<compile_context>
chip_gen: v5e
topology: v5e:2x2
jax: 0.10.0
libtpu: 0.0.40
codegen_flags: <defaults>
</compile_context>

<pallas_src>
import functools
import math

import jax
import jax.numpy as jnp
from jax.experimental import pallas as pl
from jax.experimental.pallas import tpu as pltpu


# ------------------------------ small helpers -------------------------------

def _choose_tm(m):
    """M-tile: >=2 grid steps when possible, multiple of 8, capped at 1024."""
    if m <= 8:
        return m
    tm = min(1024, -(-m // 2))     # ceil(m/2), capped
    tm = -(-tm // 8) * 8           # round up to a multiple of 8
    return min(tm, m)


def bn_fold(bn, eps=1e-3):
    """Inference BatchNorm -> (scale, shift).  eps=0.001 as in the reference."""
    gamma, beta, mean, var = bn
    scale = gamma / jnp.sqrt(var + eps)
    shift = beta - mean * scale
    return scale, shift


def dw_weight9(w_torch):
    """PyTorch depthwise weight (C,1,3,3) -> (kh*3+kw, C)."""
    return jnp.transpose(w_torch[:, 0], (1, 2, 0)).reshape(9, w_torch.shape[0])


def group_mask(groups, alpha, c):
    g_size = c // groups
    gid = jnp.arange(c) // g_size
    same = gid[:, None] == gid[None, :]
    return jnp.where(same, 1.0, alpha).astype(jnp.float32)


# ------------------------------ Pallas kernels ------------------------------

def _dw_mm_kernel(x_ref, w9_ref, bdw_ref, wmm_ref, bmm_ref, *rest,
                  dil, residual):
    """Fused depthwise-3x3(dil)+BN+ReLU -> 1x1 matmul(+BN)(+residual+ReLU).

    x_ref   (H, W, C)   bf16 input block (one image)
    w9_ref  (9, C)      f32 depthwise taps (BN folded)
    bdw_ref (1, C)      f32 depthwise bias (BN folded)
    wmm_ref (C, Cout)   bf16 1x1 weight (mask + BN folded)
    bmm_ref (1, Cout)   f32 1x1 bias (BN folded)
    rest = (res_ref?, o_ref, acc_ref)
    """
    if residual:
        res_ref, o_ref, acc_ref = rest
    else:
        res_ref = None
        o_ref, acc_ref = rest
    H, W, C = x_ref.shape

    w9 = w9_ref[...]                                          # (9, C) f32
    # Depthwise 3x3 shift-accumulate on the VPU (f32); borders handled by the
    # static window bounds -- no HBM/VMEM padded copy is ever materialized.
    acc_ref[...] = x_ref[...].astype(jnp.float32) * w9[4].reshape(1, 1, C)
    for kh in range(3):
        for kw in range(3):
            if kh == 1 and kw == 1:
                continue
            dh = (kh - 1) * dil
            dw = (kw - 1) * dil
            hh = H - abs(dh)
            ww = W - abs(dw)
            if hh <= 0 or ww <= 0:        # tap lies entirely in the zero pad
                continue
            # TODO(synk): W-axis offsets are unaligned sublane slices; a
            # pltpu.roll + mask variant would avoid per-tap relayout copies.
            src = x_ref[max(0, dh):max(0, dh) + hh,
                        max(0, dw):max(0, dw) + ww, :].astype(jnp.float32)
            oh0, ow0 = max(0, -dh), max(0, -dw)
            acc_ref[oh0:oh0 + hh, ow0:ow0 + ww, :] += (
                src * w9[kh * 3 + kw].reshape(1, 1, C))

    bdw = bdw_ref[...]                                        # (1, C)    f32
    wmm = wmm_ref[...]                                        # (C, Cout) bf16
    bmm = bmm_ref[...]                                        # (1, Cout) f32

    def row(h, carry):
        hid = jnp.maximum(acc_ref[h] + bdw, 0.0)              # (W, C) BN+ReLU
        y = jnp.dot(hid.astype(jnp.bfloat16), wmm,
                    preferred_element_type=jnp.float32) + bmm
        if residual:
            y = jnp.maximum(y + res_ref[h].astype(jnp.float32), 0.0)
        o_ref[h] = y.astype(o_ref.dtype)
        return carry

    jax.lax.fori_loop(0, H, row, 0)


def dw_mm_fused(x, w9, bdw, wmm, bmm, dil, residual=None):
    """One fused pallas_call per conv_module half.  Grid over batch images."""
    B, H, W, C = x.shape
    Cout = wmm.shape[1]
    has_res = residual is not None
    # TODO(synk): at production resolutions the per-image block should be
    # H-tiled with a dil-row halo (and vmem_limit_bytes raised) for v7x's
    # 64 MiB VMEM / 2 TensorCores; whole-image blocks are fine at these sizes.
    in_specs = [pl.BlockSpec((None, H, W, C), lambda b: (b, 0, 0, 0)),
                pl.BlockSpec((9, C), lambda b: (0, 0)),
                pl.BlockSpec((1, C), lambda b: (0, 0)),
                pl.BlockSpec((C, Cout), lambda b: (0, 0)),
                pl.BlockSpec((1, Cout), lambda b: (0, 0))]
    args = [x.astype(jnp.bfloat16),
            w9.astype(jnp.float32),
            bdw.reshape(1, C).astype(jnp.float32),
            wmm.astype(jnp.bfloat16),
            bmm.reshape(1, Cout).astype(jnp.float32)]
    if has_res:
        in_specs.append(pl.BlockSpec((None, H, W, Cout), lambda b: (b, 0, 0, 0)))
        args.append(residual.astype(jnp.bfloat16))
    return pl.pallas_call(
        functools.partial(_dw_mm_kernel, dil=dil, residual=has_res),
        out_shape=jax.ShapeDtypeStruct((B, H, W, Cout), jnp.bfloat16),
        grid=(B,),
        in_specs=in_specs,
        out_specs=pl.BlockSpec((None, H, W, Cout), lambda b: (b, 0, 0, 0)),
        scratch_shapes=[pltpu.VMEM((H, W, C), jnp.float32)],
        compiler_params=pltpu.CompilerParams(dimension_semantics=("parallel",)),
    )(*args)


def _matmul_kernel(x_ref, w_ref, b_ref, o_ref, *, relu):
    acc = jnp.dot(x_ref[...], w_ref[...], preferred_element_type=jnp.float32)
    y = acc + b_ref[...]
    if relu:
        y = jnp.maximum(y, 0.0)
    o_ref[...] = y.astype(o_ref.dtype)


def matmul_fused(x, w, b, relu=False, out_dtype=jnp.float32):
    """(M,K)@(K,N)+b with optional ReLU; bf16 operands, f32 accumulate."""
    M, K = x.shape
    N = w.shape[1]
    tm = _choose_tm(M)
    return pl.pallas_call(
        functools.partial(_matmul_kernel, relu=relu),
        out_shape=jax.ShapeDtypeStruct((M, N), out_dtype),
        grid=(pl.cdiv(M, tm),),
        in_specs=[pl.BlockSpec((tm, K), lambda i: (i, 0)),
                  pl.BlockSpec((K, N), lambda i: (0, 0)),
                  pl.BlockSpec((1, N), lambda i: (0, 0))],
        out_specs=pl.BlockSpec((tm, N), lambda i: (i, 0)),
        compiler_params=pltpu.CompilerParams(dimension_semantics=("parallel",)),
    )(x.astype(jnp.bfloat16), w.astype(jnp.bfloat16),
      b.reshape(1, N).astype(jnp.float32))


def _downsampler_kernel(col_ref, w_ref, pmat_ref, b_ref, o_ref, *, cin):
    # Conv channels: im2col matmul (BN folded into w/b, zero pool columns).
    # Pool channels: the 2x2 maxpool taps are exactly im2col patches 4,5,7,8 --
    # slice them from col, max in f32, BN-scale + place via a bf16 matmul so
    # the full-width (lane-dense) output is written in one pass.
    col = col_ref[...]                                          # (tm, 9*Cin) bf16
    conv = jnp.dot(col, w_ref[...], preferred_element_type=jnp.float32)
    p00 = col_ref[:, 4 * cin:5 * cin].astype(jnp.float32)
    p01 = col_ref[:, 5 * cin:6 * cin].astype(jnp.float32)
    p10 = col_ref[:, 7 * cin:8 * cin].astype(jnp.float32)
    p11 = col_ref[:, 8 * cin:9 * cin].astype(jnp.float32)
    pool = jnp.maximum(jnp.maximum(p00, p01), jnp.maximum(p10, p11))
    placed = jnp.dot(pool.astype(jnp.bfloat16), pmat_ref[...],
                     preferred_element_type=jnp.float32)
    o_ref[...] = jnp.maximum(conv + placed + b_ref[...], 0.0).astype(o_ref.dtype)


# ------------------------------- block wrappers ------------------------------

def downsampler_block(x, p):
    """DownsamplerBlock: cat([conv3x3 s2, maxpool 2x2]) -> BN -> ReLU, fused."""
    B, H, W, Cin = x.shape
    assert H % 2 == 0 and W % 2 == 0, "DownsamplerBlock needs even spatial dims"
    Cconv = p['conv_w'].shape[0]
    Cout = Cconv + Cin
    Ho, Wo = H // 2, W // 2
    M = B * Ho * Wo

    scale, shift = bn_fold(p['bn'])
    s_conv, t_conv = scale[:Cconv], shift[:Cconv]
    s_pool, t_pool = scale[Cconv:], shift[Cconv:]

    # TODO(synk): for the 64->128 block an in-kernel shift-and-accumulate would
    # avoid the 9x im2col read amplification (biggest win on v5e); im2col kept.
    xb = x.astype(jnp.bfloat16)
    xp = jnp.pad(xb, ((0, 0), (1, 1), (1, 1), (0, 0)))
    patches = [xp[:, kh:kh + 2 * Ho - 1:2, kw:kw + 2 * Wo - 1:2, :]
               for kh in range(3) for kw in range(3)]
    col = jnp.concatenate(patches, axis=-1).reshape(M, 9 * Cin)

    # Conv weight (Cconv,Cin,3,3) -> (9*Cin, Cout): BN-folded, zero pool columns.
    wmat = jnp.transpose(p['conv_w'], (2, 3, 1, 0)).reshape(9 * Cin, Cconv)
    wfull = jnp.concatenate(
        [wmat * s_conv[None, :], jnp.zeros((9 * Cin, Cin), jnp.float32)], axis=1)
    bfull = jnp.concatenate([p['conv_b'] * s_conv + t_conv, t_pool]).reshape(1, Cout)
    # Placement matrix for pool channels with the BN scale folded in.
    pmat = jnp.concatenate(
        [jnp.zeros((Cin, Cconv), jnp.float32), jnp.diag(s_pool)], axis=1)

    tm = _choose_tm(M)
    out = pl.pallas_call(
        functools.partial(_downsampler_kernel, cin=Cin),
        out_shape=jax.ShapeDtypeStruct((M, Cout), jnp.bfloat16),
        grid=(pl.cdiv(M, tm),),
        in_specs=[pl.BlockSpec((tm, 9 * Cin), lambda i: (i, 0)),
                  pl.BlockSpec((9 * Cin, Cout), lambda i: (0, 0)),
                  pl.BlockSpec((Cin, Cout), lambda i: (0, 0)),
                  pl.BlockSpec((1, Cout), lambda i: (0, 0))],
        out_specs=pl.BlockSpec((tm, Cout), lambda i: (i, 0)),
        compiler_params=pltpu.CompilerParams(dimension_semantics=("parallel",)),
    )(col, wfull.astype(jnp.bfloat16), pmat.astype(jnp.bfloat16),
      bfull.astype(jnp.float32))
    return out.reshape(B, Ho, Wo, Cout)


def conv_module_fwd(x, p, dil, groups, alpha=1.0):
    """dw3x3+BN+ReLU+1x1(mask)+BN  ->  dw3x3(dil)+BN+ReLU+1x1(mask)+BN+res+ReLU."""
    C = x.shape[-1]
    s11, t11 = bn_fold(p['bn1_1'])
    s21, t21 = bn_fold(p['bn2_1'])
    s12, t12 = bn_fold(p['bn1_2'])
    s22, t22 = bn_fold(p['bn2_2'])
    mask = group_mask(groups, alpha, C)

    # first half: dwconv#1 (BN1_1 folded, ReLU) fused with masked 1x1 (BN2_1)
    w9_1 = dw_weight9(p['w3_1']) * s11[None, :]
    b9_1 = p['b3_1'] * s11 + t11
    w1_1 = jnp.transpose(p['w1_1'][:, :, 0, 0] * mask) * s21[None, :]
    b1_1 = p['b1_1'] * s21 + t21
    t2 = dw_mm_fused(x, w9_1, b9_1, w1_1, b1_1, dil=1)

    # second half: dilated dwconv#2 (BN1_2, ReLU) fused with masked 1x1 (BN2_2)
    # + residual + ReLU.
    # TODO(synk): Dropout2d skipped (eval-mode identity); training dropout not reproduced.
    w9_2 = dw_weight9(p['w3_2']) * s12[None, :]
    b9_2 = p['b3_2'] * s12 + t12
    w1_2 = jnp.transpose(p['w1_2'][:, :, 0, 0] * mask) * s22[None, :]
    b1_2 = p['b1_2'] * s22 + t22
    return dw_mm_fused(t2, w9_2, b9_2, w1_2, b1_2, dil=dil, residual=x)


# ------------------------- deterministic parameters --------------------------

def init_bn(key, c):
    k = jax.random.split(key, 4)
    gamma = 1.0 + 0.1 * jax.random.normal(k[0], (c,), jnp.float32)
    beta = 0.1 * jax.random.normal(k[1], (c,), jnp.float32)
    mean = 0.1 * jax.random.normal(k[2], (c,), jnp.float32)
    var = 0.5 + jax.random.uniform(k[3], (c,), jnp.float32)
    # TODO(synk): inference-mode BN (running stats); training-mode batch stats
    # of the reference nn.BatchNorm2d are not reproduced.
    return (gamma, beta, mean, var)


def init_downsampler(key, cin, cout):
    k = jax.random.split(key, 3)
    cconv = cout - cin
    s = 1.0 / math.sqrt(cin * 9)
    return {'conv_w': jax.random.uniform(k[0], (cconv, cin, 3, 3), jnp.float32, -s, s),
            'conv_b': jax.random.uniform(k[1], (cconv,), jnp.float32, -s, s),
            'bn': init_bn(k[2], cout)}


def init_conv_module(key, c):
    k = jax.random.split(key, 12)
    s3 = 1.0 / math.sqrt(9)
    s1 = 1.0 / math.sqrt(c)
    return {
        'w3_1': jax.random.uniform(k[0], (c, 1, 3, 3), jnp.float32, -s3, s3),
        'b3_1': jax.random.uniform(k[1], (c,), jnp.float32, -s3, s3),
        'bn1_1': init_bn(k[2], c),
        'w1_1': jax.random.uniform(k[3], (c, c, 1, 1), jnp.float32, -s1, s1),
        'b1_1': jax.random.uniform(k[4], (c,), jnp.float32, -s1, s1),
        'bn2_1': init_bn(k[5], c),
        'w3_2': jax.random.uniform(k[6], (c, 1, 3, 3), jnp.float32, -s3, s3),
        'b3_2': jax.random.uniform(k[7], (c,), jnp.float32, -s3, s3),
        'bn1_2': init_bn(k[8], c),
        'w1_2': jax.random.uniform(k[9], (c, c, 1, 1), jnp.float32, -s1, s1),
        'b1_2': jax.random.uniform(k[10], (c,), jnp.float32, -s1, s1),
        'bn2_2': init_bn(k[11], c),
    }


def init_encoder(key, num_classes, groups):
    keys = iter(jax.random.split(key, 32))
    params = {'initial': init_downsampler(next(keys), 3, 16)}
    layers, arch = [], []
    layers.append(init_downsampler(next(keys), 16, 64)); arch.append(('down',))
    for _ in range(5):
        layers.append(init_conv_module(next(keys), 64)); arch.append(('conv', 1, 1))
    layers.append(init_downsampler(next(keys), 64, 128)); arch.append(('down',))
    for _ in range(2):
        for dil in (2, 4, 8, 16):
            layers.append(init_conv_module(next(keys), 128))
            arch.append(('conv', dil, groups))
    params['layers'] = layers
    s = 1.0 / math.sqrt(128)
    params['out_w'] = jax.random.uniform(next(keys), (num_classes, 128, 1, 1),
                                         jnp.float32, -s, s)
    params['out_b'] = jax.random.uniform(next(keys), (num_classes,),
                                         jnp.float32, -s, s)
    return params, tuple(arch)


# ------------------------------ encoder forward ------------------------------

def encoder_forward(x_nchw, params, arch, alpha=1.0, predict=False):
    x = jnp.transpose(x_nchw, (0, 2, 3, 1)).astype(jnp.bfloat16)   # NCHW -> NHWC
    out = downsampler_block(x, params['initial'])
    for spec, p in zip(arch, params['layers']):
        if spec[0] == 'down':
            out = downsampler_block(out, p)
        else:
            _, dil, groups = spec
            # The reference Encoder.forward tests `layer is conv_module`
            # (always False), so conv_modules always use default alpha=1.0.
            out = conv_module_fwd(out, p, dil, groups, alpha=1.0)
    if predict:
        B, H, W, C = out.shape
        ncls = params['out_w'].shape[0]
        npad = -(-ncls // 128) * 128                   # lane-dense output store
        w2d = jnp.zeros((C, npad), jnp.float32).at[:, :ncls].set(
            jnp.transpose(params['out_w'][:, :, 0, 0]))
        bpad = jnp.zeros((npad,), jnp.float32).at[:ncls].set(params['out_b'])
        y = matmul_fused(out.reshape(B * H * W, C), w2d, bpad, relu=False)
        out = y[:, :ncls].reshape(B, H, W, ncls)
    return jnp.transpose(out.astype(jnp.float32), (0, 3, 1, 2))    # NHWC -> NCHW


if __name__ == "__main__":
    key = jax.random.PRNGKey(0)
    kp, kx = jax.random.split(key)
    num_classes, groups = 5, 2
    params, arch = init_encoder(kp, num_classes, groups)
    x = jax.random.normal(kx, (2, 3, 16, 16), jnp.float32)          # NCHW input

    fwd = jax.jit(functools.partial(encoder_forward, arch=arch,
                                    alpha=1.0, predict=False))
    out = jax.block_until_ready(fwd(x, params))
    assert out.shape == (2, 128, 2, 2), out.shape
    assert jnp.all(jnp.isfinite(out))
    print("KERNEL_OK")
</pallas_src>

<mosaic_0001>
module attributes {stable_mosaic.version = 11 : i64} {
  func.func @_downsampler_kernel(%arg0: i32, %arg1: memref<64x27xbf16, #tpu.memory_space<vmem>>, %arg2: memref<27x16xbf16, #tpu.memory_space<vmem>>, %arg3: memref<3x16xbf16, #tpu.memory_space<vmem>>, %arg4: memref<1x16xf32, #tpu.memory_space<vmem>>, %arg5: memref<64x16xbf16, #tpu.memory_space<vmem>>) attributes {dimension_semantics = [#tpu.dimension_semantics<parallel>], iteration_bounds = array<i64: 2>, scalar_prefetch = 0 : i64, scratch_operands = 0 : i64, tpu.core_type = #tpu.core_type<tc>, window_params = [{transform_indices = @transform_0, window_bounds = array<i64: 64, 27>}, {pipeline_mode = #tpu.pipeline_mode<synchronous>, transform_indices = @transform_1, window_bounds = array<i64: 27, 16>}, {pipeline_mode = #tpu.pipeline_mode<synchronous>, transform_indices = @transform_2, window_bounds = array<i64: 3, 16>}, {pipeline_mode = #tpu.pipeline_mode<synchronous>, transform_indices = @transform_3, window_bounds = array<i64: 1, 16>}, {transform_indices = @transform_4, window_bounds = array<i64: 64, 16>}]} {
    %c0 = arith.constant 0 : index
    %c0_0 = arith.constant 0 : index
    %0 = vector.load %arg1[%c0, %c0_0] : memref<64x27xbf16, #tpu.memory_space<vmem>>, vector<64x27xbf16>
    %c0_1 = arith.constant 0 : index
    %c0_2 = arith.constant 0 : index
    %1 = vector.load %arg2[%c0_1, %c0_2] : memref<27x16xbf16, #tpu.memory_space<vmem>>, vector<27x16xbf16>
    %cst = arith.constant dense<0.000000e+00> : vector<64x16xf32>
    %2 = tpu.matmul %0, %1, %cst {dimension_numbers = #tpu.dot_dimension_numbers<[1], [0], [0], [1], [0, 0, 1, 1], [], []>} : vector<64x27xbf16>, vector<27x16xbf16>, vector<64x16xf32> -> vector<64x16xf32>
    %c0_3 = arith.constant 0 : index
    %c12 = arith.constant 12 : index
    %3 = vector.load %arg1[%c0_3, %c12] : memref<64x27xbf16, #tpu.memory_space<vmem>>, vector<64x3xbf16>
    %4 = arith.extf %3 : vector<64x3xbf16> to vector<64x3xf32>
    %c0_4 = arith.constant 0 : index
    %c15 = arith.constant 15 : index
    %5 = vector.load %arg1[%c0_4, %c15] : memref<64x27xbf16, #tpu.memory_space<vmem>>, vector<64x3xbf16>
    %6 = arith.extf %5 : vector<64x3xbf16> to vector<64x3xf32>
    %c0_5 = arith.constant 0 : index
    %c21 = arith.constant 21 : index
    %7 = vector.load %arg1[%c0_5, %c21] : memref<64x27xbf16, #tpu.memory_space<vmem>>, vector<64x3xbf16>
    %8 = arith.extf %7 : vector<64x3xbf16> to vector<64x3xf32>
    %c0_6 = arith.constant 0 : index
    %c24 = arith.constant 24 : index
    %9 = vector.load %arg1[%c0_6, %c24] : memref<64x27xbf16, #tpu.memory_space<vmem>>, vector<64x3xbf16>
    %10 = arith.extf %9 : vector<64x3xbf16> to vector<64x3xf32>
    %11 = arith.maximumf %4, %6 : vector<64x3xf32>
    %12 = arith.maximumf %8, %10 : vector<64x3xf32>
    %13 = arith.maximumf %11, %12 : vector<64x3xf32>
    %14 = arith.truncf %13 : vector<64x3xf32> to vector<64x3xbf16>
    %c0_7 = arith.constant 0 : index
    %c0_8 = arith.constant 0 : index
    %15 = vector.load %arg3[%c0_7, %c0_8] : memref<3x16xbf16, #tpu.memory_space<vmem>>, vector<3x16xbf16>
    %cst_9 = arith.constant dense<0.000000e+00> : vector<64x16xf32>
    %16 = tpu.matmul %14, %15, %cst_9 {dimension_numbers = #tpu.dot_dimension_numbers<[1], [0], [0], [1], [0, 0, 1, 1], [], []>} : vector<64x3xbf16>, vector<3x16xbf16>, vector<64x16xf32> -> vector<64x16xf32>
    %17 = arith.addf %2, %16 : vector<64x16xf32>
    %c0_10 = arith.constant 0 : index
    %c0_11 = arith.constant 0 : index
    %18 = vector.load %arg4[%c0_10, %c0_11] : memref<1x16xf32, #tpu.memory_space<vmem>>, vector<1x16xf32>
    %19 = vector.broadcast %18 : vector<1x16xf32> to vector<64x16xf32>
    %20 = arith.addf %17, %19 : vector<64x16xf32>
    %cst_12 = arith.constant 0.000000e+00 : f32
    %21 = vector.broadcast %cst_12 : f32 to vector<64x16xf32>
    %22 = arith.maximumf %20, %21 : vector<64x16xf32>
    %23 = arith.truncf %22 : vector<64x16xf32> to vector<64x16xbf16>
    %c0_13 = arith.constant 0 : index
    %c0_14 = arith.constant 0 : index
    %24 = vector.load %arg5[%c0_13, %c0_14] : memref<64x16xbf16, #tpu.memory_space<vmem>>, vector<64x16xbf16>
    tpu.vector_store %arg5[%c0_13, %c0_14], %23 {strides = array<i32>} : memref<64x16xbf16, #tpu.memory_space<vmem>>, vector<64x16xbf16>,
    return
  }
  func.func @transform_0(%arg0: i32) -> (i32, i32) {
    %c0_i32 = arith.constant 0 : i32
    %c0_i32_0 = arith.constant 0 : i32
    return %arg0, %c0_i32 : i32, i32
  }
  func.func @transform_1(%arg0: i32) -> (i32, i32) {
    %c0_i32 = arith.constant 0 : i32
    %c0_i32_0 = arith.constant 0 : i32
    %c0_i32_1 = arith.constant 0 : i32
    return %c0_i32, %c0_i32_0 : i32, i32
  }
  func.func @transform_2(%arg0: i32) -> (i32, i32) {
    %c0_i32 = arith.constant 0 : i32
    %c0_i32_0 = arith.constant 0 : i32
    %c0_i32_1 = arith.constant 0 : i32
    return %c0_i32, %c0_i32_0 : i32, i32
  }
  func.func @transform_3(%arg0: i32) -> (i32, i32) {
    %c0_i32 = arith.constant 0 : i32
    %c0_i32_0 = arith.constant 0 : i32
    %c0_i32_1 = arith.constant 0 : i32
    return %c0_i32, %c0_i32_0 : i32, i32
  }
  func.func @transform_4(%arg0: i32) -> (i32, i32) {
    %c0_i32 = arith.constant 0 : i32
    %c0_i32_0 = arith.constant 0 : i32
    return %arg0, %c0_i32 : i32, i32
  }
}

module attributes {stable_mosaic.version = 11 : i64} {
  func.func @_downsampler_kernel(%arg0: i32, %arg1: memref<16x144xbf16, #tpu.memory_space<vmem>>, %arg2: memref<144x64xbf16, #tpu.memory_space<vmem>>, %arg3: memref<16x64xbf16, #tpu.memory_space<vmem>>, %arg4: memref<1x64xf32, #tpu.memory_space<vmem>>, %arg5: memref<16x64xbf16, #tpu.memory_space<vmem>>) attributes {dimension_semantics = [#tpu.dimension_semantics<parallel>], iteration_bounds = array<i64: 2>, scalar_prefetch = 0 : i64, scratch_operands = 0 : i64, tpu.core_type = #tpu.core_type<tc>, window_params = [{transform_indices = @transform_0, window_bounds = array<i64: 16, 144>}, {pipeline_mode = #tpu.pipeline_mode<synchronous>, transform_indices = @transform_1, window_bounds = array<i64: 144, 64>}, {pipeline_mode = #tpu.pipeline_mode<synchronous>, transform_indices = @transform_2, window_bounds = array<i64: 16, 64>}, {pipeline_mode = #tpu.pipeline_mode<synchronous>, transform_indices = @transform_3, window_bounds = array<i64: 1, 64>}, {transform_indices = @transform_4, window_bounds = array<i64: 16, 64>}]} {
    %c0 = arith.constant 0 : index
    %c0_0 = arith.constant 0 : index
    %0 = vector.load %arg1[%c0, %c0_0] : memref<16x144xbf16, #tpu.memory_space<vmem>>, vector<16x144xbf16>
    %c0_1 = arith.constant 0 : index
    %c0_2 = arith.constant 0 : index
    %1 = vector.load %arg2[%c0_1, %c0_2] : memref<144x64xbf16, #tpu.memory_space<vmem>>, vector<144x64xbf16>
    %cst = arith.constant dense<0.000000e+00> : vector<16x64xf32>
    %2 = tpu.matmul %0, %1, %cst {dimension_numbers = #tpu.dot_dimension_numbers<[1], [0], [0], [1], [0, 0, 1, 1], [], []>} : vector<16x144xbf16>, vector<144x64xbf16>, vector<16x64xf32> -> vector<16x64xf32>
    %c0_3 = arith.constant 0 : index
    %c64 = arith.constant 64 : index
    %3 = vector.load %arg1[%c0_3, %c64] : memref<16x144xbf16, #tpu.memory_space<vmem>>, vector<16x16xbf16>
    %4 = arith.extf %3 : vector<16x16xbf16> to vector<16x16xf32>
    %c0_4 = arith.constant 0 : index
    %c80 = arith.constant 80 : index
    %5 = vector.load %arg1[%c0_4, %c80] : memref<16x144xbf16, #tpu.memory_space<vmem>>, vector<16x16xbf16>
    %6 = arith.extf %5 : vector<16x16xbf16> to vector<16x16xf32>
    %c0_5 = arith.constant 0 : index
    %c112 = arith.constant 112 : index
    %7 = vector.load %arg1[%c0_5, %c112] : memref<16x144xbf16, #tpu.memory_space<vmem>>, vector<16x16xbf16>
    %8 = arith.extf %7 : vector<16x16xbf16> to vector<16x16xf32>
    %c0_6 = arith.constant 0 : index
    %c128 = arith.constant 128 : index
    %9 = vector.load %arg1[%c0_6, %c128] : memref<16x144xbf16, #tpu.memory_space<vmem>>, vector<16x16xbf16>
    %10 = arith.extf %9 : vector<16x16xbf16> to vector<16x16xf32>
    %11 = arith.maximumf %4, %6 : vector<16x16xf32>
    %12 = arith.maximumf %8, %10 : vector<16x16xf32>
    %13 = arith.maximumf %11, %12 : vector<16x16xf32>
    %14 = arith.truncf %13 : vector<16x16xf32> to vector<16x16xbf16>
    %c0_7 = arith.constant 0 : index
    %c0_8 = arith.constant 0 : index
    %15 = vector.load %arg3[%c0_7, %c0_8] : memref<16x64xbf16, #tpu.memory_space<vmem>>, vector<16x64xbf16>
    %cst_9 = arith.constant dense<0.000000e+00> : vector<16x64xf32>
    %16 = tpu.matmul %14, %15, %cst_9 {dimension_numbers = #tpu.dot_dimension_numbers<[1], [0], [0], [1], [0, 0, 1, 1], [], []>} : vector<16x16xbf16>, vector<16x64xbf16>, vector<16x64xf32> -> vector<16x64xf32>
    %17 = arith.addf %2, %16 : vector<16x64xf32>
    %c0_10 = arith.constant 0 : index
    %c0_11 = arith.constant 0 : index
    %18 = vector.load %arg4[%c0_10, %c0_11] : memref<1x64xf32, #tpu.memory_space<vmem>>, vector<1x64xf32>
    %19 = vector.broadcast %18 : vector<1x64xf32> to vector<16x64xf32>
    %20 = arith.addf %17, %19 : vector<16x64xf32>
    %cst_12 = arith.constant 0.000000e+00 : f32
    %21 = vector.broadcast %cst_12 : f32 to vector<16x64xf32>
    %22 = arith.maximumf %20, %21 : vector<16x64xf32>
    %23 = arith.truncf %22 : vector<16x64xf32> to vector<16x64xbf16>
    %c0_13 = arith.constant 0 : index
    %c0_14 = arith.constant 0 : index
    %24 = vector.load %arg5[%c0_13, %c0_14] : memref<16x64xbf16, #tpu.memory_space<vmem>>, vector<16x64xbf16>
    tpu.vector_store %arg5[%c0_13, %c0_14], %23 {strides = array<i32>} : memref<16x64xbf16, #tpu.memory_space<vmem>>, vector<16x64xbf16>,
    return
  }
  func.func @transform_0(%arg0: i32) -> (i32, i32) {
    %c0_i32 = arith.constant 0 : i32
    %c0_i32_0 = arith.constant 0 : i32
    return %arg0, %c0_i32 : i32, i32
  }
  func.func @transform_1(%arg0: i32) -> (i32, i32) {
    %c0_i32 = arith.constant 0 : i32
    %c0_i32_0 = arith.constant 0 : i32
    %c0_i32_1 = arith.constant 0 : i32
    return %c0_i32, %c0_i32_0 : i32, i32
  }
  func.func @transform_2(%arg0: i32) -> (i32, i32) {
    %c0_i32 = arith.constant 0 : i32
    %c0_i32_0 = arith.constant 0 : i32
    %c0_i32_1 = arith.constant 0 : i32
    return %c0_i32, %c0_i32_0 : i32, i32
  }
  func.func @transform_3(%arg0: i32) -> (i32, i32) {
    %c0_i32 = arith.constant 0 : i32
    %c0_i32_0 = arith.constant 0 : i32
    %c0_i32_1 = arith.constant 0 : i32
    return %c0_i32, %c0_i32_0 : i32, i32
  }
  func.func @transform_4(%arg0: i32) -> (i32, i32) {
    %c0_i32 = arith.constant 0 : i32
    %c0_i32_0 = arith.constant 0 : i32
    return %arg0, %c0_i32 : i32, i32
  }
}

module attributes {stable_mosaic.version = 11 : i64} {
  func.func @_dw_mm_kernel(%arg0: i32, %arg1: memref<1x4x4x64xbf16, #tpu.memory_space<vmem>>, %arg2: memref<9x64xf32, #tpu.memory_space<vmem>>, %arg3: memref<1x64xf32, #tpu.memory_space<vmem>>, %arg4: memref<64x64xbf16, #tpu.memory_space<vmem>>, %arg5: memref<1x64xf32, #tpu.memory_space<vmem>>, %arg6: memref<1x4x4x64xbf16, #tpu.memory_space<vmem>>, %arg7: memref<4x4x64xf32, #tpu.memory_space<vmem>>) attributes {dimension_semantics = [#tpu.dimension_semantics<parallel>], iteration_bounds = array<i64: 2>, scalar_prefetch = 0 : i64, scratch_operands = 1 : i64, tpu.core_type = #tpu.core_type<tc>, window_params = [{transform_indices = @transform_0, window_bounds = array<i64: 1, 4, 4, 64>}, {pipeline_mode = #tpu.pipeline_mode<synchronous>, transform_indices = @transform_1, window_bounds = array<i64: 9, 64>}, {pipeline_mode = #tpu.pipeline_mode<synchronous>, transform_indices = @transform_2, window_bounds = array<i64: 1, 64>}, {pipeline_mode = #tpu.pipeline_mode<synchronous>, transform_indices = @transform_3, window_bounds = array<i64: 64, 64>}, {pipeline_mode = #tpu.pipeline_mode<synchronous>, transform_indices = @transform_4, window_bounds = array<i64: 1, 64>}, {transform_indices = @transform_5, window_bounds = array<i64: 1, 4, 4, 64>}]} {
    %c0 = arith.constant 0 : index
    %c0_0 = arith.constant 0 : index
    %0 = vector.load %arg2[%c0, %c0_0] : memref<9x64xf32, #tpu.memory_space<vmem>>, vector<9x64xf32>
    %c0_1 = arith.constant 0 : index
    %c0_2 = arith.constant 0 : index
    %c0_3 = arith.constant 0 : index
    %c0_4 = arith.constant 0 : index
    %1 = vector.load %arg1[%c0_1, %c0_2, %c0_3, %c0_4] : memref<1x4x4x64xbf16, #tpu.memory_space<vmem>>, vector<1x4x4x64xbf16>
    %2 = vector.shape_cast %1 : vector<1x4x4x64xbf16> to vector<4x4x64xbf16>
    %3 = arith.extf %2 : vector<4x4x64xbf16> to vector<4x4x64xf32>
    %4 = vector.extract_strided_slice %0 {offsets = [4, 0], sizes = [1, 64], strides = [1, 1]} : vector<9x64xf32> to vector<1x64xf32>
    %5 = vector.shape_cast %4 : vector<1x64xf32> to vector<64xf32>
    %6 = vector.shape_cast %5 : vector<64xf32> to vector<1x1x64xf32>
    %7 = vector.broadcast %6 : vector<1x1x64xf32> to vector<4x4x64xf32>
    %8 = arith.mulf %3, %7 : vector<4x4x64xf32>
    %c0_5 = arith.constant 0 : index
    %c0_6 = arith.constant 0 : index
    %c0_7 = arith.constant 0 : index
    %9 = vector.load %arg7[%c0_5, %c0_6, %c0_7] : memref<4x4x64xf32, #tpu.memory_space<vmem>>, vector<4x4x64xf32>
    tpu.vector_store %arg7[%c0_5, %c0_6, %c0_7], %8 {strides = array<i32>} : memref<4x4x64xf32, #tpu.memory_space<vmem>>, vector<4x4x64xf32>,
    %c0_8 = arith.constant 0 : index
    %c0_9 = arith.constant 0 : index
    %c0_10 = arith.constant 0 : index
    %c0_11 = arith.constant 0 : index
    %10 = vector.load %arg1[%c0_8, %c0_9, %c0_10, %c0_11] : memref<1x4x4x64xbf16, #tpu.memory_space<vmem>>, vector<1x3x3x64xbf16>
    %11 = vector.shape_cast %10 : vector<1x3x3x64xbf16> to vector<3x3x64xbf16>
    %12 = arith.extf %11 : vector<3x3x64xbf16> to vector<3x3x64xf32>
    %c1 = arith.constant 1 : index
    %c1_12 = arith.constant 1 : index
    %c0_13 = arith.constant 0 : index
    %13 = vector.load %arg7[%c1, %c1_12, %c0_13] : memref<4x4x64xf32, #tpu.memory_space<vmem>>, vector<3x3x64xf32>
    %14 = vector.extract_strided_slice %0 {offsets = [0, 0], sizes = [1, 64], strides = [1, 1]} : vector<9x64xf32> to vector<1x64xf32>
    %15 = vector.shape_cast %14 : vector<1x64xf32> to vector<64xf32>
    %16 = vector.shape_cast %15 : vector<64xf32> to vector<1x1x64xf32>
    %17 = vector.broadcast %16 : vector<1x1x64xf32> to vector<3x3x64xf32>
    %18 = arith.mulf %12, %17 : vector<3x3x64xf32>
    %19 = arith.addf %13, %18 : vector<3x3x64xf32>
    %c1_14 = arith.constant 1 : index
    %c1_15 = arith.constant 1 : index
    %c0_16 = arith.constant 0 : index
    %20 = vector.load %arg7[%c1_14, %c1_15, %c0_16] : memref<4x4x64xf32, #tpu.memory_space<vmem>>, vector<3x3x64xf32>
    tpu.vector_store %arg7[%c1_14, %c1_15, %c0_16], %19 {strides = array<i32>} : memref<4x4x64xf32, #tpu.memory_space<vmem>>, vector<3x3x64xf32>,
    %c0_17 = arith.constant 0 : index
    %c0_18 = arith.constant 0 : index
    %c0_19 = arith.constant 0 : index
    %c0_20 = arith.constant 0 : index
    %21 = vector.load %arg1[%c0_17, %c0_18, %c0_19, %c0_20] : memref<1x4x4x64xbf16, #tpu.memory_space<vmem>>, vector<1x3x4x64xbf16>
    %22 = vector.shape_cast %21 : vector<1x3x4x64xbf16> to vector<3x4x64xbf16>
    %23 = arith.extf %22 : vector<3x4x64xbf16> to vector<3x4x64xf32>
    %c1_21 = arith.constant 1 : index
    %c0_22 = arith.constant 0 : index
    %c0_23 = arith.constant 0 : index
    %24 = vector.load %arg7[%c1_21, %c0_22, %c0_23] : memref<4x4x64xf32, #tpu.memory_space<vmem>>, vector<3x4x64xf32>
    %25 = vector.extract_strided_slice %0 {offsets = [1, 0], sizes = [1, 64], strides = [1, 1]} : vector<9x64xf32> to vector<1x64xf32>
    %26 = vector.shape_cast %25 : vector<1x64xf32> to vector<64xf32>
    %27 = vector.shape_cast %26 : vector<64xf32> to vector<1x1x64xf32>
    %28 = vector.broadcast %27 : vector<1x1x64xf32> to vector<3x4x64xf32>
    %29 = arith.mulf %23, %28 : vector<3x4x64xf32>
    %30 = arith.addf %24, %29 : vector<3x4x64xf32>
    %c1_24 = arith.constant 1 : index
    %c0_25 = arith.constant 0 : index
    %c0_26 = arith.constant 0 : index
    %31 = vector.load %arg7[%c1_24, %c0_25, %c0_26] : memref<4x4x64xf32, #tpu.memory_space<vmem>>, vector<3x4x64xf32>
    tpu.vector_store %arg7[%c1_24, %c0_25, %c0_26], %30 {strides = array<i32>} : memref<4x4x64xf32, #tpu.memory_space<vmem>>, vector<3x4x64xf32>,
    %c0_27 = arith.constant 0 : index
    %c0_28 = arith.constant 0 : index
    %c1_29 = arith.constant 1 : index
    %c0_30 = arith.constant 0 : index
    %32 = vector.load %arg1[%c0_27, %c0_28, %c1_29, %c0_30] : memref<1x4x4x64xbf16, #tpu.memory_space<vmem>>, vector<1x3x3x64xbf16>
    %33 = vector.shape_cast %32 : vector<1x3x3x64xbf16> to vector<3x3x64xbf16>
    %34 = arith.extf %33 : vector<3x3x64xbf16> to vector<3x3x64xf32>
    %c1_31 = arith.constant 1 : index
    %c0_32 = arith.constant 0 : index
    %c0_33 = arith.constant 0 : index
    %35 = vector.load %arg7[%c1_31, %c0_32, %c0_33] : memref<4x4x64xf32, #tpu.memory_space<vmem>>, vector<3x3x64xf32>
    %36 = vector.extract_strided_slice %0 {offsets = [2, 0], sizes = [1, 64], strides = [1, 1]} : vector<9x64xf32> to vector<1x64xf32>
    %37 = vector.shape_cast %36 : vector<1x64xf32> to vector<64xf32>
    %38 = vector.shape_cast %37 : vector<64xf32> to vector<1x1x64xf32>
    %39 = vector.broadcast %38 : vector<1x1x64xf32> to vector<3x3x64xf32>
    %40 = arith.mulf %34, %39 : vector<3x3x64xf32>
    %41 = arith.addf %35, %40 : vector<3x3x64xf32>
    %c1_34 = arith.constant 1 : index
    %c0_35 = arith.constant 0 : index
    %c0_36 = arith.constant 0 : index
    %42 = vector.load %arg7[%c1_34, %c0_35, %c0_36] : memref<4x4x64xf32, #tpu.memory_space<vmem>>, vector<3x3x64xf32>
    tpu.vector_store %arg7[%c1_34, %c0_35, %c0_36], %41 {strides = array<i32>} : memref<4x4x64xf32, #tpu.memory_space<vmem>>, vector<3x3x64xf32>,
    %c0_37 = arith.constant 0 : index
    %c0_38 = arith.constant 0 : index
    %c0_39 = arith.constant 0 : index
    %c0_40 = arith.constant 0 : index
    %43 = vector.load %arg1[%c0_37, %c0_38, %c0_39, %c0_40] : memref<1x4x4x64xbf16, #tpu.memory_space<vmem>>, vector<1x4x3x64xbf16>
    %44 = vector.shape_cast %43 : vector<1x4x3x64xbf16> to vector<4x3x64xbf16>
    %45 = arith.extf %44 : vector<4x3x64xbf16> to vector<4x3x64xf32>
    %c0_41 = arith.constant 0 : index
    %c1_42 = arith.constant 1 : index
    %c0_43 = arith.constant 0 : index
    %46 = vector.load %arg7[%c0_41, %c1_42, %c0_43] : memref<4x4x64xf32, #tpu.memory_space<vmem>>, vector<4x3x64xf32>
    %47 = vector.extract_strided_slice %0 {offsets = [3, 0], sizes = [1, 64], strides = [1, 1]} : vector<9x64xf32> to vector<1x64xf32>
    %48 = vector.shape_cast %47 : vector<1x64xf32> to vector<64xf32>
    %49 = vector.shape_cast %48 : vector<64xf32> to vector<1x1x64xf32>
    %50 = vector.broadcast %49 : vector<1x1x64xf32> to vector<4x3x64xf32>
    %51 = arith.mulf %45, %50 : vector<4x3x64xf32>
    %52 = arith.addf %46, %51 : vector<4x3x64xf32>
    %c0_44 = arith.constant 0 : index
    %c1_45 = arith.constant 1 : index
    %c0_46 = arith.constant 0 : index
    %53 = vector.load %arg7[%c0_44, %c1_45, %c0_46] : memref<4x4x64xf32, #tpu.memory_space<vmem>>, vector<4x3x64xf32>
    tpu.vector_store %arg7[%c0_44, %c1_45, %c0_46], %52 {strides = array<i32>} : memref<4x4x64xf32, #tpu.memory_space<vmem>>, vector<4x3x64xf32>,
    %c0_47 = arith.constant 0 : index
    %c0_48 = arith.constant 0 : index
    %c1_49 = arith.constant 1 : index
    %c0_50 = arith.constant 0 : index
    %54 = vector.load %arg1[%c0_47, %c0_48, %c1_49, %c0_50] : memref<1x4x4x64xbf16, #tpu.memory_space<vmem>>, vector<1x4x3x64xbf16>
    %55 = vector.shape_cast %54 : vector<1x4x3x64xbf16> to vector<4x3x64xbf16>
    %56 = arith.extf %55 : vector<4x3x64xbf16> to vector<4x3x64xf32>
    %c0_51 = arith.constant 0 : index
    %c0_52 = arith.constant 0 : index
    %c0_53 = arith.constant 0 : index
    %57 = vector.load %arg7[%c0_51, %c0_52, %c0_53] : memref<4x4x64xf32, #tpu.memory_space<vmem>>, vector<4x3x64xf32>
    %58 = vector.extract_strided_slice %0 {offsets = [5, 0], sizes = [1, 64], strides = [1, 1]} : vector<9x64xf32> to vector<1x64xf32>
    %59 = vector.shape_cast %58 : vector<1x64xf32> to vector<64xf32>
    %60 = vector.shape_cast %59 : vector<64xf32> to vector<1x1x64xf32>
    %61 = vector.broadcast %60 : vector<1x1x64xf32> to vector<4x3x64xf32>
    %62 = arith.mulf %56, %61 : vector<4x3x64xf32>
    %63 = arith.addf %57, %62 : vector<4x3x64xf32>
    %c0_54 = arith.constant 0 : index
    %c0_55 = arith.constant 0 : index
    %c0_56 = arith.constant 0 : index
    %64 = vector.load %arg7[%c0_54, %c0_55, %c0_56] : memref<4x4x64xf32, #tpu.memory_space<vmem>>, vector<4x3x64xf32>
    tpu.vector_store %arg7[%c0_54, %c0_55, %c0_56], %63 {strides = array<i32>} : memref<4x4x64xf32, #tpu.memory_space<vmem>>, vector<4x3x64xf32>,
    %c0_57 = arith.constant 0 : index
    %c1_58 = arith.constant 1 : index
    %c0_59 = arith.constant 0 : index
    %c0_60 = arith.constant 0 : index
    %65 = vector.load %arg1[%c0_57, %c1_58, %c0_59, %c0_60] : memref<1x4x4x64xbf16, #tpu.memory_space<vmem>>, vector<1x3x3x64xbf16>
    %66 = vector.shape_cast %65 : vector<1x3x3x64xbf16> to vector<3x3x64xbf16>
    %67 = arith.extf %66 : vector<3x3x64xbf16> to vector<3x3x64xf32>
    %c0_61 = arith.constant 0 : index
    %c1_62 = arith.constant 1 : index
    %c0_63 = arith.constant 0 : index
    %68 = vector.load %arg7[%c0_61, %c1_62, %c0_63] : memref<4x4x64xf32, #tpu.memory_space<vmem>>, vector<3x3x64xf32>
    %69 = vector.extract_strided_slice %0 {offsets = [6, 0], sizes = [1, 64], strides = [1, 1]} : vector<9x64xf32> to vector<1x64xf32>
    %70 = vector.shape_cast %69 : vector<1x64xf32> to vector<64xf32>
    %71 = vector.shape_cast %70 : vector<64xf32> to vector<1x1x64xf32>
    %72 = vector.broadcast %71 : vector<1x1x64xf32> to vector<3x3x64xf32>
    %73 = arith.mulf %67, %72 : vector<3x3x64xf32>
    %74 = arith.addf %68, %73 : vector<3x3x64xf32>
    %c0_64 = arith.constant 0 : index
    %c1_65 = arith.constant 1 : index
    %c0_66 = arith.constant 0 : index
    %75 = vector.load %arg7[%c0_64, %c1_65, %c0_66] : memref<4x4x64xf32, #tpu.memory_space<vmem>>, vector<3x3x64xf32>
    tpu.vector_store %arg7[%c0_64, %c1_65, %c0_66], %74 {strides = array<i32>} : memref<4x4x64xf32, #tpu.memory_space<vmem>>, vector<3x3x64xf32>,
    %c0_67 = arith.constant 0 : index
    %c1_68 = arith.constant 1 : index
    %c0_69 = arith.constant 0 : index
    %c0_70 = arith.constant 0 : index
    %76 = vector.load %arg1[%c0_67, %c1_68, %c0_69, %c0_70] : memref<1x4x4x64xbf16, #tpu.memory_space<vmem>>, vector<1x3x4x64xbf16>
    %77 = vector.shape_cast %76 : vector<1x3x4x64xbf16> to vector<3x4x64xbf16>
    %78 = arith.extf %77 : vector<3x4x64xbf16> to vector<3x4x64xf32>
    %c0_71 = arith.constant 0 : index
    %c0_72 = arith.constant 0 : index
    %c0_73 = arith.constant 0 : index
    %79 = vector.load %arg7[%c0_71, %c0_72, %c0_73] : memref<4x4x64xf32, #tpu.memory_space<vmem>>, vector<3x4x64xf32>
    %80 = vector.extract_strided_slice %0 {offsets = [7, 0], sizes = [1, 64], strides = [1, 1]} : vector<9x64xf32> to vector<1x64xf32>
    %81 = vector.shape_cast %80 : vector<1x64xf32> to vector<64xf32>
    %82 = vector.shape_cast %81 : vector<64xf32> to vector<1x1x64xf32>
    %83 = vector.broadcast %82 : vector<1x1x64xf32> to vector<3x4x64xf32>
    %84 = arith.mulf %78, %83 : vector<3x4x64xf32>
    %85 = arith.addf %79, %84 : vector<3x4x64xf32>
    %c0_74 = arith.constant 0 : index
    %c0_75 = arith.constant 0 : index
    %c0_76 = arith.constant 0 : index
    %86 = vector.load %arg7[%c0_74, %c0_75, %c0_76] : memref<4x4x64xf32, #tpu.memory_space<vmem>>, vector<3x4x64xf32>
    tpu.vector_store %arg7[%c0_74, %c0_75, %c0_76], %85 {strides = array<i32>} : memref<4x4x64xf32, #tpu.memory_space<vmem>>, vector<3x4x64xf32>,
    %c0_77 = arith.constant 0 : index
    %c1_78 = arith.constant 1 : index
    %c1_79 = arith.constant 1 : index
    %c0_80 = arith.constant 0 : index
    %87 = vector.load %arg1[%c0_77, %c1_78, %c1_79, %c0_80] : memref<1x4x4x64xbf16, #tpu.memory_space<vmem>>, vector<1x3x3x64xbf16>
    %88 = vector.shape_cast %87 : vector<1x3x3x64xbf16> to vector<3x3x64xbf16>
    %89 = arith.extf %88 : vector<3x3x64xbf16> to vector<3x3x64xf32>
    %c0_81 = arith.constant 0 : index
    %c0_82 = arith.constant 0 : index
    %c0_83 = arith.constant 0 : index
    %90 = vector.load %arg7[%c0_81, %c0_82, %c0_83] : memref<4x4x64xf32, #tpu.memory_space<vmem>>, vector<3x3x64xf32>
    %91 = vector.extract_strided_slice %0 {offsets = [8, 0], sizes = [1, 64], strides = [1, 1]} : vector<9x64xf32> to vector<1x64xf32>
    %92 = vector.shape_cast %91 : vector<1x64xf32> to vector<64xf32>
    %93 = vector.shape_cast %92 : vector<64xf32> to vector<1x1x64xf32>
    %94 = vector.broadcast %93 : vector<1x1x64xf32> to vector<3x3x64xf32>
    %95 = arith.mulf %89, %94 : vector<3x3x64xf32>
    %96 = arith.addf %90, %95 : vector<3x3x64xf32>
    %c0_84 = arith.constant 0 : index
    %c0_85 = arith.constant 0 : index
    %c0_86 = arith.constant 0 : index
    %97 = vector.load %arg7[%c0_84, %c0_85, %c0_86] : memref<4x4x64xf32, #tpu.memory_space<vmem>>, vector<3x3x64xf32>
    tpu.vector_store %arg7[%c0_84, %c0_85, %c0_86], %96 {strides = array<i32>} : memref<4x4x64xf32, #tpu.memory_space<vmem>>, vector<3x3x64xf32>,
    %c0_87 = arith.constant 0 : index
    %c0_88 = arith.constant 0 : index
    %98 = vector.load %arg3[%c0_87, %c0_88] : memref<1x64xf32, #tpu.memory_space<vmem>>, vector<1x64xf32>
    %c0_89 = arith.constant 0 : index
    %c0_90 = arith.constant 0 : index
    %99 = vector.load %arg4[%c0_89, %c0_90] : memref<64x64xbf16, #tpu.memory_space<vmem>>, vector<64x64xbf16>
    %c0_91 = arith.constant 0 : index
    %c0_92 = arith.constant 0 : index
    %100 = vector.load %arg5[%c0_91, %c0_92] : memref<1x64xf32, #tpu.memory_space<vmem>>, vector<1x64xf32>
    %c0_i32 = arith.constant 0 : i32
    %c4_i32 = arith.constant 4 : i32
    %101 = arith.addi %c0_i32, %c4_i32 : i32
    %c1_i32 = arith.constant 1 : i32
    scf.for %arg8 = %c0_i32 to %101 step %c1_i32  : i32 {
      %102 = arith.index_cast %arg8 : i32 to index
      %c0_94 = arith.constant 0 : index
      %c0_95 = arith.constant 0 : index
      %103 = vector.load %arg7[%102, %c0_94, %c0_95] : memref<4x4x64xf32, #tpu.memory_space<vmem>>, vector<1x4x64xf32>
      %104 = vector.shape_cast %103 : vector<1x4x64xf32> to vector<4x64xf32>
      %105 = vector.broadcast %98 : vector<1x64xf32> to vector<4x64xf32>
      %106 = arith.addf %104, %105 : vector<4x64xf32>
      %cst = arith.constant 0.000000e+00 : f32
      %107 = vector.broadcast %cst : f32 to vector<4x64xf32>
      %108 = arith.maximumf %106, %107 : vector<4x64xf32>
      %109 = arith.truncf %108 : vector<4x64xf32> to vector<4x64xbf16>
      %cst_96 = arith.constant dense<0.000000e+00> : vector<4x64xf32>
      %110 = tpu.matmul %109, %99, %cst_96 {dimension_numbers = #tpu.dot_dimension_numbers<[1], [0], [0], [1], [0, 0, 1, 1], [], []>} : vector<4x64xbf16>, vector<64x64xbf16>, vector<4x64xf32> -> vector<4x64xf32>
      %111 = vector.broadcast %100 : vector<1x64xf32> to vector<4x64xf32>
      %112 = arith.addf %110, %111 : vector<4x64xf32>
      %113 = arith.truncf %112 : vector<4x64xf32> to vector<4x64xbf16>
      %c0_97 = arith.constant 0 : index
      %114 = arith.index_cast %arg8 : i32 to index
      %c0_98 = arith.constant 0 : index
      %c0_99 = arith.constant 0 : index
      %115 = vector.load %arg6[%c0_97, %114, %c0_98, %c0_99] : memref<1x4x4x64xbf16, #tpu.memory_space<vmem>>, vector<1x1x4x64xbf16>
      %116 = vector.shape_cast %115 : vector<1x1x4x64xbf16> to vector<4x64xbf16>
      %117 = vector.shape_cast %113 : vector<4x64xbf16> to vector<1x1x4x64xbf16>
      tpu.vector_store %arg6[%c0_97, %114, %c0_98, %c0_99], %117 {strides = array<i32>} : memref<1x4x4x64xbf16, #tpu.memory_space<vmem>>, vector<1x1x4x64xbf16>,
    }
    %c4_i32_93 = arith.constant 4 : i32
    return
  }
  func.func @transform_0(%arg0: i32) -> (i32, i32, i32, i32) {
    %c0_i32 = arith.constant 0 : i32
    %c0_i32_0 = arith.constant 0 : i32
    %c0_i32_1 = arith.constant 0 : i32
    %c0_i32_2 = arith.constant 0 : i32
    return %arg0, %c0_i32, %c0_i32_0, %c0_i32_1 : i32, i32, i32, i32
  }
  func.func @transform_1(%arg0: i32) -> (i32, i32) {
    %c0_i32 = arith.constant 0 : i32
    %c0_i32_0 = arith.constant 0 : i32
    %c0_i32_1 = arith.constant 0 : i32
    return %c0_i32, %c0_i32_0 : i32, i32
  }
  func.func @transform_2(%arg0: i32) -> (i32, i32) {
    %c0_i32 = arith.constant 0 : i32
    %c0_i32_0 = arith.constant 0 : i32
    %c0_i32_1 = arith.constant 0 : i32
    return %c0_i32, %c0_i32_0 : i32, i32
  }
  func.func @transform_3(%arg0: i32) -> (i32, i32) {
    %c0_i32 = arith.constant 0 : i32
    %c0_i32_0 = arith.constant 0 : i32
    %c0_i32_1 = arith.constant 0 : i32
    return %c0_i32, %c0_i32_0 : i32, i32
  }
  func.func @transform_4(%arg0: i32) -> (i32, i32) {
    %c0_i32 = arith.constant 0 : i32
    %c0_i32_0 = arith.constant 0 : i32
    %c0_i32_1 = arith.constant 0 : i32
    return %c0_i32, %c0_i32_0 : i32, i32
  }
  func.func @transform_5(%arg0: i32) -> (i32, i32, i32, i32) {
    %c0_i32 = arith.constant 0 : i32
    %c0_i32_0 = arith.constant 0 : i32
    %c0_i32_1 = arith.constant 0 : i32
    %c0_i32_2 = arith.constant 0 : i32
    return %arg0, %c0_i32, %c0_i32_0, %c0_i32_1 : i32, i32, i32, i32
  }
}

module attributes {stable_mosaic.version = 11 : i64} {
  func.func @_dw_mm_kernel(%arg0: i32, %arg1: memref<1x4x4x64xbf16, #tpu.memory_space<vmem>>, %arg2: memref<9x64xf32, #tpu.memory_space<vmem>>, %arg3: memref<1x64xf32, #tpu.memory_space<vmem>>, %arg4: memref<64x64xbf16, #tpu.memory_space<vmem>>, %arg5: memref<1x64xf32, #tpu.memory_space<vmem>>, %arg6: memref<1x4x4x64xbf16, #tpu.memory_space<vmem>>, %arg7: memref<1x4x4x64xbf16, #tpu.memory_space<vmem>>, %arg8: memref<4x4x64xf32, #tpu.memory_space<vmem>>) attributes {dimension_semantics = [#tpu.dimension_semantics<parallel>], iteration_bounds = array<i64: 2>, scalar_prefetch = 0 : i64, scratch_operands = 1 : i64, tpu.core_type = #tpu.core_type<tc>, window_params = [{transform_indices = @transform_0, window_bounds = array<i64: 1, 4, 4, 64>}, {pipeline_mode = #tpu.pipeline_mode<synchronous>, transform_indices = @transform_1, window_bounds = array<i64: 9, 64>}, {pipeline_mode = #tpu.pipeline_mode<synchronous>, transform_indices = @transform_2, window_bounds = array<i64: 1, 64>}, {pipeline_mode = #tpu.pipeline_mode<synchronous>, transform_indices = @transform_3, window_bounds = array<i64: 64, 64>}, {pipeline_mode = #tpu.pipeline_mode<synchronous>, transform_indices = @transform_4, window_bounds = array<i64: 1, 64>}, {transform_indices = @transform_5, window_bounds = array<i64: 1, 4, 4, 64>}, {transform_indices = @transform_6, window_bounds = array<i64: 1, 4, 4, 64>}]} {
    %c0 = arith.constant 0 : index
    %c0_0 = arith.constant 0 : index
    %0 = vector.load %arg2[%c0, %c0_0] : memref<9x64xf32, #tpu.memory_space<vmem>>, vector<9x64xf32>
    %c0_1 = arith.constant 0 : index
    %c0_2 = arith.constant 0 : index
    %c0_3 = arith.constant 0 : index
    %c0_4 = arith.constant 0 : index
    %1 = vector.load %arg1[%c0_1, %c0_2, %c0_3, %c0_4] : memref<1x4x4x64xbf16, #tpu.memory_space<vmem>>, vector<1x4x4x64xbf16>
    %2 = vector.shape_cast %1 : vector<1x4x4x64xbf16> to vector<4x4x64xbf16>
    %3 = arith.extf %2 : vector<4x4x64xbf16> to vector<4x4x64xf32>
    %4 = vector.extract_strided_slice %0 {offsets = [4, 0], sizes = [1, 64], strides = [1, 1]} : vector<9x64xf32> to vector<1x64xf32>
    %5 = vector.shape_cast %4 : vector<1x64xf32> to vector<64xf32>
    %6 = vector.shape_cast %5 : vector<64xf32> to vector<1x1x64xf32>
    %7 = vector.broadcast %6 : vector<1x1x64xf32> to vector<4x4x64xf32>
    %8 = arith.mulf %3, %7 : vector<4x4x64xf32>
    %c0_5 = arith.constant 0 : index
    %c0_6 = arith.constant 0 : index
    %c0_7 = arith.constant 0 : index
    %9 = vector.load %arg8[%c0_5, %c0_6, %c0_7] : memref<4x4x64xf32, #tpu.memory_space<vmem>>, vector<4x4x64xf32>
    tpu.vector_store %arg8[%c0_5, %c0_6, %c0_7], %8 {strides = array<i32>} : memref<4x4x64xf32, #tpu.memory_space<vmem>>, vector<4x4x64xf32>,
    %c0_8 = arith.constant 0 : index
    %c0_9 = arith.constant 0 : index
    %c0_10 = arith.constant 0 : index
    %c0_11 = arith.constant 0 : index
    %10 = vector.load %arg1[%c0_8, %c0_9, %c0_10, %c0_11] : memref<1x4x4x64xbf16, #tpu.memory_space<vmem>>, vector<1x3x3x64xbf16>
    %11 = vector.shape_cast %10 : vector<1x3x3x64xbf16> to vector<3x3x64xbf16>
    %12 = arith.extf %11 : vector<3x3x64xbf16> to vector<3x3x64xf32>
    %c1 = arith.constant 1 : index
    %c1_12 = arith.constant 1 : index
    %c0_13 = arith.constant 0 : index
    %13 = vector.load %arg8[%c1, %c1_12, %c0_13] : memref<4x4x64xf32, #tpu.memory_space<vmem>>, vector<3x3x64xf32>
    %14 = vector.extract_strided_slice %0 {offsets = [0, 0], sizes = [1, 64], strides = [1, 1]} : vector<9x64xf32> to vector<1x64xf32>
    %15 = vector.shape_cast %14 : vector<1x64xf32> to vector<64xf32>
    %16 = vector.shape_cast %15 : vector<64xf32> to vector<1x1x64xf32>
    %17 = vector.broadcast %16 : vector<1x1x64xf32> to vector<3x3x64xf32>
    %18 = arith.mulf %12, %17 : vector<3x3x64xf32>
    %19 = arith.addf %13, %18 : vector<3x3x64xf32>
    %c1_14 = arith.constant 1 : index
    %c1_15 = arith.constant 1 : index
    %c0_16 = arith.constant 0 : index
    %20 = vector.load %arg8[%c1_14, %c1_15, %c0_16] : memref<4x4x64xf32, #tpu.memory_space<vmem>>, vector<3x3x64xf32>
    tpu.vector_store %arg8[%c1_14, %c1_15, %c0_16], %19 {strides = array<i32>} : memref<4x4x64xf32, #tpu.memory_space<vmem>>, vector<3x3x64xf32>,
    %c0_17 = arith.constant 0 : index
    %c0_18 = arith.constant 0 : index
    %c0_19 = arith.constant 0 : index
    %c0_20 = arith.constant 0 : index
    %21 = vector.load %arg1[%c0_17, %c0_18, %c0_19, %c0_20] : memref<1x4x4x64xbf16, #tpu.memory_space<vmem>>, vector<1x3x4x64xbf16>
    %22 = vector.shape_cast %21 : vector<1x3x4x64xbf16> to vector<3x4x64xbf16>
    %23 = arith.extf %22 : vector<3x4x64xbf16> to vector<3x4x64xf32>
    %c1_21 = arith.constant 1 : index
    %c0_22 = arith.constant 0 : index
    %c0_23 = arith.constant 0 : index
    %24 = vector.load %arg8[%c1_21, %c0_22, %c0_23] : memref<4x4x64xf32, #tpu.memory_space<vmem>>, vector<3x4x64xf32>
    %25 = vector.extract_strided_slice %0 {offsets = [1, 0], sizes = [1, 64], strides = [1, 1]} : vector<9x64xf32> to vector<1x64xf32>
    %26 = vector.shape_cast %25 : vector<1x64xf32> to vector<64xf32>
    %27 = vector.shape_cast %26 : vector<64xf32> to vector<1x1x64xf32>
    %28 = vector.broadcast %27 : vector<1x1x64xf32> to vector<3x4x64xf32>
    %29 = arith.mulf %23, %28 : vector<3x4x64xf32>
    %30 = arith.addf %24, %29 : vector<3x4x64xf32>
    %c1_24 = arith.constant 1 : index
    %c0_25 = arith.constant 0 : index
    %c0_26 = arith.constant 0 : index
    %31 = vector.load %arg8[%c1_24, %c0_25, %c0_26] : memref<4x4x64xf32, #tpu.memory_space<vmem>>, vector<3x4x64xf32>
    tpu.vector_store %arg8[%c1_24, %c0_25, %c0_26], %30 {strides = array<i32>} : memref<4x4x64xf32, #tpu.memory_space<vmem>>, vector<3x4x64xf32>,
    %c0_27 = arith.constant 0 : index
    %c0_28 = arith.constant 0 : index
    %c1_29 = arith.constant 1 : index
    %c0_30 = arith.constant 0 : index
    %32 = vector.load %arg1[%c0_27, %c0_28, %c1_29, %c0_30] : memref<1x4x4x64xbf16, #tpu.memory_space<vmem>>, vector<1x3x3x64xbf16>
    %33 = vector.shape_cast %32 : vector<1x3x3x64xbf16> to vector<3x3x64xbf16>
    %34 = arith.extf %33 : vector<3x3x64xbf16> to vector<3x3x64xf32>
    %c1_31 = arith.constant 1 : index
    %c0_32 = arith.constant 0 : index
    %c0_33 = arith.constant 0 : index
    %35 = vector.load %arg8[%c1_31, %c0_32, %c0_33] : memref<4x4x64xf32, #tpu.memory_space<vmem>>, vector<3x3x64xf32>
    %36 = vector.extract_strided_slice %0 {offsets = [2, 0], sizes = [1, 64], strides = [1, 1]} : vector<9x64xf32> to vector<1x64xf32>
    %37 = vector.shape_cast %36 : vector<1x64xf32> to vector<64xf32>
    %38 = vector.shape_cast %37 : vector<64xf32> to vector<1x1x64xf32>
    %39 = vector.broadcast %38 : vector<1x1x64xf32> to vector<3x3x64xf32>
    %40 = arith.mulf %34, %39 : vector<3x3x64xf32>
    %41 = arith.addf %35, %40 : vector<3x3x64xf32>
    %c1_34 = arith.constant 1 : index
    %c0_35 = arith.constant 0 : index
    %c0_36 = arith.constant 0 : index
    %42 = vector.load %arg8[%c1_34, %c0_35, %c0_36] : memref<4x4x64xf32, #tpu.memory_space<vmem>>, vector<3x3x64xf32>
    tpu.vector_store %arg8[%c1_34, %c0_35, %c0_36], %41 {strides = array<i32>} : memref<4x4x64xf32, #tpu.memory_space<vmem>>, vector<3x3x64xf32>,
    %c0_37 = arith.constant 0 : index
    %c0_38 = arith.constant 0 : index
    %c0_39 = arith.constant 0 : index
    %c0_40 = arith.constant 0 : index
    %43 = vector.load %arg1[%c0_37, %c0_38, %c0_39, %c0_40] : memref<1x4x4x64xbf16, #tpu.memory_space<vmem>>, vector<1x4x3x64xbf16>
    %44 = vector.shape_cast %43 : vector<1x4x3x64xbf16> to vector<4x3x64xbf16>
    %45 = arith.extf %44 : vector<4x3x64xbf16> to vector<4x3x64xf32>
    %c0_41 = arith.constant 0 : index
    %c1_42 = arith.constant 1 : index
    %c0_43 = arith.constant 0 : index
    %46 = vector.load %arg8[%c0_41, %c1_42, %c0_43] : memref<4x4x64xf32, #tpu.memory_space<vmem>>, vector<4x3x64xf32>
    %47 = vector.extract_strided_slice %0 {offsets = [3, 0], sizes = [1, 64], strides = [1, 1]} : vector<9x64xf32> to vector<1x64xf32>
    %48 = vector.shape_cast %47 : vector<1x64xf32> to vector<64xf32>
    %49 = vector.shape_cast %48 : vector<64xf32> to vector<1x1x64xf32>
    %50 = vector.broadcast %49 : vector<1x1x64xf32> to vector<4x3x64xf32>
    %51 = arith.mulf %45, %50 : vector<4x3x64xf32>
    %52 = arith.addf %46, %51 : vector<4x3x64xf32>
    %c0_44 = arith.constant 0 : index
    %c1_45 = arith.constant 1 : index
    %c0_46 = arith.constant 0 : index
    %53 = vector.load %arg8[%c0_44, %c1_45, %c0_46] : memref<4x4x64xf32, #tpu.memory_space<vmem>>, vector<4x3x64xf32>
    tpu.vector_store %arg8[%c0_44, %c1_45, %c0_46], %52 {strides = array<i32>} : memref<4x4x64xf32, #tpu.memory_space<vmem>>, vector<4x3x64xf32>,
    %c0_47 = arith.constant 0 : index
    %c0_48 = arith.constant 0 : index
    %c1_49 = arith.constant 1 : index
    %c0_50 = arith.constant 0 : index
    %54 = vector.load %arg1[%c0_47, %c0_48, %c1_49, %c0_50] : memref<1x4x4x64xbf16, #tpu.memory_space<vmem>>, vector<1x4x3x64xbf16>
    %55 = vector.shape_cast %54 : vector<1x4x3x64xbf16> to vector<4x3x64xbf16>
    %56 = arith.extf %55 : vector<4x3x64xbf16> to vector<4x3x64xf32>
    %c0_51 = arith.constant 0 : index
    %c0_52 = arith.constant 0 : index
    %c0_53 = arith.constant 0 : index
    %57 = vector.load %arg8[%c0_51, %c0_52, %c0_53] : memref<4x4x64xf32, #tpu.memory_space<vmem>>, vector<4x3x64xf32>
    %58 = vector.extract_strided_slice %0 {offsets = [5, 0], sizes = [1, 64], strides = [1, 1]} : vector<9x64xf32> to vector<1x64xf32>
    %59 = vector.shape_cast %58 : vector<1x64xf32> to vector<64xf32>
    %60 = vector.shape_cast %59 : vector<64xf32> to vector<1x1x64xf32>
    %61 = vector.broadcast %60 : vector<1x1x64xf32> to vector<4x3x64xf32>
    %62 = arith.mulf %56, %61 : vector<4x3x64xf32>
    %63 = arith.addf %57, %62 : vector<4x3x64xf32>
    %c0_54 = arith.constant 0 : index
    %c0_55 = arith.constant 0 : index
    %c0_56 = arith.constant 0 : index
    %64 = vector.load %arg8[%c0_54, %c0_55, %c0_56] : memref<4x4x64xf32, #tpu.memory_space<vmem>>, vector<4x3x64xf32>
    tpu.vector_store %arg8[%c0_54, %c0_55, %c0_56], %63 {strides = array<i32>} : memref<4x4x64xf32, #tpu.memory_space<vmem>>, vector<4x3x64xf32>,
    %c0_57 = arith.constant 0 : index
    %c1_58 = arith.constant 1 : index
    %c0_59 = arith.constant 0 : index
    %c0_60 = arith.constant 0 : index
    %65 = vector.load %arg1[%c0_57, %c1_58, %c0_59, %c0_60] : memref<1x4x4x64xbf16, #tpu.memory_space<vmem>>, vector<1x3x3x64xbf16>
    %66 = vector.shape_cast %65 : vector<1x3x3x64xbf16> to vector<3x3x64xbf16>
    %67 = arith.extf %66 : vector<3x3x64xbf16> to vector<3x3x64xf32>
    %c0_61 = arith.constant 0 : index
    %c1_62 = arith.constant 1 : index
    %c0_63 = arith.constant 0 : index
    %68 = vector.load %arg8[%c0_61, %c1_62, %c0_63] : memref<4x4x64xf32, #tpu.memory_space<vmem>>, vector<3x3x64xf32>
    %69 = vector.extract_strided_slice %0 {offsets = [6, 0], sizes = [1, 64], strides = [1, 1]} : vector<9x64xf32> to vector<1x64xf32>
    %70 = vector.shape_cast %69 : vector<1x64xf32> to vector<64xf32>
    %71 = vector.shape_cast %70 : vector<64xf32> to vector<1x1x64xf32>
    %72 = vector.broadcast %71 : vector<1x1x64xf32> to vector<3x3x64xf32>
    %73 = arith.mulf %67, %72 : vector<3x3x64xf32>
    %74 = arith.addf %68, %73 : vector<3x3x64xf32>
    %c0_64 = arith.constant 0 : index
    %c1_65 = arith.constant 1 : index
    %c0_66 = arith.constant 0 : index
    %75 = vector.load %arg8[%c0_64, %c1_65, %c0_66] : memref<4x4x64xf32, #tpu.memory_space<vmem>>, vector<3x3x64xf32>
    tpu.vector_store %arg8[%c0_64, %c1_65, %c0_66], %74 {strides = array<i32>} : memref<4x4x64xf32, #tpu.memory_space<vmem>>, vector<3x3x64xf32>,
    %c0_67 = arith.constant 0 : index
    %c1_68 = arith.constant 1 : index
    %c0_69 = arith.constant 0 : index
    %c0_70 = arith.constant 0 : index
    %76 = vector.load %arg1[%c0_67, %c1_68, %c0_69, %c0_70] : memref<1x4x4x64xbf16, #tpu.memory_space<vmem>>, vector<1x3x4x64xbf16>
    %77 = vector.shape_cast %76 : vector<1x3x4x64xbf16> to vector<3x4x64xbf16>
    %78 = arith.extf %77 : vector<3x4x64xbf16> to vector<3x4x64xf32>
    %c0_71 = arith.constant 0 : index
    %c0_72 = arith.constant 0 : index
    %c0_73 = arith.constant 0 : index
    %79 = vector.load %arg8[%c0_71, %c0_72, %c0_73] : memref<4x4x64xf32, #tpu.memory_space<vmem>>, vector<3x4x64xf32>
    %80 = vector.extract_strided_slice %0 {offsets = [7, 0], sizes = [1, 64], strides = [1, 1]} : vector<9x64xf32> to vector<1x64xf32>
    %81 = vector.shape_cast %80 : vector<1x64xf32> to vector<64xf32>
    %82 = vector.shape_cast %81 : vector<64xf32> to vector<1x1x64xf32>
    %83 = vector.broadcast %82 : vector<1x1x64xf32> to vector<3x4x64xf32>
    %84 = arith.mulf %78, %83 : vector<3x4x64xf32>
    %85 = arith.addf %79, %84 : vector<3x4x64xf32>
    %c0_74 = arith.constant 0 : index
    %c0_75 = arith.constant 0 : index
    %c0_76 = arith.constant 0 : index
    %86 = vector.load %arg8[%c0_74, %c0_75, %c0_76] : memref<4x4x64xf32, #tpu.memory_space<vmem>>, vector<3x4x64xf32>
    tpu.vector_store %arg8[%c0_74, %c0_75, %c0_76], %85 {strides = array<i32>} : memref<4x4x64xf32, #tpu.memory_space<vmem>>, vector<3x4x64xf32>,
    %c0_77 = arith.constant 0 : index
    %c1_78 = arith.constant 1 : index
    %c1_79 = arith.constant 1 : index
    %c0_80 = arith.constant 0 : index
    %87 = vector.load %arg1[%c0_77, %c1_78, %c1_79, %c0_80] : memref<1x4x4x64xbf16, #tpu.memory_space<vmem>>, vector<1x3x3x64xbf16>
    %88 = vector.shape_cast %87 : vector<1x3x3x64xbf16> to vector<3x3x64xbf16>
    %89 = arith.extf %88 : vector<3x3x64xbf16> to vector<3x3x64xf32>
    %c0_81 = arith.constant 0 : index
    %c0_82 = arith.constant 0 : index
    %c0_83 = arith.constant 0 : index
    %90 = vector.load %arg8[%c0_81, %c0_82, %c0_83] : memref<4x4x64xf32, #tpu.memory_space<vmem>>, vector<3x3x64xf32>
    %91 = vector.extract_strided_slice %0 {offsets = [8, 0], sizes = [1, 64], strides = [1, 1]} : vector<9x64xf32> to vector<1x64xf32>
    %92 = vector.shape_cast %91 : vector<1x64xf32> to vector<64xf32>
    %93 = vector.shape_cast %92 : vector<64xf32> to vector<1x1x64xf32>
    %94 = vector.broadcast %93 : vector<1x1x64xf32> to vector<3x3x64xf32>
    %95 = arith.mulf %89, %94 : vector<3x3x64xf32>
    %96 = arith.addf %90, %95 : vector<3x3x64xf32>
    %c0_84 = arith.constant 0 : index
    %c0_85 = arith.constant 0 : index
    %c0_86 = arith.constant 0 : index
    %97 = vector.load %arg8[%c0_84, %c0_85, %c0_86] : memref<4x4x64xf32, #tpu.memory_space<vmem>>, vector<3x3x64xf32>
    tpu.vector_store %arg8[%c0_84, %c0_85, %c0_86], %96 {strides = array<i32>} : memref<4x4x64xf32, #tpu.memory_space<vmem>>, vector<3x3x64xf32>,
    %c0_87 = arith.constant 0 : index
    %c0_88 = arith.constant 0 : index
    %98 = vector.load %arg3[%c0_87, %c0_88] : memref<1x64xf32, #tpu.memory_space<vmem>>, vector<1x64xf32>
    %c0_89 = arith.constant 0 : index
    %c0_90 = arith.constant 0 : index
    %99 = vector.load %arg4[%c0_89, %c0_90] : memref<64x64xbf16, #tpu.memory_space<vmem>>, vector<64x64xbf16>
    %c0_91 = arith.constant 0 : index
    %c0_92 = arith.constant 0 : index
    %100 = vector.load %arg5[%c0_91, %c0_92] : memref<1x64xf32, #tpu.memory_space<vmem>>, vector<1x64xf32>
    %c0_i32 = arith.constant 0 : i32
    %c4_i32 = arith.constant 4 : i32
    %101 = arith.addi %c0_i32, %c4_i32 : i32
    %c1_i32 = arith.constant 1 : i32
    scf.for %arg9 = %c0_i32 to %101 step %c1_i32  : i32 {
      %102 = arith.index_cast %arg9 : i32 to index
      %c0_94 = arith.constant 0 : index
      %c0_95 = arith.constant 0 : index
      %103 = vector.load %arg8[%102, %c0_94, %c0_95] : memref<4x4x64xf32, #tpu.memory_space<vmem>>, vector<1x4x64xf32>
      %104 = vector.shape_cast %103 : vector<1x4x64xf32> to vector<4x64xf32>
      %105 = vector.broadcast %98 : vector<1x64xf32> to vector<4x64xf32>
      %106 = arith.addf %104, %105 : vector<4x64xf32>
      %cst = arith.constant 0.000000e+00 : f32
      %107 = vector.broadcast %cst : f32 to vector<4x64xf32>
      %108 = arith.maximumf %106, %107 : vector<4x64xf32>
      %109 = arith.truncf %108 : vector<4x64xf32> to vector<4x64xbf16>
      %cst_96 = arith.constant dense<0.000000e+00> : vector<4x64xf32>
      %110 = tpu.matmul %109, %99, %cst_96 {dimension_numbers = #tpu.dot_dimension_numbers<[1], [0], [0], [1], [0, 0, 1, 1], [], []>} : vector<4x64xbf16>, vector<64x64xbf16>, vector<4x64xf32> -> vector<4x64xf32>
      %111 = vector.broadcast %100 : vector<1x64xf32> to vector<4x64xf32>
      %112 = arith.addf %110, %111 : vector<4x64xf32>
      %c0_97 = arith.constant 0 : index
      %113 = arith.index_cast %arg9 : i32 to index
      %c0_98 = arith.constant 0 : index
      %c0_99 = arith.constant 0 : index
      %114 = vector.load %arg6[%c0_97, %113, %c0_98, %c0_99] : memref<1x4x4x64xbf16, #tpu.memory_space<vmem>>, vector<1x1x4x64xbf16>
      %115 = vector.shape_cast %114 : vector<1x1x4x64xbf16> to vector<4x64xbf16>
      %116 = arith.extf %115 : vector<4x64xbf16> to vector<4x64xf32>
      %117 = arith.addf %112, %116 : vector<4x64xf32>
      %cst_100 = arith.constant 0.000000e+00 : f32
      %118 = vector.broadcast %cst_100 : f32 to vector<4x64xf32>
      %119 = arith.maximumf %117, %118 : vector<4x64xf32>
      %120 = arith.truncf %119 : vector<4x64xf32> to vector<4x64xbf16>
      %c0_101 = arith.constant 0 : index
      %121 = arith.index_cast %arg9 : i32 to index
      %c0_102 = arith.constant 0 : index
      %c0_103 = arith.constant 0 : index
      %122 = vector.load %arg7[%c0_101, %121, %c0_102, %c0_103] : memref<1x4x4x64xbf16, #tpu.memory_space<vmem>>, vector<1x1x4x64xbf16>
      %123 = vector.shape_cast %122 : vector<1x1x4x64xbf16> to vector<4x64xbf16>
      %124 = vector.shape_cast %120 : vector<4x64xbf16> to vector<1x1x4x64xbf16>
      tpu.vector_store %arg7[%c0_101, %121, %c0_102, %c0_103], %124 {strides = array<i32>} : memref<1x4x4x64xbf16, #tpu.memory_space<vmem>>, vector<1x1x4x64xbf16>,
    }
    %c4_i32_93 = arith.constant 4 : i32
    return
  }
  func.func @transform_0(%arg0: i32) -> (i32, i32, i32, i32) {
    %c0_i32 = arith.constant 0 : i32
    %c0_i32_0 = arith.constant 0 : i32
    %c0_i32_1 = arith.constant 0 : i32
    %c0_i32_2 = arith.constant 0 : i32
    return %arg0, %c0_i32, %c0_i32_0, %c0_i32_1 : i32, i32, i32, i32
  }
  func.func @transform_1(%arg0: i32) -> (i32, i32) {
    %c0_i32 = arith.constant 0 : i32
    %c0_i32_0 = arith.constant 0 : i32
    %c0_i32_1 = arith.constant 0 : i32
    return %c0_i32, %c0_i32_0 : i32, i32
  }
  func.func @transform_2(%arg0: i32) -> (i32, i32) {
    %c0_i32 = arith.constant 0 : i32
    %c0_i32_0 = arith.constant 0 : i32
    %c0_i32_1 = arith.constant 0 : i32
    return %c0_i32, %c0_i32_0 : i32, i32
  }
  func.func @transform_3(%arg0: i32) -> (i32, i32) {
    %c0_i32 = arith.constant 0 : i32
    %c0_i32_0 = arith.constant 0 : i32
    %c0_i32_1 = arith.constant 0 : i32
    return %c0_i32, %c0_i32_0 : i32, i32
  }
  func.func @transform_4(%arg0: i32) -> (i32, i32) {
    %c0_i32 = arith.constant 0 : i32
    %c0_i32_0 = arith.constant 0 : i32
    %c0_i32_1 = arith.constant 0 : i32
    return %c0_i32, %c0_i32_0 : i32, i32
  }
  func.func @transform_5(%arg0: i32) -> (i32, i32, i32, i32) {
    %c0_i32 = arith.constant 0 : i32
    %c0_i32_0 = arith.constant 0 : i32
    %c0_i32_1 = arith.constant 0 : i32
    %c0_i32_2 = arith.constant 0 : i32
    return %arg0, %c0_i32, %c0_i32_0, %c0_i32_1 : i32, i32, i32, i32
  }
  func.func @transform_6(%arg0: i32) -> (i32, i32, i32, i32) {
    %c0_i32 = arith.constant 0 : i32
    %c0_i32_0 = arith.constant 0 : i32
    %c0_i32_1 = arith.constant 0 : i32
    %c0_i32_2 = arith.constant 0 : i32
    return %arg0, %c0_i32, %c0_i32_0, %c0_i32_1 : i32, i32, i32, i32
  }
}

module attributes {stable_mosaic.version = 11 : i64} {
  func.func @_downsampler_kernel(%arg0: i32, %arg1: memref<8x576xbf16, #tpu.memory_space<vmem>>, %arg2: memref<576x128xbf16, #tpu.memory_space<vmem>>, %arg3: memref<64x128xbf16, #tpu.memory_space<vmem>>, %arg4: memref<1x128xf32, #tpu.memory_space<vmem>>, %arg5: memref<8x128xbf16, #tpu.memory_space<vmem>>) attributes {dimension_semantics = [#tpu.dimension_semantics<parallel>], iteration_bounds = array<i64: 1>, scalar_prefetch = 0 : i64, scratch_operands = 0 : i64, tpu.core_type = #tpu.core_type<tc>, window_params = [{transform_indices = @transform_0, window_bounds = array<i64: 8, 576>}, {pipeline_mode = #tpu.pipeline_mode<synchronous>, transform_indices = @transform_1, window_bounds = array<i64: 576, 128>}, {pipeline_mode = #tpu.pipeline_mode<synchronous>, transform_indices = @transform_2, window_bounds = array<i64: 64, 128>}, {pipeline_mode = #tpu.pipeline_mode<synchronous>, transform_indices = @transform_3, window_bounds = array<i64: 1, 128>}, {transform_indices = @transform_4, window_bounds = array<i64: 8, 128>}]} {
    %c0 = arith.constant 0 : index
    %c0_0 = arith.constant 0 : index
    %0 = vector.load %arg1[%c0, %c0_0] : memref<8x576xbf16, #tpu.memory_space<vmem>>, vector<8x576xbf16>
    %c0_1 = arith.constant 0 : index
    %c0_2 = arith.constant 0 : index
    %1 = vector.load %arg2[%c0_1, %c0_2] : memref<576x128xbf16, #tpu.memory_space<vmem>>, vector<576x128xbf16>
    %cst = arith.constant dense<0.000000e+00> : vector<8x128xf32>
    %2 = tpu.matmul %0, %1, %cst {dimension_numbers = #tpu.dot_dimension_numbers<[1], [0], [0], [1], [0, 0, 1, 1], [], []>} : vector<8x576xbf16>, vector<576x128xbf16>, vector<8x128xf32> -> vector<8x128xf32>
    %c0_3 = arith.constant 0 : index
    %c256 = arith.constant 256 : index
    %3 = vector.load %arg1[%c0_3, %c256] : memref<8x576xbf16, #tpu.memory_space<vmem>>, vector<8x64xbf16>
    %4 = arith.extf %3 : vector<8x64xbf16> to vector<8x64xf32>
    %c0_4 = arith.constant 0 : index
    %c320 = arith.constant 320 : index
    %5 = vector.load %arg1[%c0_4, %c320] : memref<8x576xbf16, #tpu.memory_space<vmem>>, vector<8x64xbf16>
    %6 = arith.extf %5 : vector<8x64xbf16> to vector<8x64xf32>
    %c0_5 = arith.constant 0 : index
    %c448 = arith.constant 448 : index
    %7 = vector.load %arg1[%c0_5, %c448] : memref<8x576xbf16, #tpu.memory_space<vmem>>, vector<8x64xbf16>
    %8 = arith.extf %7 : vector<8x64xbf16> to vector<8x64xf32>
    %c0_6 = arith.constant 0 : index
    %c512 = arith.constant 512 : index
    %9 = vector.load %arg1[%c0_6, %c512] : memref<8x576xbf16, #tpu.memory_space<vmem>>, vector<8x64xbf16>
    %10 = arith.extf %9 : vector<8x64xbf16> to vector<8x64xf32>
    %11 = arith.maximumf %4, %6 : vector<8x64xf32>
    %12 = arith.maximumf %8, %10 : vector<8x64xf32>
    %13 = arith.maximumf %11, %12 : vector<8x64xf32>
    %14 = arith.truncf %13 : vector<8x64xf32> to vector<8x64xbf16>
    %c0_7 = arith.constant 0 : index
    %c0_8 = arith.constant 0 : index
    %15 = vector.load %arg3[%c0_7, %c0_8] : memref<64x128xbf16, #tpu.memory_space<vmem>>, vector<64x128xbf16>
    %cst_9 = arith.constant dense<0.000000e+00> : vector<8x128xf32>
    %16 = tpu.matmul %14, %15, %cst_9 {dimension_numbers = #tpu.dot_dimension_numbers<[1], [0], [0], [1], [0, 0, 1, 1], [], []>} : vector<8x64xbf16>, vector<64x128xbf16>, vector<8x128xf32> -> vector<8x128xf32>
    %17 = arith.addf %2, %16 : vector<8x128xf32>
    %c0_10 = arith.constant 0 : index
    %c0_11 = arith.constant 0 : index
    %18 = vector.load %arg4[%c0_10, %c0_11] : memref<1x128xf32, #tpu.memory_space<vmem>>, vector<1x128xf32>
    %19 = vector.broadcast %18 : vector<1x128xf32> to vector<8x128xf32>
    %20 = arith.addf %17, %19 : vector<8x128xf32>
    %cst_12 = arith.constant 0.000000e+00 : f32
    %21 = vector.broadcast %cst_12 : f32 to vector<8x128xf32>
    %22 = arith.maximumf %20, %21 : vector<8x128xf32>
    %23 = arith.truncf %22 : vector<8x128xf32> to vector<8x128xbf16>
    %c0_13 = arith.constant 0 : index
    %c0_14 = arith.constant 0 : index
    %24 = vector.load %arg5[%c0_13, %c0_14] : memref<8x128xbf16, #tpu.memory_space<vmem>>, vector<8x128xbf16>
    tpu.vector_store %arg5[%c0_13, %c0_14], %23 {strides = array<i32>} : memref<8x128xbf16, #tpu.memory_space<vmem>>, vector<8x128xbf16>,
    return
  }
  func.func @transform_0(%arg0: i32) -> (i32, i32) {
    %c0_i32 = arith.constant 0 : i32
    %c0_i32_0 = arith.constant 0 : i32
    return %arg0, %c0_i32 : i32, i32
  }
  func.func @transform_1(%arg0: i32) -> (i32, i32) {
    %c0_i32 = arith.constant 0 : i32
    %c0_i32_0 = arith.constant 0 : i32
    %c0_i32_1 = arith.constant 0 : i32
    return %c0_i32, %c0_i32_0 : i32, i32
  }
  func.func @transform_2(%arg0: i32) -> (i32, i32) {
    %c0_i32 = arith.constant 0 : i32
    %c0_i32_0 = arith.constant 0 : i32
    %c0_i32_1 = arith.constant 0 : i32
    return %c0_i32, %c0_i32_0 : i32, i32
  }
  func.func @transform_3(%arg0: i32) -> (i32, i32) {
    %c0_i32 = arith.constant 0 : i32
    %c0_i32_0 = arith.constant 0 : i32
    %c0_i32_1 = arith.constant 0 : i32
    return %c0_i32, %c0_i32_0 : i32, i32
  }
  func.func @transform_4(%arg0: i32) -> (i32, i32) {
    %c0_i32 = arith.constant 0 : i32
    %c0_i32_0 = arith.constant 0 : i32
    return %arg0, %c0_i32 : i32, i32
  }
}

module attributes {stable_mosaic.version = 11 : i64} {
  func.func @_dw_mm_kernel(%arg0: i32, %arg1: memref<1x2x2x128xbf16, #tpu.memory_space<vmem>>, %arg2: memref<9x128xf32, #tpu.memory_space<vmem>>, %arg3: memref<1x128xf32, #tpu.memory_space<vmem>>, %arg4: memref<128x128xbf16, #tpu.memory_space<vmem>>, %arg5: memref<1x128xf32, #tpu.memory_space<vmem>>, %arg6: memref<1x2x2x128xbf16, #tpu.memory_space<vmem>>, %arg7: memref<2x2x128xf32, #tpu.memory_space<vmem>>) attributes {dimension_semantics = [#tpu.dimension_semantics<parallel>], iteration_bounds = array<i64: 2>, scalar_prefetch = 0 : i64, scratch_operands = 1 : i64, tpu.core_type = #tpu.core_type<tc>, window_params = [{transform_indices = @transform_0, window_bounds = array<i64: 1, 2, 2, 128>}, {pipeline_mode = #tpu.pipeline_mode<synchronous>, transform_indices = @transform_1, window_bounds = array<i64: 9, 128>}, {pipeline_mode = #tpu.pipeline_mode<synchronous>, transform_indices = @transform_2, window_bounds = array<i64: 1, 128>}, {pipeline_mode = #tpu.pipeline_mode<synchronous>, transform_indices = @transform_3, window_bounds = array<i64: 128, 128>}, {pipeline_mode = #tpu.pipeline_mode<synchronous>, transform_indices = @transform_4, window_bounds = array<i64: 1, 128>}, {transform_indices = @transform_5, window_bounds = array<i64: 1, 2, 2, 128>}]} {
    %c0 = arith.constant 0 : index
    %c0_0 = arith.constant 0 : index
    %0 = vector.load %arg2[%c0, %c0_0] : memref<9x128xf32, #tpu.memory_space<vmem>>, vector<9x128xf32>
    %c0_1 = arith.constant 0 : index
    %c0_2 = arith.constant 0 : index
    %c0_3 = arith.constant 0 : index
    %c0_4 = arith.constant 0 : index
    %1 = vector.load %arg1[%c0_1, %c0_2, %c0_3, %c0_4] : memref<1x2x2x128xbf16, #tpu.memory_space<vmem>>, vector<1x2x2x128xbf16>
    %2 = vector.shape_cast %1 : vector<1x2x2x128xbf16> to vector<2x2x128xbf16>
    %3 = arith.extf %2 : vector<2x2x128xbf16> to vector<2x2x128xf32>
    %4 = vector.extract_strided_slice %0 {offsets = [4, 0], sizes = [1, 128], strides = [1, 1]} : vector<9x128xf32> to vector<1x128xf32>
    %5 = vector.shape_cast %4 : vector<1x128xf32> to vector<128xf32>
    %6 = vector.shape_cast %5 : vector<128xf32> to vector<1x1x128xf32>
    %7 = vector.broadcast %6 : vector<1x1x128xf32> to vector<2x2x128xf32>
    %8 = arith.mulf %3, %7 : vector<2x2x128xf32>
    %c0_5 = arith.constant 0 : index
    %c0_6 = arith.constant 0 : index
    %c0_7 = arith.constant 0 : index
    %9 = vector.load %arg7[%c0_5, %c0_6, %c0_7] : memref<2x2x128xf32, #tpu.memory_space<vmem>>, vector<2x2x128xf32>
    tpu.vector_store %arg7[%c0_5, %c0_6, %c0_7], %8 {strides = array<i32>} : memref<2x2x128xf32, #tpu.memory_space<vmem>>, vector<2x2x128xf32>,
    %c0_8 = arith.constant 0 : index
    %c0_9 = arith.constant 0 : index
    %c0_10 = arith.constant 0 : index
    %c0_11 = arith.constant 0 : index
    %10 = vector.load %arg1[%c0_8, %c0_9, %c0_10, %c0_11] : memref<1x2x2x128xbf16, #tpu.memory_space<vmem>>, vector<1x1x1x128xbf16>
    %11 = vector.shape_cast %10 : vector<1x1x1x128xbf16> to vector<1x1x128xbf16>
    %12 = arith.extf %11 : vector<1x1x128xbf16> to vector<1x1x128xf32>
    %c1 = arith.constant 1 : index
    %c1_12 = arith.constant 1 : index
    %c0_13 = arith.constant 0 : index
    %13 = vector.load %arg7[%c1, %c1_12, %c0_13] : memref<2x2x128xf32, #tpu.memory_space<vmem>>, vector<1x1x128xf32>
    %14 = vector.extract_strided_slice %0 {offsets = [0, 0], sizes = [1, 128], strides = [1, 1]} : vector<9x128xf32> to vector<1x128xf32>
    %15 = vector.shape_cast %14 : vector<1x128xf32> to vector<128xf32>
    %16 = vector.shape_cast %15 : vector<128xf32> to vector<1x1x128xf32>
    %17 = arith.mulf %12, %16 : vector<1x1x128xf32>
    %18 = arith.addf %13, %17 : vector<1x1x128xf32>
    %c1_14 = arith.constant 1 : index
    %c1_15 = arith.constant 1 : index
    %c0_16 = arith.constant 0 : index
    %19 = vector.load %arg7[%c1_14, %c1_15, %c0_16] : memref<2x2x128xf32, #tpu.memory_space<vmem>>, vector<1x1x128xf32>
    tpu.vector_store %arg7[%c1_14, %c1_15, %c0_16], %18 {strides = array<i32>} : memref<2x2x128xf32, #tpu.memory_space<vmem>>, vector<1x1x128xf32>,
    %c0_17 = arith.constant 0 : index
    %c0_18 = arith.constant 0 : index
    %c0_19 = arith.constant 0 : index
    %c0_20 = arith.constant 0 : index
    %20 = vector.load %arg1[%c0_17, %c0_18, %c0_19, %c0_20] : memref<1x2x2x128xbf16, #tpu.memory_space<vmem>>, vector<1x1x2x128xbf16>
    %21 = vector.shape_cast %20 : vector<1x1x2x128xbf16> to vector<1x2x128xbf16>
    %22 = arith.extf %21 : vector<1x2x128xbf16> to vector<1x2x128xf32>
    %c1_21 = arith.constant 1 : index
    %c0_22 = arith.constant 0 : index
    %c0_23 = arith.constant 0 : index
    %23 = vector.load %arg7[%c1_21, %c0_22, %c0_23] : memref<2x2x128xf32, #tpu.memory_space<vmem>>, vector<1x2x128xf32>
    %24 = vector.extract_strided_slice %0 {offsets = [1, 0], sizes = [1, 128], strides = [1, 1]} : vector<9x128xf32> to vector<1x128xf32>
    %25 = vector.shape_cast %24 : vector<1x128xf32> to vector<128xf32>
    %26 = vector.shape_cast %25 : vector<128xf32> to vector<1x1x128xf32>
    %27 = vector.broadcast %26 : vector<1x1x128xf32> to vector<1x2x128xf32>
    %28 = arith.mulf %22, %27 : vector<1x2x128xf32>
    %29 = arith.addf %23, %28 : vector<1x2x128xf32>
    %c1_24 = arith.constant 1 : index
    %c0_25 = arith.constant 0 : index
    %c0_26 = arith.constant 0 : index
    %30 = vector.load %arg7[%c1_24, %c0_25, %c0_26] : memref<2x2x128xf32, #tpu.memory_space<vmem>>, vector<1x2x128xf32>
    tpu.vector_store %arg7[%c1_24, %c0_25, %c0_26], %29 {strides = array<i32>} : memref<2x2x128xf32, #tpu.memory_space<vmem>>, vector<1x2x128xf32>,
    %c0_27 = arith.constant 0 : index
    %c0_28 = arith.constant 0 : index
    %c1_29 = arith.constant 1 : index
    %c0_30 = arith.constant 0 : index
    %31 = vector.load %arg1[%c0_27, %c0_28, %c1_29, %c0_30] : memref<1x2x2x128xbf16, #tpu.memory_space<vmem>>, vector<1x1x1x128xbf16>
    %32 = vector.shape_cast %31 : vector<1x1x1x128xbf16> to vector<1x1x128xbf16>
    %33 = arith.extf %32 : vector<1x1x128xbf16> to vector<1x1x128xf32>
    %c1_31 = arith.constant 1 : index
    %c0_32 = arith.constant 0 : index
    %c0_33 = arith.constant 0 : index
    %34 = vector.load %arg7[%c1_31, %c0_32, %c0_33] : memref<2x2x128xf32, #tpu.memory_space<vmem>>, vector<1x1x128xf32>
    %35 = vector.extract_strided_slice %0 {offsets = [2, 0], sizes = [1, 128], strides = [1, 1]} : vector<9x128xf32> to vector<1x128xf32>
    %36 = vector.shape_cast %35 : vector<1x128xf32> to vector<128xf32>
    %37 = vector.shape_cast %36 : vector<128xf32> to vector<1x1x128xf32>
    %38 = arith.mulf %33, %37 : vector<1x1x128xf32>
    %39 = arith.addf %34, %38 : vector<1x1x128xf32>
    %c1_34 = arith.constant 1 : index
    %c0_35 = arith.constant 0 : index
    %c0_36 = arith.constant 0 : index
    %40 = vector.load %arg7[%c1_34, %c0_35, %c0_36] : memref<2x2x128xf32, #tpu.memory_space<vmem>>, vector<1x1x128xf32>
    tpu.vector_store %arg7[%c1_34, %c0_35, %c0_36], %39 {strides = array<i32>} : memref<2x2x128xf32, #tpu.memory_space<vmem>>, vector<1x1x128xf32>,
    %c0_37 = arith.constant 0 : index
    %c0_38 = arith.constant 0 : index
    %c0_39 = arith.constant 0 : index
    %c0_40 = arith.constant 0 : index
    %41 = vector.load %arg1[%c0_37, %c0_38, %c0_39, %c0_40] : memref<1x2x2x128xbf16, #tpu.memory_space<vmem>>, vector<1x2x1x128xbf16>
    %42 = vector.shape_cast %41 : vector<1x2x1x128xbf16> to vector<2x1x128xbf16>
    %43 = arith.extf %42 : vector<2x1x128xbf16> to vector<2x1x128xf32>
    %c0_41 = arith.constant 0 : index
    %c1_42 = arith.constant 1 : index
    %c0_43 = arith.constant 0 : index
    %44 = vector.load %arg7[%c0_41, %c1_42, %c0_43] : memref<2x2x128xf32, #tpu.memory_space<vmem>>, vector<2x1x128xf32>
    %45 = vector.extract_strided_slice %0 {offsets = [3, 0], sizes = [1, 128], strides = [1, 1]} : vector<9x128xf32> to vector<1x128xf32>
    %46 = vector.shape_cast %45 : vector<1x128xf32> to vector<128xf32>
    %47 = vector.shape_cast %46 : vector<128xf32> to vector<1x1x128xf32>
    %48 = vector.broadcast %47 : vector<1x1x128xf32> to vector<2x1x128xf32>
    %49 = arith.mulf %43, %48 : vector<2x1x128xf32>
    %50 = arith.addf %44, %49 : vector<2x1x128xf32>
    %c0_44 = arith.constant 0 : index
    %c1_45 = arith.constant 1 : index
    %c0_46 = arith.constant 0 : index
    %51 = vector.load %arg7[%c0_44, %c1_45, %c0_46] : memref<2x2x128xf32, #tpu.memory_space<vmem>>, vector<2x1x128xf32>
    tpu.vector_store %arg7[%c0_44, %c1_45, %c0_46], %50 {strides = array<i32>} : memref<2x2x128xf32, #tpu.memory_space<vmem>>, vector<2x1x128xf32>,
    %c0_47 = arith.constant 0 : index
    %c0_48 = arith.constant 0 : index
    %c1_49 = arith.constant 1 : index
    %c0_50 = arith.constant 0 : index
    %52 = vector.load %arg1[%c0_47, %c0_48, %c1_49, %c0_50] : memref<1x2x2x128xbf16, #tpu.memory_space<vmem>>, vector<1x2x1x128xbf16>
    %53 = vector.shape_cast %52 : vector<1x2x1x128xbf16> to vector<2x1x128xbf16>
    %54 = arith.extf %53 : vector<2x1x128xbf16> to vector<2x1x128xf32>
    %c0_51 = arith.constant 0 : index
    %c0_52 = arith.constant 0 : index
    %c0_53 = arith.constant 0 : index
    %55 = vector.load %arg7[%c0_51, %c0_52, %c0_53] : memref<2x2x128xf32, #tpu.memory_space<vmem>>, vector<2x1x128xf32>
    %56 = vector.extract_strided_slice %0 {offsets = [5, 0], sizes = [1, 128], strides = [1, 1]} : vector<9x128xf32> to vector<1x128xf32>
    %57 = vector.shape_cast %56 : vector<1x128xf32> to vector<128xf32>
    %58 = vector.shape_cast %57 : vector<128xf32> to vector<1x1x128xf32>
    %59 = vector.broadcast %58 : vector<1x1x128xf32> to vector<2x1x128xf32>
    %60 = arith.mulf %54, %59 : vector<2x1x128xf32>
    %61 = arith.addf %55, %60 : vector<2x1x128xf32>
    %c0_54 = arith.constant 0 : index
    %c0_55 = arith.constant 0 : index
    %c0_56 = arith.constant 0 : index
    %62 = vector.load %arg7[%c0_54, %c0_55, %c0_56] : memref<2x2x128xf32, #tpu.memory_space<vmem>>, vector<2x1x128xf32>
    tpu.vector_store %arg7[%c0_54, %c0_55, %c0_56], %61 {strides = array<i32>} : memref<2x2x128xf32, #tpu.memory_space<vmem>>, vector<2x1x128xf32>,
    %c0_57 = arith.constant 0 : index
    %c1_58 = arith.constant 1 : index
    %c0_59 = arith.constant 0 : index
    %c0_60 = arith.constant 0 : index
    %63 = vector.load %arg1[%c0_57, %c1_58, %c0_59, %c0_60] : memref<1x2x2x128xbf16, #tpu.memory_space<vmem>>, vector<1x1x1x128xbf16>
    %64 = vector.shape_cast %63 : vector<1x1x1x128xbf16> to vector<1x1x128xbf16>
    %65 = arith.extf %64 : vector<1x1x128xbf16> to vector<1x1x128xf32>
    %c0_61 = arith.constant 0 : index
    %c1_62 = arith.constant 1 : index
    %c0_63 = arith.constant 0 : index
    %66 = vector.load %arg7[%c0_61, %c1_62, %c0_63] : memref<2x2x128xf32, #tpu.memory_space<vmem>>, vector<1x1x128xf32>
    %67 = vector.extract_strided_slice %0 {offsets = [6, 0], sizes = [1, 128], strides = [1, 1]} : vector<9x128xf32> to vector<1x128xf32>
    %68 = vector.shape_cast %67 : vector<1x128xf32> to vector<128xf32>
    %69 = vector.shape_cast %68 : vector<128xf32> to vector<1x1x128xf32>
    %70 = arith.mulf %65, %69 : vector<1x1x128xf32>
    %71 = arith.addf %66, %70 : vector<1x1x128xf32>
    %c0_64 = arith.constant 0 : index
    %c1_65 = arith.constant 1 : index
    %c0_66 = arith.constant 0 : index
    %72 = vector.load %arg7[%c0_64, %c1_65, %c0_66] : memref<2x2x128xf32, #tpu.memory_space<vmem>>, vector<1x1x128xf32>
    tpu.vector_store %arg7[%c0_64, %c1_65, %c0_66], %71 {strides = array<i32>} : memref<2x2x128xf32, #tpu.memory_space<vmem>>, vector<1x1x128xf32>,
    %c0_67 = arith.constant 0 : index
    %c1_68 = arith.constant 1 : index
    %c0_69 = arith.constant 0 : index
    %c0_70 = arith.constant 0 : index
    %73 = vector.load %arg1[%c0_67, %c1_68, %c0_69, %c0_70] : memref<1x2x2x128xbf16, #tpu.memory_space<vmem>>, vector<1x1x2x128xbf16>
    %74 = vector.shape_cast %73 : vector<1x1x2x128xbf16> to vector<1x2x128xbf16>
    %75 = arith.extf %74 : vector<1x2x128xbf16> to vector<1x2x128xf32>
    %c0_71 = arith.constant 0 : index
    %c0_72 = arith.constant 0 : index
    %c0_73 = arith.constant 0 : index
    %76 = vector.load %arg7[%c0_71, %c0_72, %c0_73] : memref<2x2x128xf32, #tpu.memory_space<vmem>>, vector<1x2x128xf32>
    %77 = vector.extract_strided_slice %0 {offsets = [7, 0], sizes = [1, 128], strides = [1, 1]} : vector<9x128xf32> to vector<1x128xf32>
    %78 = vector.shape_cast %77 : vector<1x128xf32> to vector<128xf32>
    %79 = vector.shape_cast %78 : vector<128xf32> to vector<1x1x128xf32>
    %80 = vector.broadcast %79 : vector<1x1x128xf32> to vector<1x2x128xf32>
    %81 = arith.mulf %75, %80 : vector<1x2x128xf32>
    %82 = arith.addf %76, %81 : vector<1x2x128xf32>
    %c0_74 = arith.constant 0 : index
    %c0_75 = arith.constant 0 : index
    %c0_76 = arith.constant 0 : index
    %83 = vector.load %arg7[%c0_74, %c0_75, %c0_76] : memref<2x2x128xf32, #tpu.memory_space<vmem>>, vector<1x2x128xf32>
    tpu.vector_store %arg7[%c0_74, %c0_75, %c0_76], %82 {strides = array<i32>} : memref<2x2x128xf32, #tpu.memory_space<vmem>>, vector<1x2x128xf32>,
    %c0_77 = arith.constant 0 : index
    %c1_78 = arith.constant 1 : index
    %c1_79 = arith.constant 1 : index
    %c0_80 = arith.constant 0 : index
    %84 = vector.load %arg1[%c0_77, %c1_78, %c1_79, %c0_80] : memref<1x2x2x128xbf16, #tpu.memory_space<vmem>>, vector<1x1x1x128xbf16>
    %85 = vector.shape_cast %84 : vector<1x1x1x128xbf16> to vector<1x1x128xbf16>
    %86 = arith.extf %85 : vector<1x1x128xbf16> to vector<1x1x128xf32>
    %c0_81 = arith.constant 0 : index
    %c0_82 = arith.constant 0 : index
    %c0_83 = arith.constant 0 : index
    %87 = vector.load %arg7[%c0_81, %c0_82, %c0_83] : memref<2x2x128xf32, #tpu.memory_space<vmem>>, vector<1x1x128xf32>
    %88 = vector.extract_strided_slice %0 {offsets = [8, 0], sizes = [1, 128], strides = [1, 1]} : vector<9x128xf32> to vector<1x128xf32>
    %89 = vector.shape_cast %88 : vector<1x128xf32> to vector<128xf32>
    %90 = vector.shape_cast %89 : vector<128xf32> to vector<1x1x128xf32>
    %91 = arith.mulf %86, %90 : vector<1x1x128xf32>
    %92 = arith.addf %87, %91 : vector<1x1x128xf32>
    %c0_84 = arith.constant 0 : index
    %c0_85 = arith.constant 0 : index
    %c0_86 = arith.constant 0 : index
    %93 = vector.load %arg7[%c0_84, %c0_85, %c0_86] : memref<2x2x128xf32, #tpu.memory_space<vmem>>, vector<1x1x128xf32>
    tpu.vector_store %arg7[%c0_84, %c0_85, %c0_86], %92 {strides = array<i32>} : memref<2x2x128xf32, #tpu.memory_space<vmem>>, vector<1x1x128xf32>,
    %c0_87 = arith.constant 0 : index
    %c0_88 = arith.constant 0 : index
    %94 = vector.load %arg3[%c0_87, %c0_88] : memref<1x128xf32, #tpu.memory_space<vmem>>, vector<1x128xf32>
    %c0_89 = arith.constant 0 : index
    %c0_90 = arith.constant 0 : index
    %95 = vector.load %arg4[%c0_89, %c0_90] : memref<128x128xbf16, #tpu.memory_space<vmem>>, vector<128x128xbf16>
    %c0_91 = arith.constant 0 : index
    %c0_92 = arith.constant 0 : index
    %96 = vector.load %arg5[%c0_91, %c0_92] : memref<1x128xf32, #tpu.memory_space<vmem>>, vector<1x128xf32>
    %c0_i32 = arith.constant 0 : i32
    %c2_i32 = arith.constant 2 : i32
    %97 = arith.addi %c0_i32, %c2_i32 : i32
    %c1_i32 = arith.constant 1 : i32
    scf.for %arg8 = %c0_i32 to %97 step %c1_i32  : i32 {
      %98 = arith.index_cast %arg8 : i32 to index
      %c0_94 = arith.constant 0 : index
      %c0_95 = arith.constant 0 : index
      %99 = vector.load %arg7[%98, %c0_94, %c0_95] : memref<2x2x128xf32, #tpu.memory_space<vmem>>, vector<1x2x128xf32>
      %100 = vector.shape_cast %99 : vector<1x2x128xf32> to vector<2x128xf32>
      %101 = vector.broadcast %94 : vector<1x128xf32> to vector<2x128xf32>
      %102 = arith.addf %100, %101 : vector<2x128xf32>
      %cst = arith.constant 0.000000e+00 : f32
      %103 = vector.broadcast %cst : f32 to vector<2x128xf32>
      %104 = arith.maximumf %102, %103 : vector<2x128xf32>
      %105 = arith.truncf %104 : vector<2x128xf32> to vector<2x128xbf16>
      %cst_96 = arith.constant dense<0.000000e+00> : vector<2x128xf32>
      %106 = tpu.matmul %105, %95, %cst_96 {dimension_numbers = #tpu.dot_dimension_numbers<[1], [0], [0], [1], [0, 0, 1, 1], [], []>} : vector<2x128xbf16>, vector<128x128xbf16>, vector<2x128xf32> -> vector<2x128xf32>
      %107 = vector.broadcast %96 : vector<1x128xf32> to vector<2x128xf32>
      %108 = arith.addf %106, %107 : vector<2x128xf32>
      %109 = arith.truncf %108 : vector<2x128xf32> to vector<2x128xbf16>
      %c0_97 = arith.constant 0 : index
      %110 = arith.index_cast %arg8 : i32 to index
      %c0_98 = arith.constant 0 : index
      %c0_99 = arith.constant 0 : index
      %111 = vector.load %arg6[%c0_97, %110, %c0_98, %c0_99] : memref<1x2x2x128xbf16, #tpu.memory_space<vmem>>, vector<1x1x2x128xbf16>
      %112 = vector.shape_cast %111 : vector<1x1x2x128xbf16> to vector<2x128xbf16>
      %113 = vector.shape_cast %109 : vector<2x128xbf16> to vector<1x1x2x128xbf16>
      tpu.vector_store %arg6[%c0_97, %110, %c0_98, %c0_99], %113 {strides = array<i32>} : memref<1x2x2x128xbf16, #tpu.memory_space<vmem>>, vector<1x1x2x128xbf16>,
    }
    %c2_i32_93 = arith.constant 2 : i32
    return
  }
  func.func @transform_0(%arg0: i32) -> (i32, i32, i32, i32) {
    %c0_i32 = arith.constant 0 : i32
    %c0_i32_0 = arith.constant 0 : i32
    %c0_i32_1 = arith.constant 0 : i32
    %c0_i32_2 = arith.constant 0 : i32
    return %arg0, %c0_i32, %c0_i32_0, %c0_i32_1 : i32, i32, i32, i32
  }
  func.func @transform_1(%arg0: i32) -> (i32, i32) {
    %c0_i32 = arith.constant 0 : i32
    %c0_i32_0 = arith.constant 0 : i32
    %c0_i32_1 = arith.constant 0 : i32
    return %c0_i32, %c0_i32_0 : i32, i32
  }
  func.func @transform_2(%arg0: i32) -> (i32, i32) {
    %c0_i32 = arith.constant 0 : i32
    %c0_i32_0 = arith.constant 0 : i32
    %c0_i32_1 = arith.constant 0 : i32
    return %c0_i32, %c0_i32_0 : i32, i32
  }
  func.func @transform_3(%arg0: i32) -> (i32, i32) {
    %c0_i32 = arith.constant 0 : i32
    %c0_i32_0 = arith.constant 0 : i32
    %c0_i32_1 = arith.constant 0 : i32
    return %c0_i32, %c0_i32_0 : i32, i32
  }
  func.func @transform_4(%arg0: i32) -> (i32, i32) {
    %c0_i32 = arith.constant 0 : i32
    %c0_i32_0 = arith.constant 0 : i32
    %c0_i32_1 = arith.constant 0 : i32
    return %c0_i32, %c0_i32_0 : i32, i32
  }
  func.func @transform_5(%arg0: i32) -> (i32, i32, i32, i32) {
    %c0_i32 = arith.constant 0 : i32
    %c0_i32_0 = arith.constant 0 : i32
    %c0_i32_1 = arith.constant 0 : i32
    %c0_i32_2 = arith.constant 0 : i32
    return %arg0, %c0_i32, %c0_i32_0, %c0_i32_1 : i32, i32, i32, i32
  }
}

module attributes {stable_mosaic.version = 11 : i64} {
  func.func @_dw_mm_kernel(%arg0: i32, %arg1: memref<1x2x2x128xbf16, #tpu.memory_space<vmem>>, %arg2: memref<9x128xf32, #tpu.memory_space<vmem>>, %arg3: memref<1x128xf32, #tpu.memory_space<vmem>>, %arg4: memref<128x128xbf16, #tpu.memory_space<vmem>>, %arg5: memref<1x128xf32, #tpu.memory_space<vmem>>, %arg6: memref<1x2x2x128xbf16, #tpu.memory_space<vmem>>, %arg7: memref<1x2x2x128xbf16, #tpu.memory_space<vmem>>, %arg8: memref<2x2x128xf32, #tpu.memory_space<vmem>>) attributes {dimension_semantics = [#tpu.dimension_semantics<parallel>], iteration_bounds = array<i64: 2>, scalar_prefetch = 0 : i64, scratch_operands = 1 : i64, tpu.core_type = #tpu.core_type<tc>, window_params = [{transform_indices = @transform_0, window_bounds = array<i64: 1, 2, 2, 128>}, {pipeline_mode = #tpu.pipeline_mode<synchronous>, transform_indices = @transform_1, window_bounds = array<i64: 9, 128>}, {pipeline_mode = #tpu.pipeline_mode<synchronous>, transform_indices = @transform_2, window_bounds = array<i64: 1, 128>}, {pipeline_mode = #tpu.pipeline_mode<synchronous>, transform_indices = @transform_3, window_bounds = array<i64: 128, 128>}, {pipeline_mode = #tpu.pipeline_mode<synchronous>, transform_indices = @transform_4, window_bounds = array<i64: 1, 128>}, {transform_indices = @transform_5, window_bounds = array<i64: 1, 2, 2, 128>}, {transform_indices = @transform_6, window_bounds = array<i64: 1, 2, 2, 128>}]} {
    %c0 = arith.constant 0 : index
    %c0_0 = arith.constant 0 : index
    %0 = vector.load %arg2[%c0, %c0_0] : memref<9x128xf32, #tpu.memory_space<vmem>>, vector<9x128xf32>
    %c0_1 = arith.constant 0 : index
    %c0_2 = arith.constant 0 : index
    %c0_3 = arith.constant 0 : index
    %c0_4 = arith.constant 0 : index
    %1 = vector.load %arg1[%c0_1, %c0_2, %c0_3, %c0_4] : memref<1x2x2x128xbf16, #tpu.memory_space<vmem>>, vector<1x2x2x128xbf16>
    %2 = vector.shape_cast %1 : vector<1x2x2x128xbf16> to vector<2x2x128xbf16>
    %3 = arith.extf %2 : vector<2x2x128xbf16> to vector<2x2x128xf32>
    %4 = vector.extract_strided_slice %0 {offsets = [4, 0], sizes = [1, 128], strides = [1, 1]} : vector<9x128xf32> to vector<1x128xf32>
    %5 = vector.shape_cast %4 : vector<1x128xf32> to vector<128xf32>
    %6 = vector.shape_cast %5 : vector<128xf32> to vector<1x1x128xf32>
    %7 = vector.broadcast %6 : vector<1x1x128xf32> to vector<2x2x128xf32>
    %8 = arith.mulf %3, %7 : vector<2x2x128xf32>
    %c0_5 = arith.constant 0 : index
    %c0_6 = arith.constant 0 : index
    %c0_7 = arith.constant 0 : index
    %9 = vector.load %arg8[%c0_5, %c0_6, %c0_7] : memref<2x2x128xf32, #tpu.memory_space<vmem>>, vector<2x2x128xf32>
    tpu.vector_store %arg8[%c0_5, %c0_6, %c0_7], %8 {strides = array<i32>} : memref<2x2x128xf32, #tpu.memory_space<vmem>>, vector<2x2x128xf32>,
    %c0_8 = arith.constant 0 : index
    %c0_9 = arith.constant 0 : index
    %10 = vector.load %arg3[%c0_8, %c0_9] : memref<1x128xf32, #tpu.memory_space<vmem>>, vector<1x128xf32>
    %c0_10 = arith.constant 0 : index
    %c0_11 = arith.constant 0 : index
    %11 = vector.load %arg4[%c0_10, %c0_11] : memref<128x128xbf16, #tpu.memory_space<vmem>>, vector<128x128xbf16>
    %c0_12 = arith.constant 0 : index
    %c0_13 = arith.constant 0 : index
    %12 = vector.load %arg5[%c0_12, %c0_13] : memref<1x128xf32, #tpu.memory_space<vmem>>, vector<1x128xf32>
    %c0_i32 = arith.constant 0 : i32
    %c2_i32 = arith.constant 2 : i32
    %13 = arith.addi %c0_i32, %c2_i32 : i32
    %c1_i32 = arith.constant 1 : i32
    scf.for %arg9 = %c0_i32 to %13 step %c1_i32  : i32 {
      %14 = arith.index_cast %arg9 : i32 to index
      %c0_15 = arith.constant 0 : index
      %c0_16 = arith.constant 0 : index
      %15 = vector.load %arg8[%14, %c0_15, %c0_16] : memref<2x2x128xf32, #tpu.memory_space<vmem>>, vector<1x2x128xf32>
      %16 = vector.shape_cast %15 : vector<1x2x128xf32> to vector<2x128xf32>
      %17 = vector.broadcast %10 : vector<1x128xf32> to vector<2x128xf32>
      %18 = arith.addf %16, %17 : vector<2x128xf32>
      %cst = arith.constant 0.000000e+00 : f32
      %19 = vector.broadcast %cst : f32 to vector<2x128xf32>
      %20 = arith.maximumf %18, %19 : vector<2x128xf32>
      %21 = arith.truncf %20 : vector<2x128xf32> to vector<2x128xbf16>
      %cst_17 = arith.constant dense<0.000000e+00> : vector<2x128xf32>
      %22 = tpu.matmul %21, %11, %cst_17 {dimension_numbers = #tpu.dot_dimension_numbers<[1], [0], [0], [1], [0, 0, 1, 1], [], []>} : vector<2x128xbf16>, vector<128x128xbf16>, vector<2x128xf32> -> vector<2x128xf32>
      %23 = vector.broadcast %12 : vector<1x128xf32> to vector<2x128xf32>
      %24 = arith.addf %22, %23 : vector<2x128xf32>
      %c0_18 = arith.constant 0 : index
      %25 = arith.index_cast %arg9 : i32 to index
      %c0_19 = arith.constant 0 : index
      %c0_20 = arith.constant 0 : index
      %26 = vector.load %arg6[%c0_18, %25, %c0_19, %c0_20] : memref<1x2x2x128xbf16, #tpu.memory_space<vmem>>, vector<1x1x2x128xbf16>
      %27 = vector.shape_cast %26 : vector<1x1x2x128xbf16> to vector<2x128xbf16>
      %28 = arith.extf %27 : vector<2x128xbf16> to vector<2x128xf32>
      %29 = arith.addf %24, %28 : vector<2x128xf32>
      %cst_21 = arith.constant 0.000000e+00 : f32
      %30 = vector.broadcast %cst_21 : f32 to vector<2x128xf32>
      %31 = arith.maximumf %29, %30 : vector<2x128xf32>
      %32 = arith.truncf %31 : vector<2x128xf32> to vector<2x128xbf16>
      %c0_22 = arith.constant 0 : index
      %33 = arith.index_cast %arg9 : i32 to index
      %c0_23 = arith.constant 0 : index
      %c0_24 = arith.constant 0 : index
      %34 = vector.load %arg7[%c0_22, %33, %c0_23, %c0_24] : memref<1x2x2x128xbf16, #tpu.memory_space<vmem>>, vector<1x1x2x128xbf16>
      %35 = vector.shape_cast %34 : vector<1x1x2x128xbf16> to vector<2x128xbf16>
      %36 = vector.shape_cast %32 : vector<2x128xbf16> to vector<1x1x2x128xbf16>
      tpu.vector_store %arg7[%c0_22, %33, %c0_23, %c0_24], %36 {strides = array<i32>} : memref<1x2x2x128xbf16, #tpu.memory_space<vmem>>, vector<1x1x2x128xbf16>,
    }
    %c2_i32_14 = arith.constant 2 : i32
    return
  }
  func.func @transform_0(%arg0: i32) -> (i32, i32, i32, i32) {
    %c0_i32 = arith.constant 0 : i32
    %c0_i32_0 = arith.constant 0 : i32
    %c0_i32_1 = arith.constant 0 : i32
    %c0_i32_2 = arith.constant 0 : i32
    return %arg0, %c0_i32, %c0_i32_0, %c0_i32_1 : i32, i32, i32, i32
  }
  func.func @transform_1(%arg0: i32) -> (i32, i32) {
    %c0_i32 = arith.constant 0 : i32
    %c0_i32_0 = arith.constant 0 : i32
    %c0_i32_1 = arith.constant 0 : i32
    return %c0_i32, %c0_i32_0 : i32, i32
  }
  func.func @transform_2(%arg0: i32) -> (i32, i32) {
    %c0_i32 = arith.constant 0 : i32
    %c0_i32_0 = arith.constant 0 : i32
    %c0_i32_1 = arith.constant 0 : i32
    return %c0_i32, %c0_i32_0 : i32, i32
  }
  func.func @transform_3(%arg0: i32) -> (i32, i32) {
    %c0_i32 = arith.constant 0 : i32
    %c0_i32_0 = arith.constant 0 : i32
    %c0_i32_1 = arith.constant 0 : i32
    return %c0_i32, %c0_i32_0 : i32, i32
  }
  func.func @transform_4(%arg0: i32) -> (i32, i32) {
    %c0_i32 = arith.constant 0 : i32
    %c0_i32_0 = arith.constant 0 : i32
    %c0_i32_1 = arith.constant 0 : i32
    return %c0_i32, %c0_i32_0 : i32, i32
  }
  func.func @transform_5(%arg0: i32) -> (i32, i32, i32, i32) {
    %c0_i32 = arith.constant 0 : i32
    %c0_i32_0 = arith.constant 0 : i32
    %c0_i32_1 = arith.constant 0 : i32
    %c0_i32_2 = arith.constant 0 : i32
    return %arg0, %c0_i32, %c0_i32_0, %c0_i32_1 : i32, i32, i32, i32
  }
  func.func @transform_6(%arg0: i32) -> (i32, i32, i32, i32) {
    %c0_i32 = arith.constant 0 : i32
    %c0_i32_0 = arith.constant 0 : i32
    %c0_i32_1 = arith.constant 0 : i32
    %c0_i32_2 = arith.constant 0 : i32
    return %arg0, %c0_i32, %c0_i32_0, %c0_i32_1 : i32, i32, i32, i32
  }
}

</mosaic_0001>

<bundles_post_ra>
// kernel: encoder_forward.29
= control target key start
LH: loop header
LB: loop body
LE: loop exit
PB: predicated region body
PF: predicated region fallthrough
CT: control target
= control target key end

     0   :  { %s683_s15 = smov 0   ;;  %s766_s0 = inlined_call_operand.vmem [shape: bf16[128,27], index: 0, kind: input, shape index: {}]   ;;  %s767_s1 = inlined_call_operand.vmem [shape: bf16[27,16], index: 1, kind: input, shape index: {}]   ;;  %s768_s2 = inlined_call_operand.vmem [shape: bf16[3,16], index: 2, kind: input, shape index: {}]   ;;  %s769_s3 = inlined_call_operand.vmem [shape: f32[1,16], index: 3, kind: input, shape index: {}]   ;;  %s770_s4 = inlined_call_operand.vmem [shape: bf16[128,16], index: 4, kind: output, shape index: {}]  }
   0x1 LB: > { %s541_s16 = sadd.s32 4294967295, %s652_s15   ;;  %p545_p0 = scmp.ge.s32.totalorder %s652_s15, 1  ;;  %s652_s15 = sphi %s683_s15, %s14_s15  }
   0x2   : > { %p163_p1 = scmp.lt.s32.totalorder %s652_s15, 3 }
   0x4   : > { %p164_p2 = pnand %p545_p0, %p163_p1 }
   0x5   : > { %s546_s17 = sshll.u32 (!%p164_p2), %s541_s16, 3  ;;  %s654_s22 = smov (!%p164_p2), 125  }
   0x6   : > { %167 = sbr.rel (%p164_p2) target bundleno = 525 (0x20d), region = 36  ;;  %p190_p3 = scmp.lt.s32.totalorder (!%p164_p2), %s546_s17, 15 }
   0x7   : > { %s655_s23 = smov (!%p164_p2), 119   ;;  %s656_s24 = smov (!%p164_p2), 116  }
   0xb   : > { %s772_s17 = smov (!%p190_p3, %s546_s17), 15  ;;  %v576_v46 = vld [vmem:[%s767_s1 + $0x8] sm:$0xf]  ;;  %v589_v47 = vld [vmem:[%s767_s1 + $0x8] sm:$0x30]  ;;  %vm412_vm0 = vcmask 1044480  }
   0xc   : > { %s547_s18 = sshll.u32 %s772_s17, 2  ;;  %v577_v49 = vor.u32 %v589_v47, %v576_v46  ;;  %vm413_vm1 = vcmask 1045504   ;;  %v657_v50 = vmov 65535   ;;  %v306_v55 = vld [vmem:[%s768_s2] sm:$0x3]  ;;  %vm332_vm2 = vcmask 1040384  }
   0xd   : > { %s699_s21 = scalar_lea.vmem %s766_s0, %s547_s18  ;;  %v414_v51 = vsel %vm412_vm0, 4294967295, %v657_v50  ;;  %vm333_vm3 = vcmask 1041408   ;;  %v334_v57 = vsel %vm332_vm2, 4294967295, %v657_v50  ;;  %v588_v61 = vld [vmem:[%s767_s1] sm:$0xff]  ;;  %vm399_vm4 = vcmask 220160   ;;  %s745_s11 = scalar_lea.vmem %s770_s4, %s547_s18 }
   0xe   : > { %v208_v0 = vld [vmem:[%s699_s21 + $0x18] sm:$0xff]   ;;  %v204_v1 = vld [vmem:[%s699_s21 + $0x8] sm:$0xff]   ;;  %v206_v6 = vld [vmem:[%s699_s21 + $0x10] sm:$0xff]   ;;  %v415_v54 = vsel %vm413_vm1, %v414_v51, 0  ;;  %v335_v60 = vsel %vm333_vm3, %v334_v57, 0  ;;  %vm319_vm5 = vcmask 23552  }
   0xf   : > { %v220_v2 = vunpack.c.l.bf16 %v208_v0  ;;  %v221_v3 = vunpack.c.h.bf16 %v208_v0  ;;  %v216_v4 = vunpack.c.l.bf16 %v204_v1  ;;  %v217_v5 = vunpack.c.h.bf16 %v204_v1  ;;  %v202_v7 = vld [vmem:[%s699_s21] sm:$0xff]  }
  0x10   : > { %v218_v10 = vunpack.c.l.bf16 %v206_v6  ;;  %v219_v11 = vunpack.c.h.bf16 %v206_v6  ;;  %v214_v12 = vunpack.c.l.bf16 %v202_v7  ;;  %v215_v13 = vunpack.c.h.bf16 %v202_v7  ;;  %v584_v0 = vld [vmem:[%s699_s21] sm:$0xff] }
  0x11   : > { %v615_v8 = vpack.i.bf16 %v221_v3, %v220_v2  ;;  %v605_v9 = vpack.i.bf16 %v217_v5, %v216_v4  ;;  %v417_v56 = vand.u32 %v577_v49, %v415_v54  ;;  %v337_v62 = vand.u32 %v335_v60, %v306_v55 }
  0x12   : > { %v610_v14 = vpack.i.bf16 %v219_v11, %v218_v10  ;;  %v620_v15 = vpack.i.bf16 %v215_v13, %v214_v12  ;;  %vm476_vm6 = vcmask 125952  }
  0x13   : > { %616 = vrot.lane.b32.xlu1 %v615_v8, %s654_s22  ;;  %606 = vrot.lane.b32.xlu0 %v605_v9, %s654_s22 }
  0x14   : > { %425 = vmatpush.bf16.msra.mxu1 %v417_v56  ;;  %591 = vmatpush.bf16.msra.mxu2 %v417_v56 }
  0x15   : > { %590 = vmatpush.bf16.msra.mxu3 %v337_v62  ;;  %346 = vmatpush.bf16.msra.mxu0 %v337_v62 }
  0x18   : > { %426 = vmatpush.bf16.msra.mxu1 %v588_v61  ;;  %592 = vmatpush.bf16.msra.mxu2 %v588_v61 }
  0x1b   : > { %611 = vrot.lane.b32.xlu0 %v610_v14, %s654_s22  ;;  %621 = vrot.lane.b32.xlu1 %v620_v15, %s654_s22  ;;  %v586_v14 = vld [vmem:[%s699_s21 + $0x10] sm:$0xff] }
  0x1c   : > { %578 = vmatmul.msk.bf16.vlgmr.msra.gmra.mxu1 %vm399_vm4, %v584_v0  ;;  %580 = vmatmul.msk.bf16.vlgmr.msra.gmra.mxu2 %vm399_vm4, %v586_v14 }
  0x85   : > { %v617_v16 = vpop.permute.xlu1 %616  ;;  %v607_v17 = vpop.permute.xlu0 %606 }
  0x86   : > { %v619_v18 = vunpack.i.h.bf16 %v617_v16  ;;  %v618_v19 = vunpack.i.l.bf16 %v617_v16  ;;  %v609_v20 = vunpack.i.h.bf16 %v607_v17  ;;  %v608_v21 = vunpack.i.l.bf16 %v607_v17  ;;  %v587_v16 = vld [vmem:[%s699_s21 + $0x18] sm:$0xff] }
  0x87   : > { %581 = vmatmul.msk.bf16.gmra.mxu2 %vm399_vm4, %v587_v16 }
  0x88   : > { %v705_v22 = vmax.f32 %v221_v3, %v619_v18  ;;  %v707_v23 = vmax.f32 %v220_v2, %v618_v19  ;;  %v256_v24 = vmax.f32 %v216_v4, %v608_v21  ;;  %v257_v25 = vmax.f32 %v217_v5, %v609_v20 }
  0x8a   : > { %v635_v26 = vpack.i.bf16 %v705_v22, %v707_v23  ;;  %v625_v27 = vpack.i.bf16 %v257_v25, %v256_v24 }
  0x8c   : > { %636 = vrot.lane.b32.xlu0 %v635_v26, %s655_s23  ;;  %626 = vrot.lane.b32.xlu2 %v625_v27, %s655_s23 }
  0x8d   : > { %v612_v28 = vpop.permute.xlu0 %611  ;;  %v622_v29 = vpop.permute.xlu1 %621 }
  0x8e   : > { %v614_v30 = vunpack.i.h.bf16 %v612_v28  ;;  %v613_v31 = vunpack.i.l.bf16 %v612_v28  ;;  %v624_v32 = vunpack.i.h.bf16 %v622_v29  ;;  %v623_v33 = vunpack.i.l.bf16 %v622_v29 }
  0x90   : > { %v259_v34 = vmax.f32 %v219_v11, %v614_v30  ;;  %v258_v35 = vmax.f32 %v218_v10, %v613_v31  ;;  %v255_v36 = vmax.f32 %v215_v13, %v624_v32  ;;  %v254_v37 = vmax.f32 %v214_v12, %v623_v33  ;;  %v585_v13 = vld [vmem:[%s699_s21 + $0x8] sm:$0xff] }
  0x91   : > { %579 = vmatmul.msk.bf16.gmra.mxu1 %vm399_vm4, %v585_v13 }
  0x92   : > { %v630_v38 = vpack.i.bf16 %v259_v34, %v258_v35  ;;  %v640_v39 = vpack.i.bf16 %v255_v36, %v254_v37 }
  0x94   : > { %631 = vrot.lane.b32.xlu2 %v630_v38, %s655_s23  ;;  %641 = vrot.lane.b32.xlu1 %v640_v39, %s655_s23 }
  0x99   : > { %v428_v20 = vpop.f32.mrf.mxu1 }
  0xa1   : > { %v430_v21 = vpop.f32.mrf.mxu1 }
  0xe6   : > { %v627_v40 = vpop.permute.xlu2 %626 }
  0xe7   : > { %v629_v41 = vunpack.i.h.bf16 %v627_v40  ;;  %v628_v42 = vunpack.i.l.bf16 %v627_v40 }
  0xe9   : > { %v297_v43 = vmax.f32 %v257_v25, %v629_v41  ;;  %v296_v44 = vmax.f32 %v256_v24, %v628_v42 }
  0xeb   : > { %v303_v45 = vpack.c.bf16 %v297_v43, %v296_v44 }
  0xed   : > { %313 = vrot.lane.b32.xlu2 %v303_v45, %s656_s24 }
  0xee   : > { %v632_v48 = vpop.permute.xlu2 %631 }
  0xef   : > { %v634_v52 = vunpack.i.h.bf16 %v632_v48  ;;  %v633_v53 = vunpack.i.l.bf16 %v632_v48 }
  0xf1   : > { %v299_v58 = vmax.f32 %v259_v34, %v634_v52  ;;  %v298_v59 = vmax.f32 %v258_v35, %v633_v53  ;;  %v438_v35 = vpop.f32.mrf.mxu2 }
  0xf3   : > { %v304_v63 = vpack.c.bf16 %v299_v58, %v298_v59 }
  0xf5   : > { %315 = vrot.lane.b32.xlu0 %v304_v63, %s656_s24 }
  0xf9   : > { %v440_v46 = vpop.f32.mrf.mxu2 }
  0xfe   : > { %v637_v1 = vpop.permute.xlu0 %636 }
  0xff   : > { %v639_v2 = vunpack.i.h.bf16 %v637_v1  ;;  %v638_v3 = vunpack.i.l.bf16 %v637_v1 }
 0x101   : > { %v301_v4 = vmax.f32 %v705_v22, %v639_v2  ;;  %v300_v5 = vmax.f32 %v707_v23, %v638_v3  ;;  %v645_v23 = vld [vmem:[%s769_s3] ss:$0 sm:$0xff] }
 0x103   : > { %v305_v6 = vpack.c.bf16 %v301_v4, %v300_v5 }
 0x105   : > { %317 = vrot.lane.b32.xlu1 %v305_v6, %s656_s24 }
 0x106   : > { %v642_v7 = vpop.permute.xlu1 %641 }
 0x107   : > { %v644_v8 = vunpack.i.h.bf16 %v642_v7  ;;  %v643_v9 = vunpack.i.l.bf16 %v642_v7 }
 0x109   : > { %v295_v10 = vmax.f32 %v255_v36, %v644_v8  ;;  %v294_v11 = vmax.f32 %v254_v37, %v643_v9 }
 0x10a   : > { %v443_v56 = vpop.f32.mrf.mxu2 }
 0x10b   : > { %v302_v12 = vpack.c.bf16 %v295_v10, %v294_v11 }
 0x10d   : > { %311 = vrot.lane.b32.xlu2 %v302_v12, %s656_s24 }
 0x10e   : > { %v433_v22 = vpop.f32.mrf.mxu1 }
 0x112   : > { %v445_v63 = vpop.f32.mrf.mxu2 }
 0x116   : > { %v435_v28 = vpop.f32.mrf.mxu1 }
 0x147   : > { %v314_v15 = vpop.permute.xlu2 %313 }
 0x148   : > { %551 = vmatmul.msk.bf16.vlgmr.msra.gmra.mxu3 %vm319_vm5, %v314_v15 }
 0x167   : > { %v316_v17 = vpop.permute.xlu0 %315  ;;  %v312_v18 = vpop.permute.xlu2 %311 }
 0x168   : > { %550 = vmatmul.msk.bf16.vlgmr.msra.gmra.mxu0 %vm319_vm5, %v312_v18  ;;  %552 = vmatmul.msk.bf16.gmra.mxu3 %vm319_vm5, %v316_v17 }
 0x177   : > { %v318_v19 = vpop.permute.xlu1 %317 }
 0x178   : > { %553 = vmatmul.msk.bf16.gmra.mxu3 %vm319_vm5, %v318_v19 }
 0x1cb   : > { %v353_v24 = vpop.f32.mrf.mxu3 }
 0x1cc   : > { %v434_v25 = vadd.f32 %v433_v22, %v353_v24 }
 0x1ce   : > { %v454_v26 = vadd.f32 %v645_v23, %v434_v25 }
 0x1d0   : > { %v462_v27 = vmax.f32 %v454_v26, 0.0 }
 0x1d2   : > { %v470_v29 = vpack.c.bf16 %v462_v27, %v462_v27 }
 0x1d3   : > { %v355_v30 = vpop.f32.mrf.mxu3 }
 0x1d4   : > { %479 = vst.msk [vmem:[%s745_s11 + $0x8] sm:$0xf] %vm476_vm6, %v470_v29  ;;  %v436_v31 = vadd.f32 %v435_v28, %v355_v30 }
 0x1d6   : > { %v455_v32 = vadd.f32 %v645_v23, %v436_v31 }
 0x1d8   : > { %v463_v33 = vmax.f32 %v455_v32, 0.0 }
 0x1da   : > { %v471_v34 = vpack.c.bf16 %v463_v33, %v463_v33 }
 0x1dc   : > { %480 = vst.msk [vmem:[%s745_s11 + $0xc] sm:$0xf] %vm476_vm6, %v471_v34 }
 0x1e5   : > { %v348_v36 = vpop.f32.mrf.mxu0 }
 0x1e6   : > { %v429_v37 = vadd.f32 %v428_v20, %v348_v36 }
 0x1e8   : > { %v452_v38 = vadd.f32 %v645_v23, %v429_v37 }
 0x1ea   : > { %v460_v39 = vmax.f32 %v452_v38, 0.0 }
 0x1eb   : > { %v358_v40 = vpop.f32.mrf.mxu3 }
 0x1ec   : > { %v468_v41 = vpack.c.bf16 %v460_v39, %v460_v39  ;;  %v439_v42 = vadd.f32 %v438_v35, %v358_v40 }
 0x1ed   : > { %v350_v43 = vpop.f32.mrf.mxu0 }
 0x1ee   : > { %477 = vst.msk [vmem:[%s745_s11] sm:$0xf] %vm476_vm6, %v468_v41  ;;  %v456_v44 = vadd.f32 %v645_v23, %v439_v42  ;;  %v431_v45 = vadd.f32 %v430_v21, %v350_v43 }
 0x1f0   : > { %v464_v47 = vmax.f32 %v456_v44, 0.0  ;;  %v453_v48 = vadd.f32 %v645_v23, %v431_v45 }
 0x1f2   : > { %v472_v49 = vpack.c.bf16 %v464_v47, %v464_v47  ;;  %v461_v50 = vmax.f32 %v453_v48, 0.0 }
 0x1f3   : > { %v360_v51 = vpop.f32.mrf.mxu3 }
 0x1f4   : > { %481 = vst.msk [vmem:[%s745_s11 + $0x10] sm:$0xf] %vm476_vm6, %v472_v49  ;;  %v469_v52 = vpack.c.bf16 %v461_v50, %v461_v50  ;;  %v441_v53 = vadd.f32 %v440_v46, %v360_v51 }
 0x1f6   : > { %478 = vst.msk [vmem:[%s745_s11 + $0x4] sm:$0xf] %vm476_vm6, %v469_v52  ;;  %v457_v54 = vadd.f32 %v645_v23, %v441_v53 }
 0x1f8   : > { %v465_v55 = vmax.f32 %v457_v54, 0.0 }
 0x1fa   : > { %v473_v57 = vpack.c.bf16 %v465_v55, %v465_v55 }
 0x1fb   : > { %v363_v58 = vpop.f32.mrf.mxu3 }
 0x1fc   : > { %482 = vst.msk [vmem:[%s745_s11 + $0x14] sm:$0xf] %vm476_vm6, %v473_v57  ;;  %v444_v59 = vadd.f32 %v443_v56, %v363_v58 }
 0x1fe   : > { %v458_v60 = vadd.f32 %v645_v23, %v444_v59 }
 0x200   : > { %v466_v61 = vmax.f32 %v458_v60, 0.0 }
 0x202   : > { %v474_v62 = vpack.c.bf16 %v466_v61, %v466_v61 }
 0x203   : > { %v365_v0 = vpop.f32.mrf.mxu3 }
 0x204   : > { %483 = vst.msk [vmem:[%s745_s11 + $0x18] sm:$0xf] %vm476_vm6, %v474_v62  ;;  %v446_v1 = vadd.f32 %v445_v63, %v365_v0 }
 0x206   : > { %v459_v2 = vadd.f32 %v645_v23, %v446_v1 }
 0x208   : > { %v467_v3 = vmax.f32 %v459_v2, 0.0 }
 0x20a   : > { %v475_v4 = vpack.c.bf16 %v467_v3, %v467_v3 }
 0x20c   : > { %484 = vst.msk [vmem:[%s745_s11 + $0x1c] sm:$0xf] %vm476_vm6, %v475_v4 }
 0x20d PF: > { %s14_s15 = sadd.s32 1, %s652_s15  }
 0x20e   : > { %p11_p4 = scmp.ge.s32.totalorder %s14_s15, 4  }
 0x210   :  { %13 = sbr.rel (!%p11_p4) target bundleno = 1 (0x1), region = 66 }

// kernel: encoder_forward.30
= control target key start
LH: loop header
LB: loop body
LE: loop exit
PB: predicated region body
PF: predicated region fallthrough
CT: control target
= control target key end

     0   :  { %s603_s15 = smov 0   ;;  %s667_s0 = inlined_call_operand.vmem [shape: bf16[32,144], index: 0, kind: input, shape index: {}]   ;;  %s668_s1 = inlined_call_operand.vmem [shape: bf16[144,64], index: 1, kind: input, shape index: {}]   ;;  %s669_s2 = inlined_call_operand.vmem [shape: bf16[16,64], index: 2, kind: input, shape index: {}]   ;;  %s670_s3 = inlined_call_operand.vmem [shape: f32[1,64], index: 3, kind: input, shape index: {}]   ;;  %s671_s4 = inlined_call_operand.vmem [shape: bf16[32,64], index: 4, kind: output, shape index: {}]  }
   0x1 LB: > { %s456_s16 = sadd.s32 4294967295, %s573_s15   ;;  %p460_p0 = scmp.ge.s32.totalorder %s573_s15, 1  ;;  %s573_s15 = sphi %s603_s15, %s14_s15  }
   0x2   : > { %p164_p1 = scmp.lt.s32.totalorder %s573_s15, 3 }
   0x4   : > { %p165_p2 = pnand %p460_p0, %p164_p1 }
   0x5   : > { %s461_s17 = sshll.u32 (!%p165_p2), %s456_s16, 1  ;;  %s575_s22 = smov (!%p165_p2), 112  }
   0x6   : > { %168 = sbr.rel (%p165_p2) target bundleno = 521 (0x209), region = 36  ;;  %p192_p3 = scmp.lt.s32.totalorder (!%p165_p2), %s461_s17, 3 }
   0x7   : > { %s576_s23 = smov (!%p165_p2), 80   ;;  %s577_s20 = smov (!%p165_p2), 64  }
   0xb   : > { %s673_s17 = smov (!%p192_p3, %s461_s17), 3  ;;  %v528_v14 = vld [vmem:[%s668_s1 + $0x38] sm:$0xff]  ;;  %v527_v15 = vld [vmem:[%s668_s1 + $0x30] sm:$0xff]  ;;  %v529_v16 = vld [vmem:[%s668_s1 + $0x40] sm:$0xff]  ;;  %vm275_vm0 = vcmask 130048   ;;  %vm397_vm1 = vcmask 519168  }
   0xc   : > { %s518_s18 = sshll.u32 %s673_s17, 3  ;;  %359 = vmatpush.bf16.msra.mxu1 %v528_v14  ;;  %380 = vmatpush.bf16.msra.mxu2 %v529_v16  ;;  %v530_v20 = vld [vmem:[%s669_s2] sm:$0xff]  ;;  %v526_v21 = vld [vmem:[%s668_s1 + $0x28] sm:$0xff]  ;;  %v524_v23 = vld [vmem:[%s668_s1 + $0x18] sm:$0xff] }
   0xd   : > { %s617_s21 = scalar_lea.vmem %s667_s0, %s518_s18  ;;  %286 = vmatpush.bf16.msra.mxu0 %v530_v20  ;;  %v525_v22 = vld [vmem:[%s668_s1 + $0x20] sm:$0xff]  ;;  %v523_v25 = vld [vmem:[%s668_s1 + $0x10] sm:$0xff]  ;;  %v522_v28 = vld [vmem:[%s668_s1 + $0x8] sm:$0xff] }
   0xe   : > { %v532_v0 = vld [vmem:[%s617_s21] sm:$0xff]   ;;  %v539_v1 = vld [vmem:[%s617_s21 + $0x8] sm:$0xff]  }
   0xf   : > { %v534_v2 = vunpack.c.h.bf16 %v532_v0  ;;  %v538_v3 = vunpack.c.h.bf16 %v539_v1  ;;  %v537_v5 = vunpack.c.l.bf16 %v539_v1  ;;  %v533_v6 = vunpack.c.l.bf16 %v532_v0  ;;  %v519_v17 = vld [vmem:[%s617_s21 + $0x4] sm:$0xf]  ;;  %v475_v18 = vld [vmem:[%s617_s21 + $0x8] sm:$0xf0]  ;;  %v473_v35 = vld [vmem:[%s617_s21] sm:$0xf] }
  0x10   : > { %v478_v19 = vor.u32 %v519_v17, %v475_v18  ;;  %360 = vmatpush.bf16.msra.mxu1 %v527_v15  ;;  %v521_v34 = vld [vmem:[%s668_s1] sm:$0xff]  ;;  %v520_v36 = vld [vmem:[%s617_s21 + $0x4] sm:$0xf0]  ;;  %s465_s21 = sshll.u32 %s673_s17, 2 }
  0x11   : > { %v551_v4 = vpack.i.bf16 %v538_v3, %v534_v2  ;;  %v556_v7 = vpack.i.bf16 %v537_v5, %v533_v6  ;;  %v474_v39 = vor.u32 %v520_v36, %v473_v35  ;;  %v566_v46 = vld [vmem:[%s670_s3] ss:$0 sm:$0xff]  ;;  %s202_s26 = scalar_lea.vmem %s671_s4, %s465_s21 }
  0x12   : > { %515 = vmatmul.msk.bf16.vlgmr.msra.gmra.mxu2 %vm275_vm0, %v478_v19 }
  0x13   : > { %552 = vrot.lane.b32.xlu0 %v551_v4, %s575_s22 }
  0x14   : > { %361 = vmatpush.bf16.msra.mxu1 %v526_v21 }
  0x18   : > { %362 = vmatpush.bf16.msra.mxu1 %v525_v22 }
  0x1b   : > { %557 = vrot.lane.b32.xlu0 %v556_v7, %s575_s22 }
  0x1c   : > { %363 = vmatpush.bf16.msra.mxu1 %v524_v23 }
  0x20   : > { %364 = vmatpush.bf16.msra.mxu1 %v523_v25 }
  0x24   : > { %365 = vmatpush.bf16.msra.mxu1 %v522_v28 }
  0x28   : > { %366 = vmatpush.bf16.msra.mxu1 %v521_v34 }
  0x2b   : > { %367 = vmatmul.bf16.vlgmr.msra.gmra.mxu1 %v474_v39 }
  0x85   : > { %v553_v8 = vpop.permute.xlu0 %552 }
  0x86   : > { %v555_v9 = vunpack.i.h.bf16 %v553_v8  ;;  %v554_v10 = vunpack.i.l.bf16 %v553_v8 }
  0x88   : > { %v251_v11 = vmax.f32 %v533_v6, %v554_v10  ;;  %v252_v12 = vmax.f32 %v537_v5, %v555_v9 }
  0x8a   : > { %v561_v13 = vpack.i.bf16 %v252_v12, %v251_v11 }
  0x8c   : > { %562 = vrot.lane.b32.xlu1 %v561_v13, %s576_s23 }
  0x8d   : > { %v558_v24 = vpop.permute.xlu0 %557 }
  0x8e   : > { %v560_v26 = vunpack.i.h.bf16 %v558_v24  ;;  %v559_v27 = vunpack.i.l.bf16 %v558_v24 }
  0x90   : > { %v242_v29 = vmax.f32 %v537_v5, %v560_v26  ;;  %v241_v30 = vmax.f32 %v533_v6, %v559_v27 }
  0x95   : > { %v382_v43 = vpop.f32.mrf.mxu2 }
  0x9d   : > { %v384_v54 = vpop.f32.mrf.mxu2 }
  0xa8   : > { %v368_v42 = vpop.f32.mrf.mxu1 }
  0xb0   : > { %v370_v50 = vpop.f32.mrf.mxu1 }
  0xfe   : > { %v563_v31 = vpop.permute.xlu1 %562 }
  0xff   : > { %v565_v32 = vunpack.i.h.bf16 %v563_v31  ;;  %v564_v33 = vunpack.i.l.bf16 %v563_v31 }
 0x101   : > { %v262_v37 = vmax.f32 %v242_v29, %v565_v32  ;;  %v261_v38 = vmax.f32 %v241_v30, %v564_v33 }
 0x103   : > { %v263_v40 = vpack.c.bf16 %v262_v37, %v261_v38 }
 0x105   : > { %267 = vrot.lane.b32.xlu1 %v263_v40, %s577_s20 }
 0x177   : > { %v268_v41 = vpop.permute.xlu1 %267 }
 0x178   : > { %470 = vmatmul.msk.bf16.vlgmr.msra.gmra.mxu0 %vm275_vm0, %v268_v41 }
 0x1f5   : > { %v288_v44 = vpop.f32.mrf.mxu0 }
 0x1f6   : > { %v369_v45 = vadd.f32 %v368_v42, %v288_v44 }
 0x1f8   : > { %v383_v47 = vadd.f32 %v382_v43, %v369_v45 }
 0x1fa   : > { %v391_v48 = vadd.f32 %v566_v46, %v383_v47 }
 0x1fc   : > { %v393_v49 = vmax.f32 %v391_v48, 0.0 }
 0x1fd   : > { %v290_v51 = vpop.f32.mrf.mxu0 }
 0x1fe   : > { %v395_v52 = vpack.c.bf16 %v393_v49, %v393_v49  ;;  %v371_v53 = vadd.f32 %v370_v50, %v290_v51 }
 0x200   : > { %398 = vst.msk [vmem:[%s202_s26] sm:$0xf] %vm397_vm1, %v395_v52  ;;  %v385_v55 = vadd.f32 %v384_v54, %v371_v53 }
 0x202   : > { %v392_v56 = vadd.f32 %v566_v46, %v385_v55 }
 0x204   : > { %v394_v57 = vmax.f32 %v392_v56, 0.0 }
 0x206   : > { %v396_v58 = vpack.c.bf16 %v394_v57, %v394_v57 }
 0x208   : > { %399 = vst.msk [vmem:[%s202_s26 + $0x4] sm:$0xf] %vm397_vm1, %v396_v58 }
 0x209 PF: > { %s14_s15 = sadd.s32 1, %s573_s15  }
 0x20a   : > { %p11_p4 = scmp.ge.s32.totalorder %s14_s15, 4  }
 0x20c   :  { %13 = sbr.rel (!%p11_p4) target bundleno = 1 (0x1), region = 66 }

// kernel: encoder_forward.31
= control target key start
LH: loop header
LB: loop body
LE: loop exit
PB: predicated region body
PF: predicated region fallthrough
CT: control target
= control target key end

     0   :  { %s716_s18 = smov 0   ;;  %s895_s0 = inlined_call_operand.vmem [shape: bf16[2,4,4,64], index: 0, kind: input, shape index: {}]   ;;  %s896_s1 = inlined_call_operand.vmem [shape: f32[9,64], index: 1, kind: input, shape index: {}]   ;;  %s897_s2 = inlined_call_operand.vmem [shape: f32[1,64], index: 2, kind: input, shape index: {}]   ;;  %s898_s3 = inlined_call_operand.vmem [shape: bf16[64,64], index: 3, kind: input, shape index: {}]   ;;  %s899_s4 = inlined_call_operand.vmem [shape: f32[1,64], index: 4, kind: input, shape index: {}]   ;;  %s900_s5 = inlined_call_operand.vmem [shape: bf16[2,4,4,64], index: 5, kind: output, shape index: {}]  }
   0x1 LB: > { %s608_s19 = sadd.s32 4294967295, %s680_s18   ;;  %p612_p0 = scmp.ge.s32.totalorder %s680_s18, 1  ;;  %s680_s18 = sphi %s716_s18, %s15_s18  }
   0x2   : > { %p187_p1 = scmp.lt.s32.totalorder %s680_s18, 3 }
   0x4   : > { %p188_p2 = pnand %p612_p0, %p187_p1 }
   0x5   : > { %p215_p3 = scmp.lt.s32.totalorder (!%p188_p2), %s608_s19, 1 }
   0x6   : > { %191 = sbr.rel (%p188_p2) target bundleno = 252 (0xfc), region = 40 }
   0xb   : > { %s902_s19 = smov (!%p215_p3, %s608_s19), 1  ;;  %v727_v0 = vld [vmem:[%s896_s1] sm:$0xff]  ;;  %vm241_vm0 = vcmask 519168   ;;  %vm263_vm1 = vcmask 518144  }
   0xc   : > { %s647_s22 = sshll.u32 %s902_s19, 3  ;;  %v236_v1 = vperm.slane %v727_v0, 4  ;;  %v295_v9 = vperm.slane %v727_v0, 2  ;;  %v256_v23 = vperm.slane %v727_v0, 0  ;;  %v759_v34 = vperm.slane %v727_v0, 3 }
   0xd   : > { %s732_s25 = scalar_lea.vmem %s895_s0, %s647_s22  ;;  %s737_s28 = scalar_lea.vmem %s900_s5, %s647_s22  ;;  %v359_v40 = vperm.slane %v727_v0, 5  ;;  %v276_v59 = vperm.slane %v727_v0, 1 }
   0xe   : > { %v229_v2 = vld [vmem:[%s732_s25 + $0x2] sm:$0x3]  ;;  %v230_v3 = vld [vmem:[%s732_s25 + $0x4] sm:$0x3]  ;;  %v231_v4 = vld [vmem:[%s732_s25 + $0x6] sm:$0x3] }
   0xf   : > { %v233_v5 = vunpack.c.l.bf16 %v229_v2  ;;  %v234_v6 = vunpack.c.l.bf16 %v230_v3  ;;  %v235_v7 = vunpack.c.l.bf16 %v231_v4  ;;  %v228_v8 = vld [vmem:[%s732_s25] sm:$0x3]  ;;  %v287_v13 = vld [vmem:[%s732_s25 + $0x2] sm:$0x3]  ;;  %v248_v20 = vld [vmem:[%s732_s25 + $0x4] sm:$0x3] }
  0x10   : > { %v232_v10 = vunpack.c.l.bf16 %v228_v8  ;;  %v246_v11 = vld [vmem:[%s732_s25] sm:$0x3]  ;;  %v247_v17 = vld [vmem:[%s732_s25 + $0x2] sm:$0x3]  ;;  %v288_v21 = vld [vmem:[%s732_s25 + $0x4] sm:$0x3]  ;;  %v290_v25 = vunpack.c.l.bf16 %v287_v13  ;;  %v251_v29 = vunpack.c.l.bf16 %v248_v20 }
  0x11   : > { %v286_v12 = vld [vmem:[%s732_s25] sm:$0x3]  ;;  %v238_v14 = vmul.f32 %v236_v1, %v233_v5  ;;  %v239_v15 = vmul.f32 %v236_v1, %v234_v6  ;;  %v240_v16 = vmul.f32 %v236_v1, %v235_v7  ;;  %v249_v22 = vunpack.c.l.bf16 %v246_v11  ;;  %v348_v36 = vld [vmem:[%s732_s25 + $0x2] sm:$0x3]  ;;  %v350_v37 = vld [vmem:[%s732_s25 + $0x6] sm:$0x3] }
  0x12   : > { %v289_v18 = vunpack.c.l.bf16 %v286_v12  ;;  %v237_v19 = vmul.f32 %v236_v1, %v232_v10  ;;  %v322_v26 = vld [vmem:[%s732_s25] sm:$0x3]  ;;  %v250_v27 = vunpack.c.l.bf16 %v247_v17  ;;  %v291_v28 = vunpack.c.l.bf16 %v288_v21  ;;  %v349_v41 = vld [vmem:[%s732_s25 + $0x4] sm:$0x3]  ;;  %v268_v51 = vld [vmem:[%s732_s25 + $0x2] sm:$0x3] }
  0x13   : > { %243 = vst.msk [vmem:[#allocation2 + $0x4] sm:$0xf] %vm241_vm0, %v238_v14  ;;  %v297_v30 = vmul.f32 %v295_v9, %v290_v25  ;;  %v347_v31 = vld [vmem:[%s732_s25] sm:$0x3]  ;;  %v326_v33 = vunpack.c.l.bf16 %v322_v26  ;;  %v257_v35 = vmul.f32 %v256_v23, %v249_v22  ;;  %v354_v42 = vunpack.c.l.bf16 %v350_v37  ;;  %v269_v56 = vld [vmem:[%s732_s25 + $0x4] sm:$0x3] }
  0x14   : > { %v296_v24 = vmul.f32 %v295_v9, %v289_v18  ;;  %244 = vst.msk [vmem:[#allocation2 + $0x8] sm:$0xf] %vm241_vm0, %v239_v15  ;;  %v298_v32 = vmul.f32 %v295_v9, %v291_v28  ;;  %v258_v38 = vmul.f32 %v256_v23, %v250_v27  ;;  %v351_v39 = vunpack.c.l.bf16 %v347_v31  ;;  %v267_v45 = vld [vmem:[%s732_s25] sm:$0x3]  ;;  %v623_v7 = vld [vmem:[%s732_s25 + $0x2] sm:$0x3] }
  0x15   : > { %245 = vst.msk [vmem:[#allocation2 + $0xc] sm:$0xf] %vm241_vm0, %v240_v16  ;;  %v259_v43 = vmul.f32 %v256_v23, %v251_v29  ;;  %v335_v46 = vmul.f32 %v759_v34, %v326_v33  ;;  %v352_v47 = vunpack.c.l.bf16 %v348_v36  ;;  %v363_v48 = vmul.f32 %v359_v40, %v354_v42  ;;  %v669_v10 = vld [vmem:[%s896_s1 + $0x8] ss:$0 sm:$0xff]  ;;  %v617_v22 = vld [vmem:[%s732_s25 + $0x2] sm:$0x3] }
  0x16   : > { %242 = vst.msk [vmem:[#allocation2] sm:$0xf] %vm241_vm0, %v237_v19  ;;  %v353_v52 = vunpack.c.l.bf16 %v349_v41  ;;  %v360_v55 = vmul.f32 %v359_v40, %v351_v39  ;;  %v270_v58 = vunpack.c.l.bf16 %v267_v45  ;;  %v271_v62 = vunpack.c.l.bf16 %v268_v51  ;;  %v323_v29 = vld [vmem:[%s732_s25 + $0x2] sm:$0x3]  ;;  %v324_v31 = vld [vmem:[%s732_s25 + $0x4] sm:$0x3] }
  0x17   : > { %302 = vst [vmem:[#allocation1] ss:$2 sm:$0xff] %v296_v24  ;;  %v361_v1 = vmul.f32 %v359_v40, %v352_v47  ;;  %v272_v2 = vunpack.c.l.bf16 %v269_v56  ;;  %v437_v9 = vunpack.c.l.bf16 %v623_v7  ;;  %v399_v26 = vunpack.c.l.bf16 %v617_v22  ;;  %v624_v39 = vld [vmem:[%s732_s25 + $0x4] sm:$0x3] }
  0x18   : > { %305 = vst [vmem:[#allocation1 + $0x10] ss:$2 sm:$0xff] %v297_v30  ;;  %v362_v4 = vmul.f32 %v359_v40, %v353_v52  ;;  %v277_v6 = vmul.f32 %v276_v59, %v270_v58  ;;  %v278_v8 = vmul.f32 %v276_v59, %v271_v62  ;;  %v784_v27 = vperm.slane %v727_v0, 6  ;;  %v625_v40 = vld [vmem:[%s732_s25 + $0x6] sm:$0x3] }
  0x19   : > { %308 = vst [vmem:[#allocation1 + $0x20] ss:$2 sm:$0xff] %v298_v32  ;;  %v279_v11 = vmul.f32 %v276_v59, %v272_v2  ;;  %v444_v17 = vmul.f32 %v669_v10, %v437_v9  ;;  %v327_v41 = vunpack.c.l.bf16 %v323_v29  ;;  %v328_v45 = vunpack.c.l.bf16 %v324_v31  ;;  %v848_v29 = vld [vmem:[%s898_s3 + $0x18] sm:$0xf]  ;;  %v858_v31 = vld [vmem:[%s899_s4] sm:$0x1] }
  0x1a   : > { %v253_v44 = vld [vmem:[#allocation2 + $0x5] sm:$0x7]  ;;  %377 = vst [vmem:[#allocation1 + $0x30] ss:$2 sm:$0xff] %v363_v48  ;;  %v620_v48 = vld [vmem:[%s732_s25 + $0x2] sm:$0x3] }
  0x1b   : > { %v260_v49 = vadd.f32 %v257_v35, %v253_v44  ;;  %v254_v50 = vld [vmem:[#allocation2 + $0x9] sm:$0x7]  ;;  %v325_v35 = vld [vmem:[%s732_s25 + $0x6] sm:$0x3]  ;;  %v439_v44 = vunpack.c.l.bf16 %v625_v40  ;;  %v418_v56 = vunpack.c.l.bf16 %v620_v48 }
  0x1c   : > { %v261_v53 = vadd.f32 %v258_v38, %v254_v50  ;;  %v255_v54 = vld [vmem:[#allocation2 + $0xd] sm:$0x7]  ;;  %v406_v38 = vmul.f32 %v784_v27, %v399_v26  ;;  %v329_v47 = vunpack.c.l.bf16 %v325_v35  ;;  %v621_v35 = vld [vmem:[%s732_s25 + $0x4] sm:$0x3] }
  0x1d   : > { %264 = vst.msk [vmem:[#allocation2 + $0x5] sm:$0x7] %vm263_vm1, %v260_v49  ;;  %v262_v57 = vadd.f32 %v259_v43, %v255_v54  ;;  %v330_v60 = vld [vmem:[#allocation2 + $0x1] sm:$0x7]  ;;  %v438_v43 = vunpack.c.l.bf16 %v624_v39  ;;  %v446_v50 = vmul.f32 %v669_v10, %v439_v44  ;;  %v337_v54 = vmul.f32 %v759_v34, %v328_v45  ;;  %v843_v26 = vld [vmem:[%s898_s3 + $0x10] sm:$0xf0] }
  0x1e   : > { %265 = vst.msk [vmem:[#allocation2 + $0x9] sm:$0x7] %vm263_vm1, %v261_v53  ;;  %v303_v61 = vld.sshfl [vmem:[#allocation1] sm:$0xff pattern:$0x75316420]  ;;  %v339_v63 = vadd.f32 %v335_v46, %v330_v60  ;;  %v336_v53 = vmul.f32 %v759_v34, %v327_v41  ;;  %v338_v58 = vmul.f32 %v759_v34, %v329_v47  ;;  %v419_v41 = vunpack.c.l.bf16 %v621_v35 }
  0x1f   : > { %266 = vst.msk [vmem:[#allocation2 + $0xd] sm:$0x7] %vm263_vm1, %v262_v57  ;;  %v306_v3 = vld.sshfl [vmem:[#allocation1 + $0x10] sm:$0xff pattern:$0x75316420]  ;;  %v310_v24 = vrot.slane %v303_v61, 1  ;;  %v445_v49 = vmul.f32 %v669_v10, %v438_v43 }
  0x20   : > { %368 = vst [vmem:[#allocation1] ss:$2 sm:$0xff] %v360_v55  ;;  %v309_v5 = vld.sshfl [vmem:[#allocation1 + $0x20] sm:$0xff pattern:$0x75316420]  ;;  %v311_v25 = vrot.slane %v306_v3, 1 }
  0x21   : > { %343 = vst.msk [vmem:[#allocation2 + $0x1] sm:$0x7] %vm263_vm1, %v339_v63  ;;  %v312_v28 = vrot.slane %v309_v5, 1  ;;  %v424_v57 = vperm.slane %v727_v0, 7  ;;  %v619_v10 = vld [vmem:[%s732_s25 + $0x6] sm:$0x3] }
  0x22   : > { %371 = vst [vmem:[#allocation1 + $0x10] ss:$2 sm:$0xff] %v361_v1  ;;  %v401_v22 = vunpack.c.l.bf16 %v619_v10 }
  0x23   : > { %374 = vst [vmem:[#allocation1 + $0x20] ss:$2 sm:$0xff] %v362_v4  ;;  %v425_v1 = vmul.f32 %v424_v57, %v418_v56  ;;  %v378_v4 = vld.sshfl [vmem:[#allocation1 + $0x30] sm:$0xff pattern:$0x75316420]  ;;  %v426_v43 = vmul.f32 %v424_v57, %v419_v41 }
  0x24   : > { %v273_v12 = vld [vmem:[#allocation2 + $0x4] sm:$0xf]  ;;  %v382_v7 = vrot.slane %v378_v4, 1 }
  0x25   : > { %v280_v13 = vadd.f32 %v277_v6, %v273_v12  ;;  %v274_v14 = vld [vmem:[#allocation2 + $0x8] sm:$0xf] }
  0x26   : > { %v281_v15 = vadd.f32 %v278_v8, %v274_v14  ;;  %v275_v16 = vld [vmem:[#allocation2 + $0xc] sm:$0xf]  ;;  %v618_v8 = vld [vmem:[%s732_s25 + $0x4] sm:$0x3] }
  0x27   : > { %283 = vst.msk [vmem:[#allocation2 + $0x4] sm:$0xf] %vm241_vm0, %v280_v13  ;;  %v282_v18 = vadd.f32 %v279_v11, %v275_v16  ;;  %v369_v19 = vld.sshfl [vmem:[#allocation1] sm:$0xff pattern:$0x75316420] }
  0x28   : > { %284 = vst.msk [vmem:[#allocation2 + $0x8] sm:$0xf] %vm241_vm0, %v281_v15  ;;  %v355_v20 = vld [vmem:[#allocation2] sm:$0x7]  ;;  %v379_v21 = vrot.slane %v369_v19, 1 }
  0x29   : > { %285 = vst.msk [vmem:[#allocation2 + $0xc] sm:$0xf] %vm241_vm0, %v282_v18  ;;  %v372_v52 = vld.sshfl [vmem:[#allocation1 + $0x10] sm:$0xff pattern:$0x75316420]  ;;  %v400_v18 = vunpack.c.l.bf16 %v618_v8 }
  0x2a   : > { %v387_v23 = vadd.f32 %v379_v21, %v355_v20  ;;  %450 = vst [vmem:[#allocation1] ss:$2 sm:$0xff] %v444_v17  ;;  %v375_v55 = vld.sshfl [vmem:[#allocation1 + $0x20] sm:$0xff pattern:$0x75316420]  ;;  %v380_v34 = vrot.slane %v372_v52, 1 }
  0x2b   : > { %453 = vst [vmem:[#allocation1 + $0x10] ss:$2 sm:$0xff] %v445_v49  ;;  %v381_v5 = vrot.slane %v375_v55, 1  ;;  %v810_v16 = vld [vmem:[%s897_s2] sm:$0x1] }
  0x2c   : > { %391 = vst.msk [vmem:[#allocation2] sm:$0x7] %vm263_vm1, %v387_v23  ;;  %v815_v17 = vld [vmem:[%s898_s3] sm:$0xf]  ;;  %v821_v20 = vld [vmem:[%s898_s3] sm:$0xf0] }
  0x2d   : > { %456 = vst [vmem:[#allocation1 + $0x20] ss:$2 sm:$0xff] %v446_v50  ;;  %v826_v21 = vld [vmem:[%s898_s3 + $0x8] sm:$0xf]  ;;  %v832_v23 = vld [vmem:[%s898_s3 + $0x8] sm:$0xf0] }
  0x2e   : > { %v292_v30 = vld [vmem:[#allocation2 + $0x4] sm:$0x7] }
  0x2f   : > { %v316_v32 = vadd.f32 %v310_v24, %v292_v30  ;;  %v293_v33 = vld [vmem:[#allocation2 + $0x8] sm:$0x7]  ;;  %v853_v30 = vld [vmem:[%s898_s3 + $0x18] sm:$0xf0] }
  0x30   : > { %v317_v36 = vadd.f32 %v311_v25, %v293_v33  ;;  %v294_v37 = vld [vmem:[#allocation2 + $0xc] sm:$0x7]  ;;  %v837_v24 = vld [vmem:[%s898_s3 + $0x10] sm:$0xf]  ;;  %v408_v33 = vmul.f32 %v784_v27, %v401_v22 }
  0x31   : > { %319 = vst.msk [vmem:[#allocation2 + $0x4] sm:$0x7] %vm263_vm1, %v316_v32  ;;  %v318_v42 = vadd.f32 %v312_v28, %v294_v37  ;;  %v451_v6 = vld.sshfl [vmem:[#allocation1] sm:$0xff pattern:$0x75316420]  ;;  %v407_v32 = vmul.f32 %v784_v27, %v400_v18 }
  0x32   : > { %320 = vst.msk [vmem:[#allocation2 + $0x8] sm:$0x7] %vm263_vm1, %v317_v36  ;;  %v458_v13 = vrot.slane %v451_v6, 1  ;;  %v622_v37 = vld [vmem:[%s732_s25 + $0x6] sm:$0x3]  ;;  %s871_s25 = smov 0  }
  0x33   : > { %321 = vst.msk [vmem:[#allocation2 + $0xc] sm:$0x7] %vm263_vm1, %v318_v42  ;;  %v402_v46 = vld [vmem:[#allocation2 + $0x1] sm:$0x7]  ;;  %v420_v42 = vunpack.c.l.bf16 %v622_v37 }
  0x34   : > { %v409_v51 = vadd.f32 %v406_v38, %v402_v46  ;;  %v454_v48 = vld.sshfl [vmem:[#allocation1 + $0x10] sm:$0xff pattern:$0x75316420]  ;;  %v457_v49 = vld.sshfl [vmem:[#allocation1 + $0x20] sm:$0xff pattern:$0x75316420] }
  0x35   : > { %v427_v44 = vmul.f32 %v424_v57, %v420_v42  ;;  %v459_v50 = vrot.slane %v454_v48, 1 }
  0x36   : > { %412 = vst.msk [vmem:[#allocation2 + $0x1] sm:$0x7] %vm263_vm1, %v409_v51  ;;  %v460_v51 = vrot.slane %v457_v49, 1 }
  0x38   : > { %v331_v59 = vld [vmem:[#allocation2 + $0x5] sm:$0x7] }
  0x39   : > { %v340_v60 = vadd.f32 %v336_v53, %v331_v59  ;;  %v332_v61 = vld [vmem:[#allocation2 + $0x9] sm:$0x7] }
  0x3a   : > { %v341_v62 = vadd.f32 %v337_v54, %v332_v61  ;;  %v333_v63 = vld [vmem:[#allocation2 + $0xd] sm:$0x7] }
  0x3b   : > { %344 = vst.msk [vmem:[#allocation2 + $0x5] sm:$0x7] %vm263_vm1, %v340_v60  ;;  %v342_v2 = vadd.f32 %v338_v58, %v333_v63 }
  0x3c   : > { %345 = vst.msk [vmem:[#allocation2 + $0x9] sm:$0x7] %vm263_vm1, %v341_v62 }
  0x3d   : > { %346 = vst.msk [vmem:[#allocation2 + $0xd] sm:$0x7] %vm263_vm1, %v342_v2  ;;  %v421_v3 = vld [vmem:[#allocation2] sm:$0xf] }
  0x3e   : > { %v428_v0 = vadd.f32 %v425_v1, %v421_v3 }
  0x40   : > { %431 = vst.msk [vmem:[#allocation2] sm:$0xf] %vm241_vm0, %v428_v0 }
  0x42   : > { %v356_v9 = vld [vmem:[#allocation2 + $0x4] sm:$0x7] }
  0x43   : > { %v388_v11 = vadd.f32 %v380_v34, %v356_v9  ;;  %v357_v12 = vld [vmem:[#allocation2 + $0x8] sm:$0x7] }
  0x44   : > { %v389_v14 = vadd.f32 %v381_v5, %v357_v12  ;;  %v358_v15 = vld [vmem:[#allocation2 + $0xc] sm:$0x7] }
  0x45   : > { %392 = vst.msk [vmem:[#allocation2 + $0x4] sm:$0x7] %vm263_vm1, %v388_v11  ;;  %v390_v19 = vadd.f32 %v382_v7, %v358_v15 }
  0x46   : > { %393 = vst.msk [vmem:[#allocation2 + $0x8] sm:$0x7] %vm263_vm1, %v389_v14 }
  0x47   : > { %394 = vst.msk [vmem:[#allocation2 + $0xc] sm:$0x7] %vm263_vm1, %v390_v19  ;;  %v440_v25 = vld [vmem:[#allocation2] sm:$0x7] }
  0x48   : > { %v464_v28 = vadd.f32 %v458_v13, %v440_v25 }
  0x4a   : > { %467 = vst.msk [vmem:[#allocation2] sm:$0x7] %vm263_vm1, %v464_v28 }
  0x4c   : > { %v403_v36 = vld [vmem:[#allocation2 + $0x5] sm:$0x7] }
  0x4d   : > { %v410_v38 = vadd.f32 %v407_v32, %v403_v36  ;;  %v404_v39 = vld [vmem:[#allocation2 + $0x9] sm:$0x7] }
  0x4e   : > { %v411_v40 = vadd.f32 %v408_v33, %v404_v39 }
  0x4f   : > { %413 = vst.msk [vmem:[#allocation2 + $0x5] sm:$0x7] %vm263_vm1, %v410_v38 }
  0x50   : > { %414 = vst.msk [vmem:[#allocation2 + $0x9] sm:$0x7] %vm263_vm1, %v411_v40 }
  0x56   : > { %v422_v45 = vld [vmem:[#allocation2 + $0x4] sm:$0xf] }
  0x57   : > { %v429_v46 = vadd.f32 %v426_v43, %v422_v45  ;;  %v423_v47 = vld [vmem:[#allocation2 + $0x8] sm:$0xf] }
  0x58   : > { %v430_v27 = vadd.f32 %v427_v44, %v423_v47 }
  0x59   : > { %432 = vst.msk [vmem:[#allocation2 + $0x4] sm:$0xf] %vm241_vm0, %v429_v46 }
  0x5a   : > { %433 = vst.msk [vmem:[#allocation2 + $0x8] sm:$0xf] %vm241_vm0, %v430_v27 }
  0x60   : > { %v441_v52 = vld [vmem:[#allocation2 + $0x4] sm:$0x7] }
  0x61   : > { %v465_v53 = vadd.f32 %v459_v50, %v441_v52  ;;  %v442_v54 = vld [vmem:[#allocation2 + $0x8] sm:$0x7] }
  0x62   : > { %v466_v55 = vadd.f32 %v460_v51, %v442_v54 }
  0x63   : > { %468 = vst.msk [vmem:[#allocation2 + $0x4] sm:$0x7] %vm263_vm1, %v465_v53 }
  0x64   : > { %469 = vst.msk [vmem:[#allocation2 + $0x8] sm:$0x7] %vm263_vm1, %v466_v55 }
  0x65 LB: >> { %v642_v56 = vor.u32 %v853_v30, %v848_v29  ;;  %v490_v57 = vperm.slane %v810_v16, 0  ;;  %v638_v58 = vor.u32 %v843_v26, %v837_v24  ;;  %s626_s29 = sshll.u32 %s684_s25, 2  ;;  %v634_v61 = vor.u32 %v832_v23, %v826_v21  ;;  %s644_s6 = sshll.u32 %s684_s25, 1  ;;  %s684_s25 = sphi %s871_s25, %s485_s25  }
  0x66   : >> { %s487_s30 = scalar_lea.vmem [#allocation2], %s626_s29  ;;  %v630_v63 = vor.u32 %v821_v20, %v815_v17  ;;  %vm522_vm2 = vcmask 523264   ;;  %v496_v2 = vperm.slane %v858_v31, 0  ;;  %s541_s7 = scalar_lea.vmem %s737_s28, %s644_s6  ;;  %vm542_vm3 = vcmask 517120  }
  0x67   : >> { %530 = vmatpush.bf16.msra.mxu0 %v642_v56  ;;  %s485_s25 = sadd.s32 1, %s684_s25  }
  0x68   : >> { %p482_p4 = scmp.ge.s32.totalorder %s485_s25, 4  }
  0x6b   : >> { %v488_v59 = vld [vmem:[%s487_s30] sm:$0xf]  ;;  %531 = vmatpush.bf16.msra.mxu0 %v638_v58 }
  0x6c   : >> { %v492_v60 = vadd.f32 %v490_v57, %v488_v59 }
  0x6e   : >> { %v493_v62 = vmax.f32 %v492_v60, 0.0 }
  0x6f   : >> { %532 = vmatpush.bf16.msra.mxu0 %v634_v61 }
  0x70   : >> { %v494_v1 = vpack.c.bf16 %v493_v62, %v493_v62 }
  0x73   : >> { %533 = vmatpush.bf16.msra.mxu0 %v630_v63 }
  0x76   : >> { %643 = vmatmul.msk.bf16.vlgmr.msra.gmra.mxu0 %vm522_vm2, %v494_v1 }
  0xf3   : >> { %v535_v3 = vpop.f32.mrf.mxu0 }
  0xf4   : >> { %v536_v0 = vadd.f32 %v535_v3, %v496_v2 }
  0xf6   : >> { %v539_v4 = vpack.c.bf16 %v536_v0, %v536_v0 }
  0xf7   : > { %484 = sbr.rel (!%p482_p4) target bundleno = 101 (0x65), region = 88 }
  0xf8   : >> { %543 = vst.msk [vmem:[%s541_s7] sm:$0x3] %vm542_vm3, %v539_v4 }
  0xfb   : >> { %v537_v34 = vpop.f32.mrf.mxu0 }
  0xfc PF: > { %s15_s18 = sadd.s32 1, %s680_s18  }
  0xfd   : > { %p12_p5 = scmp.ge.s32.totalorder %s15_s18, 4  }
  0xff   :  { %14 = sbr.rel (!%p12_p5) target bundleno = 1 (0x1), region = 99 }

// kernel: encoder_forward.32
= control target key start
LH: loop header
LB: loop body
LE: loop exit
PB: predicated region body
PF: predicated region fallthrough
CT: control target
= control target key end

     0   :  { %s792_s21 = smov 0   ;;  %s986_s0 = inlined_call_operand.vmem [shape: bf16[2,4,4,64], index: 0, kind: input, shape index: {}]   ;;  %s987_s1 = inlined_call_operand.vmem [shape: f32[9,64], index: 1, kind: input, shape index: {}]   ;;  %s988_s2 = inlined_call_operand.vmem [shape: f32[1,64], index: 2, kind: input, shape index: {}]   ;;  %s989_s3 = inlined_call_operand.vmem [shape: bf16[64,64], index: 3, kind: input, shape index: {}]   ;;  %s990_s4 = inlined_call_operand.vmem [shape: f32[1,64], index: 4, kind: input, shape index: {}]   ;;  %s991_s5 = inlined_call_operand.vmem [shape: bf16[2,4,4,64], index: 5, kind: input, shape index: {}]   ;;  %s992_s6 = inlined_call_operand.vmem [shape: bf16[2,4,4,64], index: 6, kind: output, shape index: {}]  }
   0x1 LB: > { %s675_s22 = sadd.s32 4294967295, %s751_s21   ;;  %p679_p0 = scmp.ge.s32.totalorder %s751_s21, 1  ;;  %s751_s21 = sphi %s792_s21, %s16_s21  }
   0x2   : > { %p222_p1 = scmp.lt.s32.totalorder %s751_s21, 3 }
   0x4   : > { %p223_p2 = pnand %p679_p0, %p222_p1 }
   0x5   : > { %p257_p3 = scmp.lt.s32.totalorder (!%p223_p2), %s675_s22, 1 }
   0x6   : > { %226 = sbr.rel (%p223_p2) target bundleno = 253 (0xfd), region = 44 }
   0xb   : > { %s994_s22 = smov (!%p257_p3, %s675_s22), 1  ;;  %v803_v0 = vld [vmem:[%s987_s1] sm:$0xff]  ;;  %vm288_vm0 = vcmask 519168   ;;  %vm310_vm1 = vcmask 518144  }
   0xc   : > { %s805_s25 = sshll.u32 %s994_s22, 3  ;;  %v283_v1 = vperm.slane %v803_v0, 4  ;;  %v342_v9 = vperm.slane %v803_v0, 2  ;;  %v303_v23 = vperm.slane %v803_v0, 0  ;;  %v841_v34 = vperm.slane %v803_v0, 3 }
   0xd   : > { %s811_s28 = scalar_lea.vmem %s986_s0, %s805_s25  ;;  %s266_s7 = scalar_lea.vmem %s991_s5, %s805_s25  ;;  %v406_v40 = vperm.slane %v803_v0, 5  ;;  %v323_v59 = vperm.slane %v803_v0, 1 }
   0xe   : > { %s271_s10 = scalar_lea.vmem %s992_s6, %s805_s25  ;;  %v276_v2 = vld [vmem:[%s811_s28 + $0x2] sm:$0x3]  ;;  %v277_v3 = vld [vmem:[%s811_s28 + $0x4] sm:$0x3]  ;;  %v278_v4 = vld [vmem:[%s811_s28 + $0x6] sm:$0x3] }
   0xf   : > { %v280_v5 = vunpack.c.l.bf16 %v276_v2  ;;  %v281_v6 = vunpack.c.l.bf16 %v277_v3  ;;  %v282_v7 = vunpack.c.l.bf16 %v278_v4  ;;  %v275_v8 = vld [vmem:[%s811_s28] sm:$0x3]  ;;  %v334_v13 = vld [vmem:[%s811_s28 + $0x2] sm:$0x3]  ;;  %v295_v20 = vld [vmem:[%s811_s28 + $0x4] sm:$0x3] }
  0x10   : > { %v279_v10 = vunpack.c.l.bf16 %v275_v8  ;;  %v293_v11 = vld [vmem:[%s811_s28] sm:$0x3]  ;;  %v294_v17 = vld [vmem:[%s811_s28 + $0x2] sm:$0x3]  ;;  %v335_v21 = vld [vmem:[%s811_s28 + $0x4] sm:$0x3]  ;;  %v337_v25 = vunpack.c.l.bf16 %v334_v13  ;;  %v298_v29 = vunpack.c.l.bf16 %v295_v20 }
  0x11   : > { %v333_v12 = vld [vmem:[%s811_s28] sm:$0x3]  ;;  %v285_v14 = vmul.f32 %v283_v1, %v280_v5  ;;  %v286_v15 = vmul.f32 %v283_v1, %v281_v6  ;;  %v287_v16 = vmul.f32 %v283_v1, %v282_v7  ;;  %v296_v22 = vunpack.c.l.bf16 %v293_v11  ;;  %v395_v36 = vld [vmem:[%s811_s28 + $0x2] sm:$0x3]  ;;  %v397_v37 = vld [vmem:[%s811_s28 + $0x6] sm:$0x3] }
  0x12   : > { %v336_v18 = vunpack.c.l.bf16 %v333_v12  ;;  %v284_v19 = vmul.f32 %v283_v1, %v279_v10  ;;  %v369_v26 = vld [vmem:[%s811_s28] sm:$0x3]  ;;  %v297_v27 = vunpack.c.l.bf16 %v294_v17  ;;  %v338_v28 = vunpack.c.l.bf16 %v335_v21  ;;  %v396_v41 = vld [vmem:[%s811_s28 + $0x4] sm:$0x3]  ;;  %v315_v51 = vld [vmem:[%s811_s28 + $0x2] sm:$0x3] }
  0x13   : > { %290 = vst.msk [vmem:[#allocation2 + $0x4] sm:$0xf] %vm288_vm0, %v285_v14  ;;  %v344_v30 = vmul.f32 %v342_v9, %v337_v25  ;;  %v394_v31 = vld [vmem:[%s811_s28] sm:$0x3]  ;;  %v373_v33 = vunpack.c.l.bf16 %v369_v26  ;;  %v304_v35 = vmul.f32 %v303_v23, %v296_v22  ;;  %v401_v42 = vunpack.c.l.bf16 %v397_v37  ;;  %v316_v56 = vld [vmem:[%s811_s28 + $0x4] sm:$0x3] }
  0x14   : > { %v343_v24 = vmul.f32 %v342_v9, %v336_v18  ;;  %291 = vst.msk [vmem:[#allocation2 + $0x8] sm:$0xf] %vm288_vm0, %v286_v15  ;;  %v345_v32 = vmul.f32 %v342_v9, %v338_v28  ;;  %v305_v38 = vmul.f32 %v303_v23, %v297_v27  ;;  %v398_v39 = vunpack.c.l.bf16 %v394_v31  ;;  %v314_v45 = vld [vmem:[%s811_s28] sm:$0x3]  ;;  %v692_v7 = vld [vmem:[%s811_s28 + $0x2] sm:$0x3] }
  0x15   : > { %292 = vst.msk [vmem:[#allocation2 + $0xc] sm:$0xf] %vm288_vm0, %v287_v16  ;;  %v306_v43 = vmul.f32 %v303_v23, %v298_v29  ;;  %v382_v46 = vmul.f32 %v841_v34, %v373_v33  ;;  %v399_v47 = vunpack.c.l.bf16 %v395_v36  ;;  %v410_v48 = vmul.f32 %v406_v40, %v401_v42  ;;  %v740_v10 = vld [vmem:[%s987_s1 + $0x8] ss:$0 sm:$0xff]  ;;  %v686_v22 = vld [vmem:[%s811_s28 + $0x2] sm:$0x3] }
  0x16   : > { %289 = vst.msk [vmem:[#allocation2] sm:$0xf] %vm288_vm0, %v284_v19  ;;  %v400_v52 = vunpack.c.l.bf16 %v396_v41  ;;  %v407_v55 = vmul.f32 %v406_v40, %v398_v39  ;;  %v317_v58 = vunpack.c.l.bf16 %v314_v45  ;;  %v318_v62 = vunpack.c.l.bf16 %v315_v51  ;;  %v370_v29 = vld [vmem:[%s811_s28 + $0x2] sm:$0x3]  ;;  %v371_v31 = vld [vmem:[%s811_s28 + $0x4] sm:$0x3] }
  0x17   : > { %349 = vst [vmem:[#allocation1] ss:$2 sm:$0xff] %v343_v24  ;;  %v408_v1 = vmul.f32 %v406_v40, %v399_v47  ;;  %v319_v2 = vunpack.c.l.bf16 %v316_v56  ;;  %v484_v9 = vunpack.c.l.bf16 %v692_v7  ;;  %v446_v26 = vunpack.c.l.bf16 %v686_v22  ;;  %v693_v39 = vld [vmem:[%s811_s28 + $0x4] sm:$0x3] }
  0x18   : > { %352 = vst [vmem:[#allocation1 + $0x10] ss:$2 sm:$0xff] %v344_v30  ;;  %v409_v4 = vmul.f32 %v406_v40, %v400_v52  ;;  %v324_v6 = vmul.f32 %v323_v59, %v317_v58  ;;  %v325_v8 = vmul.f32 %v323_v59, %v318_v62  ;;  %v866_v27 = vperm.slane %v803_v0, 6  ;;  %v694_v40 = vld [vmem:[%s811_s28 + $0x6] sm:$0x3] }
  0x19   : > { %355 = vst [vmem:[#allocation1 + $0x20] ss:$2 sm:$0xff] %v345_v32  ;;  %v326_v11 = vmul.f32 %v323_v59, %v319_v2  ;;  %v491_v17 = vmul.f32 %v740_v10, %v484_v9  ;;  %v374_v41 = vunpack.c.l.bf16 %v370_v29  ;;  %v375_v45 = vunpack.c.l.bf16 %v371_v31  ;;  %v930_v29 = vld [vmem:[%s989_s3 + $0x18] sm:$0xf]  ;;  %v940_v31 = vld [vmem:[%s990_s4] sm:$0x1] }
  0x1a   : > { %v300_v44 = vld [vmem:[#allocation2 + $0x5] sm:$0x7]  ;;  %424 = vst [vmem:[#allocation1 + $0x30] ss:$2 sm:$0xff] %v410_v48  ;;  %v689_v48 = vld [vmem:[%s811_s28 + $0x2] sm:$0x3] }
  0x1b   : > { %v307_v49 = vadd.f32 %v304_v35, %v300_v44  ;;  %v301_v50 = vld [vmem:[#allocation2 + $0x9] sm:$0x7]  ;;  %v372_v35 = vld [vmem:[%s811_s28 + $0x6] sm:$0x3]  ;;  %v486_v44 = vunpack.c.l.bf16 %v694_v40  ;;  %v465_v56 = vunpack.c.l.bf16 %v689_v48 }
  0x1c   : > { %v308_v53 = vadd.f32 %v305_v38, %v301_v50  ;;  %v302_v54 = vld [vmem:[#allocation2 + $0xd] sm:$0x7]  ;;  %v453_v38 = vmul.f32 %v866_v27, %v446_v26  ;;  %v376_v47 = vunpack.c.l.bf16 %v372_v35  ;;  %v690_v35 = vld [vmem:[%s811_s28 + $0x4] sm:$0x3] }
  0x1d   : > { %311 = vst.msk [vmem:[#allocation2 + $0x5] sm:$0x7] %vm310_vm1, %v307_v49  ;;  %v309_v57 = vadd.f32 %v306_v43, %v302_v54  ;;  %v377_v60 = vld [vmem:[#allocation2 + $0x1] sm:$0x7]  ;;  %v485_v43 = vunpack.c.l.bf16 %v693_v39  ;;  %v493_v50 = vmul.f32 %v740_v10, %v486_v44  ;;  %v384_v54 = vmul.f32 %v841_v34, %v375_v45  ;;  %v925_v26 = vld [vmem:[%s989_s3 + $0x10] sm:$0xf0] }
  0x1e   : > { %312 = vst.msk [vmem:[#allocation2 + $0x9] sm:$0x7] %vm310_vm1, %v308_v53  ;;  %v350_v61 = vld.sshfl [vmem:[#allocation1] sm:$0xff pattern:$0x75316420]  ;;  %v386_v63 = vadd.f32 %v382_v46, %v377_v60  ;;  %v383_v53 = vmul.f32 %v841_v34, %v374_v41  ;;  %v385_v58 = vmul.f32 %v841_v34, %v376_v47  ;;  %v466_v41 = vunpack.c.l.bf16 %v690_v35 }
  0x1f   : > { %313 = vst.msk [vmem:[#allocation2 + $0xd] sm:$0x7] %vm310_vm1, %v309_v57  ;;  %v353_v3 = vld.sshfl [vmem:[#allocation1 + $0x10] sm:$0xff pattern:$0x75316420]  ;;  %v357_v24 = vrot.slane %v350_v61, 1  ;;  %v492_v49 = vmul.f32 %v740_v10, %v485_v43 }
  0x20   : > { %415 = vst [vmem:[#allocation1] ss:$2 sm:$0xff] %v407_v55  ;;  %v356_v5 = vld.sshfl [vmem:[#allocation1 + $0x20] sm:$0xff pattern:$0x75316420]  ;;  %v358_v25 = vrot.slane %v353_v3, 1 }
  0x21   : > { %390 = vst.msk [vmem:[#allocation2 + $0x1] sm:$0x7] %vm310_vm1, %v386_v63  ;;  %v359_v28 = vrot.slane %v356_v5, 1  ;;  %v471_v57 = vperm.slane %v803_v0, 7  ;;  %v688_v10 = vld [vmem:[%s811_s28 + $0x6] sm:$0x3] }
  0x22   : > { %418 = vst [vmem:[#allocation1 + $0x10] ss:$2 sm:$0xff] %v408_v1  ;;  %v448_v22 = vunpack.c.l.bf16 %v688_v10 }
  0x23   : > { %421 = vst [vmem:[#allocation1 + $0x20] ss:$2 sm:$0xff] %v409_v4  ;;  %v472_v1 = vmul.f32 %v471_v57, %v465_v56  ;;  %v425_v4 = vld.sshfl [vmem:[#allocation1 + $0x30] sm:$0xff pattern:$0x75316420]  ;;  %v473_v43 = vmul.f32 %v471_v57, %v466_v41 }
  0x24   : > { %v320_v12 = vld [vmem:[#allocation2 + $0x4] sm:$0xf]  ;;  %v429_v7 = vrot.slane %v425_v4, 1 }
  0x25   : > { %v327_v13 = vadd.f32 %v324_v6, %v320_v12  ;;  %v321_v14 = vld [vmem:[#allocation2 + $0x8] sm:$0xf] }
  0x26   : > { %v328_v15 = vadd.f32 %v325_v8, %v321_v14  ;;  %v322_v16 = vld [vmem:[#allocation2 + $0xc] sm:$0xf]  ;;  %v687_v8 = vld [vmem:[%s811_s28 + $0x4] sm:$0x3] }
  0x27   : > { %330 = vst.msk [vmem:[#allocation2 + $0x4] sm:$0xf] %vm288_vm0, %v327_v13  ;;  %v329_v18 = vadd.f32 %v326_v11, %v322_v16  ;;  %v416_v19 = vld.sshfl [vmem:[#allocation1] sm:$0xff pattern:$0x75316420] }
  0x28   : > { %331 = vst.msk [vmem:[#allocation2 + $0x8] sm:$0xf] %vm288_vm0, %v328_v15  ;;  %v402_v20 = vld [vmem:[#allocation2] sm:$0x7]  ;;  %v426_v21 = vrot.slane %v416_v19, 1 }
  0x29   : > { %332 = vst.msk [vmem:[#allocation2 + $0xc] sm:$0xf] %vm288_vm0, %v329_v18  ;;  %v419_v52 = vld.sshfl [vmem:[#allocation1 + $0x10] sm:$0xff pattern:$0x75316420]  ;;  %v447_v18 = vunpack.c.l.bf16 %v687_v8 }
  0x2a   : > { %v434_v23 = vadd.f32 %v426_v21, %v402_v20  ;;  %497 = vst [vmem:[#allocation1] ss:$2 sm:$0xff] %v491_v17  ;;  %v422_v55 = vld.sshfl [vmem:[#allocation1 + $0x20] sm:$0xff pattern:$0x75316420]  ;;  %v427_v34 = vrot.slane %v419_v52, 1 }
  0x2b   : > { %500 = vst [vmem:[#allocation1 + $0x10] ss:$2 sm:$0xff] %v492_v49  ;;  %v428_v5 = vrot.slane %v422_v55, 1  ;;  %v892_v16 = vld [vmem:[%s988_s2] sm:$0x1] }
  0x2c   : > { %438 = vst.msk [vmem:[#allocation2] sm:$0x7] %vm310_vm1, %v434_v23  ;;  %v897_v17 = vld [vmem:[%s989_s3] sm:$0xf]  ;;  %v903_v20 = vld [vmem:[%s989_s3] sm:$0xf0] }
  0x2d   : > { %503 = vst [vmem:[#allocation1 + $0x20] ss:$2 sm:$0xff] %v493_v50  ;;  %v908_v21 = vld [vmem:[%s989_s3 + $0x8] sm:$0xf]  ;;  %v914_v23 = vld [vmem:[%s989_s3 + $0x8] sm:$0xf0] }
  0x2e   : > { %v339_v30 = vld [vmem:[#allocation2 + $0x4] sm:$0x7] }
  0x2f   : > { %v363_v32 = vadd.f32 %v357_v24, %v339_v30  ;;  %v340_v33 = vld [vmem:[#allocation2 + $0x8] sm:$0x7]  ;;  %v935_v30 = vld [vmem:[%s989_s3 + $0x18] sm:$0xf0] }
  0x30   : > { %v364_v36 = vadd.f32 %v358_v25, %v340_v33  ;;  %v341_v37 = vld [vmem:[#allocation2 + $0xc] sm:$0x7]  ;;  %v919_v24 = vld [vmem:[%s989_s3 + $0x10] sm:$0xf]  ;;  %v455_v33 = vmul.f32 %v866_v27, %v448_v22 }
  0x31   : > { %366 = vst.msk [vmem:[#allocation2 + $0x4] sm:$0x7] %vm310_vm1, %v363_v32  ;;  %v365_v42 = vadd.f32 %v359_v28, %v341_v37  ;;  %v498_v6 = vld.sshfl [vmem:[#allocation1] sm:$0xff pattern:$0x75316420]  ;;  %v454_v32 = vmul.f32 %v866_v27, %v447_v18 }
  0x32   : > { %367 = vst.msk [vmem:[#allocation2 + $0x8] sm:$0x7] %vm310_vm1, %v364_v36  ;;  %v505_v13 = vrot.slane %v498_v6, 1  ;;  %v691_v37 = vld [vmem:[%s811_s28 + $0x6] sm:$0x3]  ;;  %s953_s28 = smov 0  }
  0x33   : > { %368 = vst.msk [vmem:[#allocation2 + $0xc] sm:$0x7] %vm310_vm1, %v365_v42  ;;  %v449_v46 = vld [vmem:[#allocation2 + $0x1] sm:$0x7]  ;;  %v467_v42 = vunpack.c.l.bf16 %v691_v37 }
  0x34   : > { %v456_v51 = vadd.f32 %v453_v38, %v449_v46  ;;  %v501_v48 = vld.sshfl [vmem:[#allocation1 + $0x10] sm:$0xff pattern:$0x75316420]  ;;  %v504_v49 = vld.sshfl [vmem:[#allocation1 + $0x20] sm:$0xff pattern:$0x75316420] }
  0x35   : > { %v474_v44 = vmul.f32 %v471_v57, %v467_v42  ;;  %v506_v50 = vrot.slane %v501_v48, 1 }
  0x36   : > { %459 = vst.msk [vmem:[#allocation2 + $0x1] sm:$0x7] %vm310_vm1, %v456_v51  ;;  %v507_v51 = vrot.slane %v504_v49, 1 }
  0x38   : > { %v378_v59 = vld [vmem:[#allocation2 + $0x5] sm:$0x7] }
  0x39   : > { %v387_v60 = vadd.f32 %v383_v53, %v378_v59  ;;  %v379_v61 = vld [vmem:[#allocation2 + $0x9] sm:$0x7] }
  0x3a   : > { %v388_v62 = vadd.f32 %v384_v54, %v379_v61  ;;  %v380_v63 = vld [vmem:[#allocation2 + $0xd] sm:$0x7] }
  0x3b   : > { %391 = vst.msk [vmem:[#allocation2 + $0x5] sm:$0x7] %vm310_vm1, %v387_v60  ;;  %v389_v2 = vadd.f32 %v385_v58, %v380_v63 }
  0x3c   : > { %392 = vst.msk [vmem:[#allocation2 + $0x9] sm:$0x7] %vm310_vm1, %v388_v62 }
  0x3d   : > { %393 = vst.msk [vmem:[#allocation2 + $0xd] sm:$0x7] %vm310_vm1, %v389_v2  ;;  %v468_v3 = vld [vmem:[#allocation2] sm:$0xf] }
  0x3e   : > { %v475_v0 = vadd.f32 %v472_v1, %v468_v3 }
  0x40   : > { %478 = vst.msk [vmem:[#allocation2] sm:$0xf] %vm288_vm0, %v475_v0 }
  0x42   : > { %v403_v9 = vld [vmem:[#allocation2 + $0x4] sm:$0x7] }
  0x43   : > { %v435_v11 = vadd.f32 %v427_v34, %v403_v9  ;;  %v404_v12 = vld [vmem:[#allocation2 + $0x8] sm:$0x7] }
  0x44   : > { %v436_v14 = vadd.f32 %v428_v5, %v404_v12  ;;  %v405_v15 = vld [vmem:[#allocation2 + $0xc] sm:$0x7] }
  0x45   : > { %439 = vst.msk [vmem:[#allocation2 + $0x4] sm:$0x7] %vm310_vm1, %v435_v11  ;;  %v437_v19 = vadd.f32 %v429_v7, %v405_v15 }
  0x46   : > { %440 = vst.msk [vmem:[#allocation2 + $0x8] sm:$0x7] %vm310_vm1, %v436_v14 }
  0x47   : > { %441 = vst.msk [vmem:[#allocation2 + $0xc] sm:$0x7] %vm310_vm1, %v437_v19  ;;  %v487_v25 = vld [vmem:[#allocation2] sm:$0x7] }
  0x48   : > { %v511_v28 = vadd.f32 %v505_v13, %v487_v25 }
  0x4a   : > { %514 = vst.msk [vmem:[#allocation2] sm:$0x7] %vm310_vm1, %v511_v28 }
  0x4c   : > { %v450_v36 = vld [vmem:[#allocation2 + $0x5] sm:$0x7] }
  0x4d   : > { %v457_v38 = vadd.f32 %v454_v32, %v450_v36  ;;  %v451_v39 = vld [vmem:[#allocation2 + $0x9] sm:$0x7] }
  0x4e   : > { %v458_v40 = vadd.f32 %v455_v33, %v451_v39 }
  0x4f   : > { %460 = vst.msk [vmem:[#allocation2 + $0x5] sm:$0x7] %vm310_vm1, %v457_v38 }
  0x50   : > { %461 = vst.msk [vmem:[#allocation2 + $0x9] sm:$0x7] %vm310_vm1, %v458_v40 }
  0x56   : > { %v469_v45 = vld [vmem:[#allocation2 + $0x4] sm:$0xf] }
  0x57   : > { %v476_v46 = vadd.f32 %v473_v43, %v469_v45  ;;  %v470_v47 = vld [vmem:[#allocation2 + $0x8] sm:$0xf] }
  0x58   : > { %v477_v27 = vadd.f32 %v474_v44, %v470_v47 }
  0x59   : > { %479 = vst.msk [vmem:[#allocation2 + $0x4] sm:$0xf] %vm288_vm0, %v476_v46 }
  0x5a   : > { %480 = vst.msk [vmem:[#allocation2 + $0x8] sm:$0xf] %vm288_vm0, %v477_v27 }
  0x60   : > { %v488_v52 = vld [vmem:[#allocation2 + $0x4] sm:$0x7] }
  0x61   : > { %v512_v53 = vadd.f32 %v506_v50, %v488_v52  ;;  %v489_v54 = vld [vmem:[#allocation2 + $0x8] sm:$0x7] }
  0x62   : > { %v513_v55 = vadd.f32 %v507_v51, %v489_v54 }
  0x63   : > { %515 = vst.msk [vmem:[#allocation2 + $0x4] sm:$0x7] %vm310_vm1, %v512_v53 }
  0x64   : > { %516 = vst.msk [vmem:[#allocation2 + $0x8] sm:$0x7] %vm310_vm1, %v513_v55 }
  0x65 LB: >> { %v711_v56 = vor.u32 %v935_v30, %v930_v29  ;;  %v537_v57 = vperm.slane %v892_v16, 0  ;;  %v707_v58 = vor.u32 %v925_v26, %v919_v24  ;;  %s695_s14 = sshll.u32 %s755_s28, 2  ;;  %v703_v61 = vor.u32 %v914_v23, %v908_v21  ;;  %s713_s16 = sshll.u32 %s755_s28, 1  ;;  %s755_s28 = sphi %s953_s28, %s532_s28  }
  0x66   : >> { %s534_s15 = scalar_lea.vmem [#allocation2], %s695_s14  ;;  %v699_v63 = vor.u32 %v903_v20, %v897_v17  ;;  %vm569_vm2 = vcmask 523264   ;;  %s587_s19 = scalar_lea.vmem %s266_s7, %s713_s16  ;;  %v543_v3 = vperm.slane %v940_v31, 0  ;;  %vm595_vm3 = vcmask 517120  }
  0x67   : >> { %577 = vmatpush.bf16.msra.mxu0 %v711_v56  ;;  %v588_v2 = vld [vmem:[%s587_s19] sm:$0x3]  ;;  %s594_s23 = scalar_lea.vmem %s271_s10, %s713_s16  ;;  %s532_s28 = sadd.s32 1, %s755_s28  }
  0x68   : >> { %v589_v0 = vunpack.c.l.bf16 %v588_v2  ;;  %p529_p4 = scmp.ge.s32.totalorder %s532_s28, 4  }
  0x6b   : >> { %v535_v59 = vld [vmem:[%s534_s15] sm:$0xf]  ;;  %578 = vmatpush.bf16.msra.mxu0 %v707_v58 }
  0x6c   : >> { %v539_v60 = vadd.f32 %v537_v57, %v535_v59 }
  0x6e   : >> { %v540_v62 = vmax.f32 %v539_v60, 0.0 }
  0x6f   : >> { %579 = vmatpush.bf16.msra.mxu0 %v703_v61 }
  0x70   : >> { %v541_v1 = vpack.c.bf16 %v540_v62, %v540_v62 }
  0x73   : >> { %580 = vmatpush.bf16.msra.mxu0 %v699_v63 }
  0x76   : >> { %712 = vmatmul.msk.bf16.vlgmr.msra.gmra.mxu0 %vm569_vm2, %v541_v1 }
  0xf3   : >> { %v582_v4 = vpop.f32.mrf.mxu0 }
  0xf4   : >> { %v583_v34 = vadd.f32 %v582_v4, %v543_v3 }
  0xf6   : >> { %v590_v5 = vadd.f32 %v589_v0, %v583_v34 }
  0xf8   : >> { %v591_v6 = vmax.f32 %v590_v5, 0.0  ;;  %531 = sbr.rel (!%p529_p4) target bundleno = 101 (0x65), region = 96 }
  0xfa   : >> { %v592_v7 = vpack.c.bf16 %v591_v6, %v591_v6 }
  0xfb   : >> { %v584_v8 = vpop.f32.mrf.mxu0 }
  0xfc   : >> { %596 = vst.msk [vmem:[%s594_s23] sm:$0x3] %vm595_vm3, %v592_v7 }
  0xfd PF: > { %s16_s21 = sadd.s32 1, %s751_s21  }
  0xfe   : > { %p13_p5 = scmp.ge.s32.totalorder %s16_s21, 4  }
 0x100   :  { %15 = sbr.rel (!%p13_p5) target bundleno = 1 (0x1), region = 107 }

// kernel: encoder_forward.43
= control target key start
LH: loop header
LB: loop body
LE: loop exit
PB: predicated region body
PF: predicated region fallthrough
CT: control target
= control target key end

     0   :  { %s571_s21 = smov 0   ;;  %s704_s0 = inlined_call_operand.vmem [shape: bf16[2,2,2,128], index: 0, kind: input, shape index: {}]   ;;  %s705_s1 = inlined_call_operand.vmem [shape: f32[9,128], index: 1, kind: input, shape index: {}]   ;;  %s706_s2 = inlined_call_operand.vmem [shape: f32[1,128], index: 2, kind: input, shape index: {}]   ;;  %s707_s3 = inlined_call_operand.vmem [shape: bf16[128,128], index: 3, kind: input, shape index: {}]   ;;  %s708_s4 = inlined_call_operand.vmem [shape: f32[1,128], index: 4, kind: input, shape index: {}]   ;;  %s709_s5 = inlined_call_operand.vmem [shape: bf16[2,2,2,128], index: 5, kind: input, shape index: {}]   ;;  %s710_s6 = inlined_call_operand.vmem [shape: bf16[2,2,2,128], index: 6, kind: output, shape index: {}]  }
   0x1 LB: > { %s453_s22 = sadd.s32 4294967295, %s530_s21   ;;  %p457_p0 = scmp.ge.s32.totalorder %s530_s21, 1  ;;  %s530_s21 = sphi %s571_s21, %s16_s21  }
   0x2   : > { %p220_p1 = scmp.lt.s32.totalorder %s530_s21, 3 }
   0x4   : > { %p221_p2 = pnand %p457_p0, %p220_p1 }
   0x5   : > { %p252_p3 = scmp.lt.s32.totalorder (!%p221_p2), %s453_s22, 1  ;;  %s670_s27 = smov (!%p221_p2), 0  }
   0x6   : > { %224 = sbr.rel (%p221_p2) target bundleno = 191 (0xbf), region = 44 }
   0xb   : > { %v582_v0 = vld [vmem:[%s706_s2] sm:$0x1]  ;;  %v595_v3 = vld [vmem:[%s707_s3] sm:$0xf0]  ;;  %v600_v4 = vld [vmem:[%s707_s3 + $0x8] sm:$0xf] }
   0xc   : > { %v587_v1 = vld [vmem:[%s707_s3] sm:$0xf]  ;;  %s712_s22 = smov (!%p252_p3, %s453_s22), 1  ;;  %v605_v5 = vld [vmem:[%s707_s3 + $0x8] sm:$0xf0] }
   0xd   : > { %v264_v2 = vld [vmem:[%s705_s1] sm:$0xff]  ;;  %v610_v6 = vld [vmem:[%s707_s3 + $0x10] sm:$0xf]  ;;  %v615_v7 = vld [vmem:[%s707_s3 + $0x10] sm:$0xf0]  ;;  %s627_s19 = sshll.u32 %s712_s22, 1 }
   0xe   : > { %v620_v8 = vld [vmem:[%s707_s3 + $0x18] sm:$0xf]  ;;  %v625_v9 = vld [vmem:[%s707_s3 + $0x18] sm:$0xf0]  ;;  %v269_v10 = vperm.slane %v264_v2, 4  ;;  %s255_s28 = scalar_lea.vmem %s704_s0, %s627_s19  ;;  %s259_s30 = scalar_lea.vmem %s709_s5, %s627_s19 }
   0xf   : > { %v632_v11 = vld [vmem:[%s707_s3 + $0x20] sm:$0xf]  ;;  %v500_v12 = vld [vmem:[%s707_s3 + $0x20] sm:$0xf0]  ;;  %v484_v13 = vld [vmem:[%s707_s3 + $0x28] sm:$0xf]  ;;  %s263_s15 = scalar_lea.vmem %s710_s6, %s627_s19 }
  0x10   : > { %v501_v14 = vld [vmem:[%s707_s3 + $0x28] sm:$0xf0]  ;;  %v488_v15 = vld [vmem:[%s707_s3 + $0x30] sm:$0xf]  ;;  %v265_v16 = vld [vmem:[%s255_s28] sm:$0x1] }
  0x11   : > { %v266_v17 = vld [vmem:[%s255_s28 + $0x1] sm:$0x1]  ;;  %v502_v18 = vld [vmem:[%s707_s3 + $0x30] sm:$0xf0]  ;;  %v267_v19 = vunpack.c.l.bf16 %v265_v16  ;;  %v492_v21 = vld [vmem:[%s707_s3 + $0x38] sm:$0xf] }
  0x12   : > { %v268_v20 = vunpack.c.l.bf16 %v266_v17  ;;  %v503_v22 = vld [vmem:[%s707_s3 + $0x38] sm:$0xf0]  ;;  %v291_v23 = vld [vmem:[%s708_s4] sm:$0x1] }
  0x13   : > { %v270_v24 = vmul.f32 %v269_v10, %v267_v19 }
  0x14   : > { %v271_v25 = vmul.f32 %v269_v10, %v268_v20 }
  0x15   : > { %272 = vst [vmem:[#allocation2] sm:$0x3] %v270_v24 }
  0x16   : > { %273 = vst [vmem:[#allocation2 + $0x2] sm:$0x3] %v271_v25 }
  0x17 LB: >> { %v493_v26 = vor.u32 %v503_v22, %v492_v21  ;;  %v489_v27 = vor.u32 %v502_v18, %v488_v15  ;;  %v485_v28 = vor.u32 %v501_v14, %v484_v13  ;;  %v481_v29 = vor.u32 %v500_v12, %v632_v11  ;;  %s461_s28 = sshll.u32 %s534_s27, 1  ;;  %s371_s8 = scalar_lea.vmem %s259_s30, %s534_s27  ;;  %s534_s27 = sphi %s670_s27, %s297_s27  }
  0x18   : >> { %v477_v30 = vor.u32 %v625_v9, %v620_v8  ;;  %v302_v31 = vperm.slane %v582_v0, 0  ;;  %v473_v32 = vor.u32 %v615_v7, %v610_v6  ;;  %s299_s29 = scalar_lea.vmem [#allocation2], %s461_s28  ;;  %v469_v35 = vor.u32 %v605_v5, %v600_v4  ;;  %v372_v39 = vld [vmem:[%s371_s8] sm:$0x1]  ;;  %s377_s11 = scalar_lea.vmem %s263_s15, %s534_s27 }
  0x19   : >> { %358 = vmatpush.bf16.msra.mxu0 %v493_v26  ;;  %v465_v37 = vor.u32 %v595_v3, %v587_v1  ;;  %v308_v40 = vperm.slane %v291_v23, 0  ;;  %v373_v41 = vunpack.c.l.bf16 %v372_v39  ;;  %s297_s27 = sadd.s32 1, %s534_s27  }
  0x1a   : >> { %p294_p4 = scmp.ge.s32.totalorder %s297_s27, 2  }
  0x1d   : >> { %359 = vmatpush.bf16.msra.mxu0 %v489_v27  ;;  %v300_v33 = vld [vmem:[%s299_s29] sm:$0x3] }
  0x1e   : >> { %v304_v34 = vadd.f32 %v302_v31, %v300_v33 }
  0x20   : >> { %v305_v36 = vmax.f32 %v304_v34, 0.0 }
  0x21   : >> { %360 = vmatpush.bf16.msra.mxu0 %v485_v28 }
  0x22   : >> { %v306_v38 = vpack.c.bf16 %v305_v36, %v305_v36 }
  0x25   : >> { %361 = vmatpush.bf16.msra.mxu0 %v481_v29 }
  0x29   : >> { %362 = vmatpush.bf16.msra.mxu0 %v477_v30 }
  0x2d   : >> { %363 = vmatpush.bf16.msra.mxu0 %v473_v32 }
  0x31   : >> { %364 = vmatpush.bf16.msra.mxu0 %v469_v35 }
  0x35   : >> { %365 = vmatpush.bf16.msra.mxu0 %v465_v37 }
  0x38   : >> { %366 = vmatmul.bf16.vlgmr.msra.gmra.mxu0 %v306_v38 }
  0xb5   : >> { %v367_v42 = vpop.f32.mrf.mxu0 }
  0xb6   : >> { %v368_v43 = vadd.f32 %v367_v42, %v308_v40 }
  0xb8   : >> { %v374_v44 = vadd.f32 %v373_v41, %v368_v43 }
  0xba   : >> { %v375_v45 = vmax.f32 %v374_v44, 0.0  ;;  %296 = sbr.rel (!%p294_p4) target bundleno = 23 (0x17), region = 87 }
  0xbc   : >> { %v376_v46 = vpack.c.bf16 %v375_v45, %v375_v45 }
  0xbd   : >> { %v369_v47 = vpop.f32.mrf.mxu0 }
  0xbe   : >> { %378 = vst [vmem:[%s377_s11] sm:$0x1] %v376_v46 }
  0xbf PF: > { %s16_s21 = sadd.s32 1, %s530_s21  }
  0xc0   : > { %p13_p5 = scmp.ge.s32.totalorder %s16_s21, 4  }
  0xc2   :  { %15 = sbr.rel (!%p13_p5) target bundleno = 1 (0x1), region = 98 }

// kernel: encoder_forward.42
= control target key start
LH: loop header
LB: loop body
LE: loop exit
PB: predicated region body
PF: predicated region fallthrough
CT: control target
= control target key end

     0   :  { %s618_s18 = smov 0   ;;  %s788_s0 = inlined_call_operand.vmem [shape: bf16[2,2,2,128], index: 0, kind: input, shape index: {}]   ;;  %s789_s1 = inlined_call_operand.vmem [shape: f32[9,128], index: 1, kind: input, shape index: {}]   ;;  %s790_s2 = inlined_call_operand.vmem [shape: f32[1,128], index: 2, kind: input, shape index: {}]   ;;  %s791_s3 = inlined_call_operand.vmem [shape: bf16[128,128], index: 3, kind: input, shape index: {}]   ;;  %s792_s4 = inlined_call_operand.vmem [shape: f32[1,128], index: 4, kind: input, shape index: {}]   ;;  %s793_s5 = inlined_call_operand.vmem [shape: bf16[2,2,2,128], index: 5, kind: output, shape index: {}]  }
   0x1 LB: > { %s501_s19 = sadd.s32 4294967295, %s582_s18   ;;  %p505_p0 = scmp.ge.s32.totalorder %s582_s18, 1  ;;  %s582_s18 = sphi %s618_s18, %s15_s18  }
   0x2   : > { %p186_p1 = scmp.lt.s32.totalorder %s582_s18, 3 }
   0x4   : > { %p187_p2 = pnand %p505_p0, %p186_p1 }
   0x5   : > { %p212_p3 = scmp.lt.s32.totalorder (!%p187_p2), %s501_s19, 1  ;;  %s756_s21 = smov (!%p187_p2), 0  }
   0x6   : > { %190 = sbr.rel (%p187_p2) target bundleno = 236 (0xec), region = 40 }
   0xb   : > { %v629_v0 = vld [vmem:[%s789_s1] sm:$0xff]  ;;  %s795_s19 = smov (!%p212_p3, %s501_s19), 1  ;;  %v651_v4 = vld [vmem:[%s791_s3 + $0x8] sm:$0xf]  ;;  %v656_v5 = vld [vmem:[%s791_s3 + $0x8] sm:$0xf0] }
   0xc   : > { %v634_v1 = vld [vmem:[%s790_s2] sm:$0x1]  ;;  %249 = vst.sshfl [vmem:[#allocation1] sm:$0xff pattern:$0x73625140] %v629_v0  ;;  %s506_s11 = sshll.u32 %s795_s19, 1 }
   0xd   : > { %v639_v2 = vld [vmem:[%s791_s3] sm:$0xf]  ;;  %v645_v3 = vld [vmem:[%s791_s3] sm:$0xf0]  ;;  %v661_v6 = vld [vmem:[%s791_s3 + $0x10] sm:$0xf]  ;;  %s682_s20 = scalar_lea.vmem %s788_s0, %s506_s11  ;;  %s687_s19 = scalar_lea.vmem %s793_s5, %s506_s11 }
   0xe   : > { %269 = vst.sshfl [vmem:[#allocation1 + $0x20] sm:$0xff pattern:$0x73625140] %v629_v0  ;;  %v666_v7 = vld [vmem:[%s791_s3 + $0x10] sm:$0xf0]  ;;  %v226_v8 = vperm.slane %v629_v0, 4 }
   0xf   : > { %v672_v9 = vld [vmem:[%s791_s3 + $0x18] sm:$0xf]  ;;  %v677_v10 = vld [vmem:[%s791_s3 + $0x18] sm:$0xf0]  ;;  %v692_v11 = vld [vmem:[%s791_s3 + $0x20] sm:$0xf] }
  0x10   : > { %v697_v12 = vld [vmem:[%s791_s3 + $0x20] sm:$0xf0]  ;;  %v702_v13 = vld [vmem:[%s791_s3 + $0x28] sm:$0xf]  ;;  %v223_v14 = vld [vmem:[%s682_s20 + $0x1] sm:$0x1] }
  0x11   : > { %v222_v15 = vld [vmem:[%s682_s20] sm:$0x1]  ;;  %v225_v16 = vunpack.c.l.bf16 %v223_v14  ;;  %v710_v19 = vld [vmem:[%s791_s3 + $0x28] sm:$0xf0]  ;;  %v715_v20 = vld [vmem:[%s791_s3 + $0x30] sm:$0xf] }
  0x12   : > { %v224_v17 = vunpack.c.l.bf16 %v222_v15  ;;  %v231_v18 = vld [vmem:[%s682_s20] sm:$0x1]  ;;  %v720_v22 = vld [vmem:[%s791_s3 + $0x30] sm:$0xf0]  ;;  %v725_v23 = vld [vmem:[%s791_s3 + $0x38] sm:$0xf] }
  0x13   : > { %v251_v21 = vld [vmem:[#allocation1 + $0x1] ss:$4 sm:$0xff]  ;;  %v228_v24 = vmul.f32 %v226_v8, %v225_v16  ;;  %v736_v27 = vld [vmem:[%s792_s4] sm:$0x1]  ;;  %v232_v28 = vunpack.c.l.bf16 %v231_v18  ;;  %v241_v43 = vperm.slane %v629_v0, 1 }
  0x14   : > { %266 = vst.sshfl [vmem:[#allocation1] sm:$0xff pattern:$0x73625140] %v629_v0  ;;  %v227_v25 = vmul.f32 %v226_v8, %v224_v17  ;;  %v731_v26 = vld [vmem:[%s791_s3 + $0x38] sm:$0xf0]  ;;  %v252_v50 = vrot.slane %v251_v21, 7 }
  0x15   : > { %230 = vst [vmem:[#allocation2 + $0x2] sm:$0x3] %v228_v24  ;;  %v260_v29 = vld [vmem:[%s682_s20] sm:$0x1]  ;;  %v271_v30 = vld [vmem:[#allocation1 + $0x21] ss:$4 sm:$0xff]  ;;  %v235_v31 = vmul.f32 %v232_v28, %v629_v0 }
  0x16   : > { %229 = vst [vmem:[#allocation2] sm:$0x3] %v227_v25  ;;  %v262_v32 = vunpack.c.l.bf16 %v260_v29  ;;  %v238_v36 = vld [vmem:[%s682_s20] sm:$0x1]  ;;  %v510_v48 = vld [vmem:[%s682_s20 + $0x1] sm:$0x1] }
  0x17   : > { %293 = vst.sshfl [vmem:[#allocation1 + $0x20] sm:$0xff pattern:$0x73625140] %v629_v0  ;;  %v284_v37 = vld [vmem:[%s682_s20] sm:$0x1]  ;;  %v239_v42 = vunpack.c.l.bf16 %v238_v36  ;;  %v312_v57 = vunpack.c.l.bf16 %v510_v48  ;;  %v509_v60 = vrot.slane %v271_v30, 9 }
  0x18   : > { %v286_v44 = vunpack.c.l.bf16 %v284_v37  ;;  %v245_v49 = vld [vmem:[%s682_s20] sm:$0x1]  ;;  %v261_v54 = vld [vmem:[%s682_s20 + $0x1] sm:$0x1]  ;;  %v324_v24 = vperm.slane %v629_v0, 7 }
  0x19   : > { %v242_v46 = vmul.f32 %v241_v43, %v239_v42  ;;  %v246_v58 = vunpack.c.l.bf16 %v245_v49  ;;  %v263_v59 = vunpack.c.l.bf16 %v261_v54  ;;  %v511_v14 = vld [vmem:[%s682_s20 + $0x1] sm:$0x1] }
  0x1a   : > { %v285_v15 = vld [vmem:[%s682_s20 + $0x1] sm:$0x1]  ;;  %v322_v21 = vunpack.c.l.bf16 %v511_v14 }
  0x1b   : > { %v268_v33 = vld [vmem:[#allocation1 + $0x1] ss:$4 sm:$0xff]  ;;  %v254_v63 = vmul.f32 %v252_v50, %v246_v58  ;;  %v279_v16 = vmul.f32 %v509_v60, %v263_v59  ;;  %v287_v25 = vunpack.c.l.bf16 %v285_v15 }
  0x1c   : > { %v508_v34 = vrot.slane %v268_v33, 9  ;;  %290 = vst.sshfl [vmem:[#allocation1] sm:$0xff pattern:$0x73625140] %v629_v0  ;;  %v234_v35 = vld [vmem:[#allocation2 + $0x3] sm:$0x1] }
  0x1d   : > { %v236_v38 = vadd.f32 %v235_v31, %v234_v35  ;;  %v264_v39 = vld [vmem:[#allocation2 + $0x1] sm:$0x1]  ;;  %v288_v53 = vld [vmem:[#allocation2] sm:$0x1]  ;;  %v256_v18 = vperm.slane %v254_v63, 1  ;;  %v325_v35 = vmul.f32 %v324_v24, %v322_v21 }
  0x1e   : > { %v278_v40 = vmul.f32 %v508_v34, %v262_v32  ;;  %v295_v31 = vld [vmem:[#allocation1 + $0x22] ss:$4 sm:$0xff]  ;;  %v221_v33 = vld [vmem:[%s789_s1 + $0x8] sm:$0x1]  ;;  %v512_v34 = vld [vmem:[%s682_s20 + $0x1] sm:$0x1] }
  0x1f   : > { %237 = vst [vmem:[#allocation2 + $0x3] sm:$0x1] %v236_v38  ;;  %v299_v36 = vmul.f32 %v295_v31, %v287_v25  ;;  %v329_v37 = vunpack.c.l.bf16 %v512_v34  ;;  %v332_v38 = vrot.slane %v221_v33, 7 }
  0x20   : > { %v280_v41 = vadd.f32 %v278_v40, %v264_v39 }
  0x22   : > { %282 = vst [vmem:[#allocation2 + $0x1] sm:$0x1] %v280_v41  ;;  %v334_v41 = vmul.f32 %v332_v38, %v329_v37 }
  0x23   : > { %v292_v45 = vld [vmem:[#allocation1 + $0x2] ss:$4 sm:$0xff] }
  0x24   : > { %314 = vst.sshfl [vmem:[#allocation1] sm:$0xff pattern:$0x73625140] %v629_v0  ;;  %v298_v47 = vmul.f32 %v292_v45, %v286_v44  ;;  %v303_v0 = vperm.slane %v299_v36, 1  ;;  %v336_v44 = vperm.slane %v334_v41, 1 }
  0x26   : > { %v302_v51 = vperm.slane %v298_v47, 1  ;;  %v240_v52 = vld [vmem:[#allocation2 + $0x2] sm:$0x3] }
  0x27   : > { %v243_v55 = vadd.f32 %v242_v46, %v240_v52 }
  0x28   : > { %v306_v56 = vadd.f32 %v302_v51, %v288_v53 }
  0x29   : > { %244 = vst [vmem:[#allocation2 + $0x2] sm:$0x3] %v243_v55  ;;  %v313_v8 = vld [vmem:[#allocation2 + $0x1] sm:$0x1] }
  0x2a   : > { %308 = vst [vmem:[#allocation2] sm:$0x1] %v306_v56 }
  0x2b   : > { %v316_v61 = vld [vmem:[#allocation1 + $0x3] ss:$4 sm:$0xff] }
  0x2c   : > { %v318_v62 = vmul.f32 %v316_v61, %v312_v57 }
  0x2e   : > { %v319_v17 = vadd.f32 %v318_v62, %v313_v8 }
  0x30   : > { %320 = vst [vmem:[#allocation2 + $0x1] sm:$0x1] %v319_v17  ;;  %v247_v28 = vld [vmem:[#allocation2 + $0x2] sm:$0x1]  ;;  %v265_v29 = vld [vmem:[#allocation2 + $0x3] sm:$0x1] }
  0x31   : > { %v258_v30 = vadd.f32 %v256_v18, %v247_v28  ;;  %v281_v32 = vadd.f32 %v279_v16, %v265_v29 }
  0x33   : > { %259 = vst [vmem:[#allocation2 + $0x2] sm:$0x1] %v258_v30 }
  0x34   : > { %283 = vst [vmem:[#allocation2 + $0x3] sm:$0x1] %v281_v32 }
  0x37   : > { %v323_v39 = vld [vmem:[#allocation2] sm:$0x3] }
  0x38   : > { %v326_v40 = vadd.f32 %v325_v35, %v323_v39 }
  0x3a   : > { %327 = vst [vmem:[#allocation2] sm:$0x3] %v326_v40  ;;  %v289_v42 = vld [vmem:[#allocation2 + $0x2] sm:$0x1] }
  0x3b   : > { %v307_v43 = vadd.f32 %v303_v0, %v289_v42 }
  0x3d   : > { %309 = vst [vmem:[#allocation2 + $0x2] sm:$0x1] %v307_v43 }
  0x41   : > { %v330_v45 = vld [vmem:[#allocation2] sm:$0x1] }
  0x42   : > { %v338_v46 = vadd.f32 %v336_v44, %v330_v45 }
  0x44   : > { %339 = vst [vmem:[#allocation2] sm:$0x1] %v338_v46 }
  0x45 LB: >> { %v545_v47 = vor.u32 %v731_v26, %v725_v23  ;;  %v541_v48 = vor.u32 %v720_v22, %v715_v20  ;;  %v537_v49 = vor.u32 %v710_v19, %v702_v13  ;;  %v533_v50 = vor.u32 %v697_v12, %v692_v11  ;;  %s513_s20 = sshll.u32 %s586_s21, 1  ;;  %s438_s23 = scalar_lea.vmem %s687_s19, %s586_s21  ;;  %s586_s21 = sphi %s756_s21, %s363_s21  }
  0x46   : >> { %v529_v51 = vor.u32 %v677_v10, %v672_v9  ;;  %v368_v52 = vperm.slane %v634_v1, 0  ;;  %v525_v53 = vor.u32 %v666_v7, %v661_v6  ;;  %s365_s22 = scalar_lea.vmem [#allocation2], %s513_s20  ;;  %v521_v56 = vor.u32 %v656_v5, %v651_v4  ;;  %s363_s21 = sadd.s32 1, %s586_s21  }
  0x47   : >> { %424 = vmatpush.bf16.msra.mxu0 %v545_v47  ;;  %v517_v58 = vor.u32 %v645_v3, %v639_v2  ;;  %v374_v60 = vperm.slane %v736_v27, 0  ;;  %p360_p4 = scmp.ge.s32.totalorder %s363_s21, 2  }
  0x4b   : >> { %425 = vmatpush.bf16.msra.mxu0 %v541_v48  ;;  %v366_v54 = vld [vmem:[%s365_s22] sm:$0x3] }
  0x4c   : >> { %v370_v55 = vadd.f32 %v368_v52, %v366_v54 }
  0x4e   : >> { %v371_v57 = vmax.f32 %v370_v55, 0.0 }
  0x4f   : >> { %426 = vmatpush.bf16.msra.mxu0 %v537_v49 }
  0x50   : >> { %v372_v59 = vpack.c.bf16 %v371_v57, %v371_v57 }
  0x53   : >> { %427 = vmatpush.bf16.msra.mxu0 %v533_v50 }
  0x57   : >> { %428 = vmatpush.bf16.msra.mxu0 %v529_v51 }
  0x5b   : >> { %429 = vmatpush.bf16.msra.mxu0 %v525_v53 }
  0x5f   : >> { %430 = vmatpush.bf16.msra.mxu0 %v521_v56 }
  0x63   : >> { %431 = vmatpush.bf16.msra.mxu0 %v517_v58 }
  0x66   : >> { %432 = vmatmul.bf16.vlgmr.msra.gmra.mxu0 %v372_v59 }
  0xe3   : >> { %v433_v61 = vpop.f32.mrf.mxu0 }
  0xe4   : >> { %v434_v62 = vadd.f32 %v433_v61, %v374_v60 }
  0xe6   : >> { %v437_v63 = vpack.c.bf16 %v434_v62, %v434_v62 }
  0xe7   : > { %362 = sbr.rel (!%p360_p4) target bundleno = 69 (0x45), region = 87 }
  0xe8   : >> { %439 = vst [vmem:[%s438_s23] sm:$0x1] %v437_v63 }
  0xeb   : >> { %v435_v8 = vpop.f32.mrf.mxu0 }
  0xec PF: > { %s15_s18 = sadd.s32 1, %s582_s18  }
  0xed   : > { %p12_p5 = scmp.ge.s32.totalorder %s15_s18, 4  }
  0xef   :  { %14 = sbr.rel (!%p12_p5) target bundleno = 1 (0x1), region = 98 }

// kernel: encoder_forward.41
= control target key start
LH: loop header
LB: loop body
LE: loop exit
PB: predicated region body
PF: predicated region fallthrough
CT: control target
= control target key end

     0   :  { %s690_s17 = smov 64   ;;  %vm146_vm0 = vcmask 523264   ;;  %s863_s0 = inlined_call_operand.vmem [shape: bf16[8,576], index: 0, kind: input, shape index: {}]   ;;  %s864_s1 = inlined_call_operand.vmem [shape: bf16[576,128], index: 1, kind: input, shape index: {}]   ;;  %s865_s2 = inlined_call_operand.vmem [shape: bf16[64,128], index: 2, kind: input, shape index: {}]   ;;  %s866_s3 = inlined_call_operand.vmem [shape: f32[1,128], index: 3, kind: input, shape index: {}]   ;;  %s867_s4 = inlined_call_operand.vmem [shape: bf16[8,128], index: 4, kind: output, shape index: {}]  }
   0x1   :  { %v719_v0 = vld [vmem:[%s863_s0 + $0x10] sm:$0xf]  ;;  %v645_v2 = vld [vmem:[%s864_s1 + $0x38] sm:$0xff]  ;;  %v643_v10 = vld [vmem:[%s864_s1 + $0x28] sm:$0xff] }
   0x2   :  { %v97_v1 = vunpack.c.l.bf16 %v719_v0  ;;  %v653_v3 = vld [vmem:[%s864_s1 + $0x78] sm:$0xff]  ;;  %399 = vmatpush.bf16.msra.mxu1 %v645_v2  ;;  %v644_v5 = vld [vmem:[%s864_s1 + $0x30] sm:$0xff]  ;;  %v651_v11 = vld [vmem:[%s864_s1 + $0x68] sm:$0xff]  ;;  %v170_v52 = vunpack.c.l.b16 %v719_v0 }
   0x3   :  { %v661_v4 = vld [vmem:[%s864_s1 + $0xb8] sm:$0xff]  ;;  %412 = vmatpush.bf16.msra.mxu2 %v653_v3  ;;  %v652_v6 = vld [vmem:[%s864_s1 + $0x70] sm:$0xff]  ;;  %v659_v12 = vld [vmem:[%s864_s1 + $0xa8] sm:$0xff] }
   0x4   :  { %104 = vrot.lane.b32.xlu0 %v97_v1, %s690_s17  ;;  %v677_v7 = vld [vmem:[%s865_s2 + $0x18] sm:$0xff]  ;;  %425 = vmatpush.bf16.msra.mxu3 %v661_v4  ;;  %v660_v8 = vld [vmem:[%s864_s1 + $0xb0] sm:$0xff]  ;;  %v675_v13 = vld [vmem:[%s865_s2 + $0x8] sm:$0xff]  ;;  %v175_v55 = vpack.c.b16 %v170_v52, %v170_v52 }
   0x5   :  { %154 = vmatpush.bf16.msra.mxu0 %v677_v7  ;;  %v676_v9 = vld [vmem:[%s865_s2 + $0x10] sm:$0xff]  ;;  %v642_v14 = vld [vmem:[%s864_s1 + $0x20] sm:$0xff]  ;;  %v669_v18 = vld [vmem:[%s864_s1 + $0xf8] sm:$0xff] }
   0x6   :  { %400 = vmatpush.bf16.msra.mxu1 %v644_v5  ;;  %v650_v15 = vld [vmem:[%s864_s1 + $0x60] sm:$0xff]  ;;  %v641_v19 = vld [vmem:[%s864_s1 + $0x18] sm:$0xff]  ;;  %v668_v22 = vld [vmem:[%s864_s1 + $0xf0] sm:$0xff] }
   0x7   :  { %413 = vmatpush.bf16.msra.mxu2 %v652_v6  ;;  %v658_v16 = vld [vmem:[%s864_s1 + $0xa0] sm:$0xff]  ;;  %v649_v20 = vld [vmem:[%s864_s1 + $0x58] sm:$0xff]  ;;  %v640_v23 = vld [vmem:[%s864_s1 + $0x10] sm:$0xff] }
   0x8   :  { %426 = vmatpush.bf16.msra.mxu3 %v660_v8  ;;  %v674_v17 = vld [vmem:[%s865_s2] sm:$0xff]  ;;  %v657_v21 = vld [vmem:[%s864_s1 + $0x98] sm:$0xff]  ;;  %v648_v24 = vld [vmem:[%s864_s1 + $0x50] sm:$0xff] }
   0x9   :  { %155 = vmatpush.bf16.msra.mxu0 %v676_v9  ;;  %v656_v25 = vld [vmem:[%s864_s1 + $0x90] sm:$0xff]  ;;  %v798_v26 = vld [vmem:[%s863_s0 + $0x8] sm:$0xff]   ;;  %v638_v32 = vld [vmem:[%s864_s1] sm:$0xff] }
   0xa   :  { %401 = vmatpush.bf16.msra.mxu1 %v643_v10  ;;  %v639_v27 = vld [vmem:[%s864_s1 + $0x8] sm:$0xff]  ;;  %v681_v30 = vunpack.c.h.bf16 %v798_v26  ;;  %v680_v31 = vunpack.c.l.bf16 %v798_v26  ;;  %v18_v36 = vld [vmem:[%s863_s0] sm:$0xff]  ;;  %v673_v43 = vld [vmem:[%s864_s1 + $0x118] sm:$0xff]  ;;  %v168_v45 = vunpack.c.l.b16 %v798_v26  ;;  %v169_v63 = vunpack.c.h.b16 %v798_v26 }
   0xb   :  { %414 = vmatpush.bf16.msra.mxu2 %v651_v11  ;;  %v647_v28 = vld [vmem:[%s864_s1 + $0x48] sm:$0xff]  ;;  %v166_v37 = vunpack.c.l.b16 %v18_v36  ;;  %v646_v38 = vld [vmem:[%s864_s1 + $0x40] sm:$0xff]  ;;  %v167_v41 = vunpack.c.h.b16 %v18_v36  ;;  %v672_v48 = vld [vmem:[%s864_s1 + $0x110] sm:$0xff] }
   0xc   :  { %427 = vmatpush.bf16.msra.mxu3 %v659_v12  ;;  %v655_v29 = vld [vmem:[%s864_s1 + $0x88] sm:$0xff]  ;;  %v654_v42 = vld [vmem:[%s864_s1 + $0x80] sm:$0xff]  ;;  %v173_v47 = vpack.c.b16 %v168_v45, %v168_v45  ;;  %v665_v49 = vld [vmem:[%s864_s1 + $0xd8] sm:$0xff]  ;;  %v174_v0 = vpack.c.b16 %v169_v63, %v169_v63 }
   0xd   :  { %156 = vmatpush.bf16.msra.mxu0 %v675_v13  ;;  %v667_v39 = vld [vmem:[%s864_s1 + $0xe8] sm:$0xff]  ;;  %v171_v40 = vpack.c.b16 %v166_v37, %v166_v37  ;;  %v172_v44 = vpack.c.b16 %v167_v41, %v167_v41  ;;  %v666_v46 = vld [vmem:[%s864_s1 + $0xe0] sm:$0xff]  ;;  %v664_v51 = vld [vmem:[%s864_s1 + $0xd0] sm:$0xff] }
   0xe   :  { %402 = vmatpush.bf16.msra.mxu1 %v642_v14  ;;  %v671_v50 = vld [vmem:[%s864_s1 + $0x108] sm:$0xff]  ;;  %v670_v53 = vld [vmem:[%s864_s1 + $0x100] sm:$0xff] }
   0xf   :  { %415 = vmatpush.bf16.msra.mxu2 %v650_v15  ;;  %v663_v54 = vld [vmem:[%s864_s1 + $0xc8] sm:$0xff]  ;;  %v662_v56 = vld [vmem:[%s864_s1 + $0xc0] sm:$0xff] }
  0x10   :  { %428 = vmatpush.bf16.msra.mxu3 %v658_v16  ;;  %v689_v16 = vld [vmem:[%s866_s3] ss:$0 sm:$0xff] }
  0x11   :  { %157 = vmatpush.bf16.msra.mxu0 %v674_v17 }
  0x12   :  { %403 = vmatpush.bf16.msra.mxu1 %v641_v19 }
  0x13   :  { %416 = vmatpush.bf16.msra.mxu2 %v649_v20 }
  0x14   :  { %429 = vmatpush.bf16.msra.mxu3 %v657_v21 }
  0x15   :  { %438 = vmatpush.bf16.msrb.mxu0 %v669_v18 }
  0x16   :  { %404 = vmatpush.bf16.msra.mxu1 %v640_v23 }
  0x17   :  { %417 = vmatpush.bf16.msra.mxu2 %v648_v24 }
  0x18   :  { %430 = vmatpush.bf16.msra.mxu3 %v656_v25 }
  0x19   :  { %439 = vmatpush.bf16.msrb.mxu0 %v668_v22 }
  0x1a   :  { %405 = vmatpush.bf16.msra.mxu1 %v639_v27 }
  0x1b   :  { %418 = vmatpush.bf16.msra.mxu2 %v647_v28 }
  0x1c   :  { %431 = vmatpush.bf16.msra.mxu3 %v655_v29 }
  0x1d   :  { %440 = vmatpush.bf16.msrb.mxu0 %v667_v39 }
  0x1e   :  { %406 = vmatpush.bf16.msra.mxu1 %v638_v32 }
  0x1f   :  { %419 = vmatpush.bf16.msra.mxu2 %v646_v38 }
  0x20   :  { %432 = vmatpush.bf16.msra.mxu3 %v654_v42 }
  0x21   :  { %407 = vmatmul.bf16.vlgmr.msra.gmra.mxu1 %v171_v40  ;;  %441 = vmatpush.bf16.msrb.mxu0 %v666_v46 }
  0x22   :  { %455 = vmatpush.bf16.msrb.mxu1 %v673_v43  ;;  %420 = vmatmul.bf16.vlgmr.msra.gmra.mxu2 %v172_v44 }
  0x23   :  { %433 = vmatmul.bf16.vlgmr.msra.gmra.mxu3 %v173_v47 }
  0x25   :  { %442 = vmatpush.bf16.msrb.mxu0 %v665_v49 }
  0x26   :  { %456 = vmatpush.bf16.msrb.mxu1 %v672_v48 }
  0x29   :  { %443 = vmatpush.bf16.msrb.mxu0 %v664_v51 }
  0x2a   :  { %457 = vmatpush.bf16.msrb.mxu1 %v671_v50 }
  0x2d   :  { %444 = vmatpush.bf16.msrb.mxu0 %v663_v54 }
  0x2e   :  { %458 = vmatpush.bf16.msrb.mxu1 %v670_v53 }
  0x31   :  { %637 = vmatmul.msk.bf16.vlgmr.msrb.gmra.mxu1 %vm146_vm0, %v175_v55  ;;  %445 = vmatpush.bf16.msrb.mxu0 %v662_v56 }
  0x76   :  { %v105_v33 = vpop.permute.xlu0 %104 }
  0x77   :  { %v107_v34 = vmax.f32 %v681_v30, %v105_v33 }
  0x79   :  { %v684_v35 = vpack.i.bf16 %v107_v34, %v680_v31 }
  0x7b   :  { %685 = vrot.lane.b32.xlu0 %v684_v35, %s690_s17 }
  0x9e   :  { %v408_v1 = vpop.f32.mrf.mxu1 }
  0xa5   :  { %v421_v3 = vpop.f32.mrf.mxu2 }
  0xa6   :  { %v410_v2 = vpop.f32.mrf.mxu1  ;;  %v434_v4 = vpop.f32.mrf.mxu3 }
  0xad   :  { %v423_v6 = vpop.f32.mrf.mxu2 }
  0xae   :  { %v460_v5 = vpop.f32.mrf.mxu1  ;;  %v436_v7 = vpop.f32.mrf.mxu3 }
  0xb6   :  { %v462_v8 = vpop.f32.mrf.mxu1 }
  0xed   :  { %v686_v57 = vpop.permute.xlu0 %685 }
  0xee   :  { %v687_v58 = vunpack.i.l.bf16 %v686_v57  ;;  %v688_v59 = vunpack.i.h.bf16 %v686_v57 }
  0xf0   :  { %v102_v60 = vmax.f32 %v680_v31, %v687_v58 }
  0xf2   :  { %v112_v61 = vmax.f32 %v102_v60, %v688_v59 }
  0xf4   :  { %v113_v62 = vpack.c.bf16 %v112_v61, %v112_v61 }
  0xf6   :  { %492 = vmatmul.msk.bf16.vlgmr.msra.gmra.mxu0 %vm146_vm0, %v113_v62 }
 0x106   :  { %446 = vmatmul.bf16.vlgmr.msrb.gmra.mxu0 %v174_v0 }
 0x173   :  { %v159_v9 = vpop.f32.mrf.mxu0 }
 0x174   :  { %v409_v10 = vadd.f32 %v408_v1, %v159_v9 }
 0x176   :  { %v422_v12 = vadd.f32 %v421_v3, %v409_v10 }
 0x178   :  { %v435_v13 = vadd.f32 %v434_v4, %v422_v12 }
 0x17b   :  { %v161_v11 = vpop.f32.mrf.mxu0 }
 0x183   :  { %v447_v14 = vpop.f32.mrf.mxu0 }
 0x184   :  { %v448_v15 = vadd.f32 %v447_v14, %v435_v13 }
 0x186   :  { %v461_v17 = vadd.f32 %v460_v5, %v448_v15 }
 0x188   :  { %v468_v18 = vadd.f32 %v689_v16, %v461_v17 }
 0x18a   :  { %v469_v19 = vmax.f32 %v468_v18, 0.0 }
 0x18b   :  { %v449_v20 = vpop.f32.mrf.mxu0 }
 0x18c   :  { %v470_v21 = vpack.c.bf16 %v469_v19, %v469_v19 }
 0x18e   :  { %471 = vst [vmem:[%s867_s4] sm:$0xf] %v470_v21 }

</bundles_post_ra>
